<compile_context>
chip_gen: v7x
topology: tpu7x:2x2x1
jax: 0.10.0
libtpu: 0.0.40
codegen_flags: <defaults>
</compile_context>

<pallas_src>
import functools

import jax
import jax.numpy as jnp
from jax.experimental import pallas as pl
from jax.experimental.pallas import tpu as pltpu

VMEM_LIMIT = 32 * 1024 * 1024  # safe on v5e/v6e (128 MiB) and v7x (64 MiB)


def _pick_tile(total, target):
    """Largest divisor of `total` that is a multiple of 8 and <= target."""
    if total < 8:
        return total
    best = None
    for d in range(8, min(total, target) + 1, 8):
        if total % d == 0:
            best = d
    return best if best is not None else total


def _pick_row_chunk(H, W, target_rows=256):
    """Largest divisor of H with chunk_rows * W roughly <= target_rows."""
    want = max(1, target_rows // max(W, 1))
    best = 1
    for d in range(1, H + 1):
        if H % d == 0 and d <= want:
            best = d
    return best


# ---------------------------------------------------------------------------
# Kernel A: fused conv1(1x1)+bn1+relu -> padded VMEM slab -> conv2(3x3)+bn2+relu
#           + per-image spatial mean of h2 (for the SE branch).
# ---------------------------------------------------------------------------
def _conv12_pool_kernel(x_ref, w1_ref, b1_ref, w2_ref, b2_ref,
                        h2_ref, pool_ref, slab_ref, *, H, W, Wp, HEAD, hb):
    """Slab layout: flattened padded rows of width Wp (Wp >= W+2, Wp % 16 == 0).
    Padded-row r (r=0 top pad, 1..H image rows, H+1 bottom pad) occupies slab
    rows [HEAD + r*Wp, HEAD + (r+1)*Wp); pixels sit in columns [0, W), columns
    [W, Wp) stay zero, so the "column -1" neighbour of any pixel is the zero
    right-pad of the previous slab row.  All slab writes are sublane-aligned;
    only the kx=0/2 tap reads are off-by-one (handled by one extended read per
    kx that covers all three ky taps)."""
    Cp = w1_ref.shape[1]
    f32 = jnp.float32

    # zero the whole slab (top/bottom pad rows, right-pad columns, HEAD/tail
    # guard rows used by the kx=0 tap)
    slab_ref[...] = jnp.zeros_like(slab_ref)

    nchunks = H // hb

    # -- phase 1: conv1 (1x1) + bias + relu, written into the padded slab ----
    for c in range(nchunks):
        r0 = c * hb * W
        h1 = jnp.dot(x_ref[0, r0:r0 + hb * W, :], w1_ref[...],
                     preferred_element_type=f32)
        h1 = jnp.maximum(h1 + b1_ref[...], 0.0).astype(slab_ref.dtype)
        for j in range(hb):
            ho = c * hb + j
            dst = HEAD + (ho + 1) * Wp          # aligned (HEAD, Wp % 16 == 0)
            slab_ref[dst:dst + W, :] = h1[j * W:(j + 1) * W, :]

    # -- phase 2: conv2 (3x3, pad=1) + bias + relu, dense store + pool -------
    L = hb * Wp
    col = jax.lax.broadcasted_iota(jnp.int32, (L, 1), 0) % Wp
    valid = col < W                              # mask out padded columns
    pool = jnp.zeros((1, Cp), f32)
    for c in range(nchunks):
        base = HEAD + c * hb * Wp
        acc = jnp.zeros((L, Cp), f32)
        for kx in range(3):
            # one (possibly off-by-one) slab read per kx covers all three ky
            ext = slab_ref[base + kx - 1:base + kx - 1 + L + 2 * Wp, :]
            for ky in range(3):
                acc = acc + jnp.dot(ext[ky * Wp:ky * Wp + L, :],
                                    w2_ref[3 * ky + kx],
                                    preferred_element_type=f32)
        y = jnp.maximum(acc + b2_ref[...], 0.0)                  # (L, Cp) f32
        pool = pool + jnp.sum(jnp.where(valid, y, 0.0), axis=0, keepdims=True)
        yb = y.astype(h2_ref.dtype)
        for j in range(hb):                      # aligned valid-column slices
            ho = c * hb + j
            h2_ref[0, ho * W:(ho + 1) * W, :] = yb[j * Wp:j * Wp + W, :]

    pool_ref[...] = (pool * (1.0 / (H * W)))[None]


def conv12_pool(x2d, w1, b1, w2, b2, *, H, W):
    """x2d: (N, H*W, Cin) bf16; w1: (Cin, Cp) bf16 (bn1 scale folded);
    b1: (1, Cp) f32; w2: (9, Cp, Cp) bf16 (bn2 scale folded); b2: (1, Cp) f32.
    Returns h2 (N, H*W, Cp) bf16 and mean(h2) (N, 1, Cp) f32."""
    N, HW, Cin = x2d.shape
    assert HW == H * W and W % 8 == 0, "requires W % 8 == 0"
    Cp = w1.shape[1]
    Wp = ((W + 2 + 15) // 16) * 16       # padded row width, sublane aligned
    HEAD = 16                            # zero guard rows before the top pad
    S = HEAD + (H + 2) * Wp + 16         # slab rows (incl. tail guard)
    hb = _pick_row_chunk(H, W)           # image rows per in-kernel chunk
    kernel = functools.partial(_conv12_pool_kernel,
                               H=H, W=W, Wp=Wp, HEAD=HEAD, hb=hb)
    return pl.pallas_call(
        kernel,
        out_shape=(jax.ShapeDtypeStruct((N, HW, Cp), jnp.bfloat16),
                   jax.ShapeDtypeStruct((N, 1, Cp), jnp.float32)),
        grid=(N,),
        in_specs=[
            pl.BlockSpec((1, HW, Cin), lambda n: (n, 0, 0)),
            pl.BlockSpec((Cin, Cp), lambda n: (0, 0)),
            pl.BlockSpec((1, Cp), lambda n: (0, 0)),
            pl.BlockSpec((9, Cp, Cp), lambda n: (0, 0, 0)),
            pl.BlockSpec((1, Cp), lambda n: (0, 0)),
        ],
        out_specs=(pl.BlockSpec((1, HW, Cp), lambda n: (n, 0, 0)),
                   pl.BlockSpec((1, 1, Cp), lambda n: (n, 0, 0))),
        scratch_shapes=[pltpu.VMEM((S, Cp), jnp.bfloat16)],
        compiler_params=pltpu.CompilerParams(
            dimension_semantics=("parallel",),
            vmem_limit_bytes=VMEM_LIMIT),
    )(x2d, w1, b1, w2, b2)


# ---------------------------------------------------------------------------
# Kernel B: fused conv3 (1x1) + bn3 bias + SE-gate scale + residual add + ReLU
#           spatially tiled, both grid axes parallel.
# ---------------------------------------------------------------------------
def _conv3_gate_residual_kernel(h2_ref, w3_ref, b3_ref, g_ref, r_ref, y_ref):
    out = jnp.dot(h2_ref[0], w3_ref[...],
                  preferred_element_type=jnp.float32) + b3_ref[...]
    y = jnp.maximum(g_ref[0] * out + r_ref[0].astype(jnp.float32), 0.0)
    y_ref[...] = y[None].astype(y_ref.dtype)


def conv3_gate_residual(h2, w3, b3, gate, resid, *, tm_target=512):
    """h2: (N, HW, Cp) bf16; w3: (Cp, C4) bf16 (bn3 scale folded);
    b3: (1, C4) f32; gate: (N, 1, C4) f32; resid: (N, HW, C4) bf16."""
    N, HW, Cp = h2.shape
    C4 = w3.shape[1]
    TM = _pick_tile(HW, tm_target)
    return pl.pallas_call(
        _conv3_gate_residual_kernel,
        out_shape=jax.ShapeDtypeStruct((N, HW, C4), jnp.bfloat16),
        grid=(N, HW // TM),
        in_specs=[
            pl.BlockSpec((1, TM, Cp), lambda n, m: (n, m, 0)),
            pl.BlockSpec((Cp, C4), lambda n, m: (0, 0)),
            pl.BlockSpec((1, C4), lambda n, m: (0, 0)),
            pl.BlockSpec((1, 1, C4), lambda n, m: (n, 0, 0)),
            pl.BlockSpec((1, TM, C4), lambda n, m: (n, m, 0)),
        ],
        out_specs=pl.BlockSpec((1, TM, C4), lambda n, m: (n, m, 0)),
        compiler_params=pltpu.CompilerParams(
            dimension_semantics=("parallel", "parallel"),
            vmem_limit_bytes=VMEM_LIMIT),
    )(h2, w3, b3, gate, resid)


# ---------------------------------------------------------------------------
# Parameters (deterministic; matches Bottleneck.__init__ shapes) + BN folding
# ---------------------------------------------------------------------------
def _fold_bn(gamma, beta, mean, var, eps=1e-5):
    scale = gamma / jnp.sqrt(var + eps)
    bias = beta - mean * scale
    return scale, bias


def make_params(key, inplanes, planes):
    c4 = planes * 4
    cr = planes // 4
    ks = jax.random.split(key, 8)

    def w(k, shape, fan_in):
        return jax.random.normal(k, shape, jnp.float32) / jnp.sqrt(fan_in)

    p = {}
    p["w1"] = w(ks[0], (inplanes, planes), inplanes)
    p["w2"] = w(ks[1], (3, 3, planes, planes), 9 * planes)
    p["w3"] = w(ks[2], (planes, c4), planes)
    p["wd"] = w(ks[3], (c4, cr), c4)
    p["wu"] = w(ks[4], (cr, c4), cr)

    def bn(k, c):
        kg, kb, km, kv = jax.random.split(k, 4)
        gamma = 1.0 + 0.1 * jax.random.normal(kg, (c,), jnp.float32)
        beta = 0.1 * jax.random.normal(kb, (c,), jnp.float32)
        mean = 0.1 * jax.random.normal(km, (c,), jnp.float32)
        var = jnp.abs(jax.random.normal(kv, (c,), jnp.float32)) + 0.5
        return _fold_bn(gamma, beta, mean, var)

    p["s1"], p["b1"] = bn(ks[5], planes)
    p["s2"], p["b2"] = bn(ks[6], planes)
    p["s3"], p["b3"] = bn(ks[7], c4)
    return p


def prepare_params(p):
    """Fold BN scales into the conv weights, cast matmul weights to bf16."""
    planes = p["w1"].shape[1]
    c4 = p["w3"].shape[1]
    return {
        "w1": (p["w1"] * p["s1"][None, :]).astype(jnp.bfloat16),
        "b1": p["b1"].reshape(1, planes).astype(jnp.float32),
        "w2": (p["w2"] * p["s2"][None, None, None, :]
               ).reshape(9, planes, planes).astype(jnp.bfloat16),
        "b2": p["b2"].reshape(1, planes).astype(jnp.float32),
        "w3": (p["w3"] * p["s3"][None, :]).astype(jnp.bfloat16),
        "b3": p["b3"].reshape(1, c4).astype(jnp.float32),
        "wd": p["wd"].astype(jnp.float32),
        "wu": p["wu"].astype(jnp.float32),
    }


# ---------------------------------------------------------------------------
# Forward pass (hot paths in the two Pallas kernels; SE MLP is tiny plain JAX)
# ---------------------------------------------------------------------------
def bottleneck_forward(x_nchw, prep, stride=1):
    if stride != 1:
        # TODO(synk): stride != 1 / a non-None downsample branch would need its
        # own kernel; the identity residual path here requires stride == 1.
        raise NotImplementedError("stride != 1 requires a downsample kernel")
    f32 = jnp.float32
    x = jnp.transpose(x_nchw, (0, 2, 3, 1)).astype(f32)      # NHWC
    N, H, W, Cin = x.shape
    c4 = prep["w3"].shape[1]
    assert Cin == c4, "identity residual requires inplanes == 4*planes"

    # single bf16 cast of x: reused as conv1 input AND as the residual
    x2d = x.reshape(N, H * W, Cin).astype(jnp.bfloat16)

    # fused conv1 + pad + conv2 (+ spatial mean of h2)
    h2, pooled = conv12_pool(x2d, prep["w1"], prep["b1"],
                             prep["w2"], prep["b2"], H=H, W=W)

    # SE gate (tiny): pool(bn3(conv3(h2))) == mean(h2) @ w3_scaled + b3
    pool3 = pooled[:, 0, :] @ prep["w3"].astype(f32) + prep["b3"]
    z = jnp.maximum(pool3 @ prep["wd"], 0.0) @ prep["wu"]
    gate = jax.nn.sigmoid(z)[:, None, :]                      # (N, 1, C4)

    # fused conv3 + bn3 bias + gate*out + residual + relu
    y = conv3_gate_residual(h2, prep["w3"], prep["b3"], gate, x2d)
    y = y.reshape(N, H, W, c4).astype(f32)
    return jnp.transpose(y, (0, 3, 1, 2))                     # NCHW


# ---------------------------------------------------------------------------
# Pure-JAX reference (mirrors the bf16 cast points of the kernel path)
# ---------------------------------------------------------------------------
def bottleneck_ref(x_nchw, prep):
    f32 = jnp.float32
    x = jnp.transpose(x_nchw, (0, 2, 3, 1)).astype(f32)
    N, H, W, _ = x.shape
    planes = prep["w1"].shape[1]

    xb = x.astype(jnp.bfloat16).astype(f32)
    h1 = jnp.maximum(jnp.einsum("nhwc,cd->nhwd", xb,
                                prep["w1"].astype(f32)) + prep["b1"], 0.0)
    h1 = h1.astype(jnp.bfloat16).astype(f32)

    xp = jnp.pad(h1, ((0, 0), (1, 1), (1, 1), (0, 0)))
    w2 = prep["w2"].astype(f32)                               # (9, Cp, Cp)
    acc = jnp.zeros((N, H, W, planes), f32)
    for ky in range(3):
        for kx in range(3):
            patch = xp[:, ky:ky + H, kx:kx + W, :]
            acc = acc + jnp.einsum("nhwc,cd->nhwd", patch, w2[3 * ky + kx])
    h2_f32 = jnp.maximum(acc + prep["b2"], 0.0)
    h2_b = h2_f32.astype(jnp.bfloat16).astype(f32)

    w3 = prep["w3"].astype(f32)
    out3 = jnp.einsum("nhwc,cd->nhwd", h2_b, w3) + prep["b3"]

    pooled = h2_f32.mean(axis=(1, 2)) @ w3 + prep["b3"]       # linearity path
    z = jnp.maximum(pooled @ prep["wd"], 0.0) @ prep["wu"]
    gate = jax.nn.sigmoid(z)[:, None, None, :]

    y = jnp.maximum(gate * out3 + xb, 0.0)
    return jnp.transpose(y, (0, 3, 1, 2))


if __name__ == "__main__":
    # inplanes == 4*planes so the identity residual path (downsample=None,
    # stride=1) is valid, matching the PyTorch module's usage.
    N, planes, H, W = 2, 8, 16, 16
    inplanes = planes * 4

    key = jax.random.PRNGKey(0)
    kx_, kp = jax.random.split(key)
    x = jax.random.normal(kx_, (N, inplanes, H, W), jnp.float32)   # NCHW

    params = make_params(kp, inplanes, planes)
    prep = prepare_params(params)

    fwd = jax.jit(functools.partial(bottleneck_forward, stride=1))
    y = jax.block_until_ready(fwd(x, prep))

    y_ref = bottleneck_ref(x, prep)
    assert y.shape == (N, inplanes, H, W), y.shape
    max_err = float(jnp.max(jnp.abs(y - y_ref)))
    assert jnp.allclose(y, y_ref, atol=2e-2, rtol=2e-2), \
        f"mismatch vs reference (max abs err {max_err})"

    print("KERNEL_OK")
</pallas_src>

<mosaic_0001>
module attributes {stable_mosaic.version = 11 : i64} {
  func.func @_conv12_pool_kernel(%arg0: i32, %arg1: memref<1x256x32xbf16, #tpu.memory_space<vmem>>, %arg2: memref<32x8xbf16, #tpu.memory_space<vmem>>, %arg3: memref<1x8xf32, #tpu.memory_space<vmem>>, %arg4: memref<9x8x8xbf16, #tpu.memory_space<vmem>>, %arg5: memref<1x8xf32, #tpu.memory_space<vmem>>, %arg6: memref<1x256x8xbf16, #tpu.memory_space<vmem>>, %arg7: memref<1x1x8xf32, #tpu.memory_space<vmem>>, %arg8: memref<608x8xbf16, #tpu.memory_space<vmem>>) attributes {dimension_semantics = [#tpu.dimension_semantics<parallel>], iteration_bounds = array<i64: 2>, scalar_prefetch = 0 : i64, scratch_operands = 1 : i64, tpu.core_type = #tpu.core_type<tc>, window_params = [{transform_indices = @transform_0, window_bounds = array<i64: 1, 256, 32>}, {pipeline_mode = #tpu.pipeline_mode<synchronous>, transform_indices = @transform_1, window_bounds = array<i64: 32, 8>}, {pipeline_mode = #tpu.pipeline_mode<synchronous>, transform_indices = @transform_2, window_bounds = array<i64: 1, 8>}, {pipeline_mode = #tpu.pipeline_mode<synchronous>, transform_indices = @transform_3, window_bounds = array<i64: 9, 8, 8>}, {pipeline_mode = #tpu.pipeline_mode<synchronous>, transform_indices = @transform_4, window_bounds = array<i64: 1, 8>}, {transform_indices = @transform_5, window_bounds = array<i64: 1, 256, 8>}, {transform_indices = @transform_6, window_bounds = array<i64: 1, 1, 8>}]} {
    %cst = arith.constant 0.000000e+00 : bf16
    %0 = vector.broadcast %cst : bf16 to vector<608x8xbf16>
    %c0 = arith.constant 0 : index
    %c0_0 = arith.constant 0 : index
    %1 = vector.load %arg8[%c0, %c0_0] : memref<608x8xbf16, #tpu.memory_space<vmem>>, vector<608x8xbf16>
    tpu.vector_store %arg8[%c0, %c0_0], %0 {strides = array<i32>} : memref<608x8xbf16, #tpu.memory_space<vmem>>, vector<608x8xbf16>,
    %c0_1 = arith.constant 0 : index
    %c0_2 = arith.constant 0 : index
    %c0_3 = arith.constant 0 : index
    %2 = vector.load %arg1[%c0_1, %c0_2, %c0_3] : memref<1x256x32xbf16, #tpu.memory_space<vmem>>, vector<1x256x32xbf16>
    %3 = vector.shape_cast %2 : vector<1x256x32xbf16> to vector<256x32xbf16>
    %c0_4 = arith.constant 0 : index
    %c0_5 = arith.constant 0 : index
    %4 = vector.load %arg2[%c0_4, %c0_5] : memref<32x8xbf16, #tpu.memory_space<vmem>>, vector<32x8xbf16>
    %cst_6 = arith.constant dense<0.000000e+00> : vector<256x8xf32>
    %5 = tpu.matmul %3, %4, %cst_6 {dimension_numbers = #tpu.dot_dimension_numbers<[1], [0], [0], [1], [0, 0, 1, 1], [], []>} : vector<256x32xbf16>, vector<32x8xbf16>, vector<256x8xf32> -> vector<256x8xf32>
    %c0_7 = arith.constant 0 : index
    %c0_8 = arith.constant 0 : index
    %6 = vector.load %arg3[%c0_7, %c0_8] : memref<1x8xf32, #tpu.memory_space<vmem>>, vector<1x8xf32>
    %7 = vector.broadcast %6 : vector<1x8xf32> to vector<256x8xf32>
    %8 = arith.addf %5, %7 : vector<256x8xf32>
    %cst_9 = arith.constant 0.000000e+00 : f32
    %9 = vector.broadcast %cst_9 : f32 to vector<256x8xf32>
    %10 = arith.maximumf %8, %9 : vector<256x8xf32>
    %11 = arith.truncf %10 : vector<256x8xf32> to vector<256x8xbf16>
    %12 = vector.extract_strided_slice %11 {offsets = [0, 0], sizes = [16, 8], strides = [1, 1]} : vector<256x8xbf16> to vector<16x8xbf16>
    %c48 = arith.constant 48 : index
    %c0_10 = arith.constant 0 : index
    %13 = vector.load %arg8[%c48, %c0_10] : memref<608x8xbf16, #tpu.memory_space<vmem>>, vector<16x8xbf16>
    tpu.vector_store %arg8[%c48, %c0_10], %12 {strides = array<i32>} : memref<608x8xbf16, #tpu.memory_space<vmem>>, vector<16x8xbf16>,
    %14 = vector.extract_strided_slice %11 {offsets = [16, 0], sizes = [16, 8], strides = [1, 1]} : vector<256x8xbf16> to vector<16x8xbf16>
    %c80 = arith.constant 80 : index
    %c0_11 = arith.constant 0 : index
    %15 = vector.load %arg8[%c80, %c0_11] : memref<608x8xbf16, #tpu.memory_space<vmem>>, vector<16x8xbf16>
    tpu.vector_store %arg8[%c80, %c0_11], %14 {strides = array<i32>} : memref<608x8xbf16, #tpu.memory_space<vmem>>, vector<16x8xbf16>,
    %16 = vector.extract_strided_slice %11 {offsets = [32, 0], sizes = [16, 8], strides = [1, 1]} : vector<256x8xbf16> to vector<16x8xbf16>
    %c112 = arith.constant 112 : index
    %c0_12 = arith.constant 0 : index
    %17 = vector.load %arg8[%c112, %c0_12] : memref<608x8xbf16, #tpu.memory_space<vmem>>, vector<16x8xbf16>
    tpu.vector_store %arg8[%c112, %c0_12], %16 {strides = array<i32>} : memref<608x8xbf16, #tpu.memory_space<vmem>>, vector<16x8xbf16>,
    %18 = vector.extract_strided_slice %11 {offsets = [48, 0], sizes = [16, 8], strides = [1, 1]} : vector<256x8xbf16> to vector<16x8xbf16>
    %c144 = arith.constant 144 : index
    %c0_13 = arith.constant 0 : index
    %19 = vector.load %arg8[%c144, %c0_13] : memref<608x8xbf16, #tpu.memory_space<vmem>>, vector<16x8xbf16>
    tpu.vector_store %arg8[%c144, %c0_13], %18 {strides = array<i32>} : memref<608x8xbf16, #tpu.memory_space<vmem>>, vector<16x8xbf16>,
    %20 = vector.extract_strided_slice %11 {offsets = [64, 0], sizes = [16, 8], strides = [1, 1]} : vector<256x8xbf16> to vector<16x8xbf16>
    %c176 = arith.constant 176 : index
    %c0_14 = arith.constant 0 : index
    %21 = vector.load %arg8[%c176, %c0_14] : memref<608x8xbf16, #tpu.memory_space<vmem>>, vector<16x8xbf16>
    tpu.vector_store %arg8[%c176, %c0_14], %20 {strides = array<i32>} : memref<608x8xbf16, #tpu.memory_space<vmem>>, vector<16x8xbf16>,
    %22 = vector.extract_strided_slice %11 {offsets = [80, 0], sizes = [16, 8], strides = [1, 1]} : vector<256x8xbf16> to vector<16x8xbf16>
    %c208 = arith.constant 208 : index
    %c0_15 = arith.constant 0 : index
    %23 = vector.load %arg8[%c208, %c0_15] : memref<608x8xbf16, #tpu.memory_space<vmem>>, vector<16x8xbf16>
    tpu.vector_store %arg8[%c208, %c0_15], %22 {strides = array<i32>} : memref<608x8xbf16, #tpu.memory_space<vmem>>, vector<16x8xbf16>,
    %24 = vector.extract_strided_slice %11 {offsets = [96, 0], sizes = [16, 8], strides = [1, 1]} : vector<256x8xbf16> to vector<16x8xbf16>
    %c240 = arith.constant 240 : index
    %c0_16 = arith.constant 0 : index
    %25 = vector.load %arg8[%c240, %c0_16] : memref<608x8xbf16, #tpu.memory_space<vmem>>, vector<16x8xbf16>
    tpu.vector_store %arg8[%c240, %c0_16], %24 {strides = array<i32>} : memref<608x8xbf16, #tpu.memory_space<vmem>>, vector<16x8xbf16>,
    %26 = vector.extract_strided_slice %11 {offsets = [112, 0], sizes = [16, 8], strides = [1, 1]} : vector<256x8xbf16> to vector<16x8xbf16>
    %c272 = arith.constant 272 : index
    %c0_17 = arith.constant 0 : index
    %27 = vector.load %arg8[%c272, %c0_17] : memref<608x8xbf16, #tpu.memory_space<vmem>>, vector<16x8xbf16>
    tpu.vector_store %arg8[%c272, %c0_17], %26 {strides = array<i32>} : memref<608x8xbf16, #tpu.memory_space<vmem>>, vector<16x8xbf16>,
    %28 = vector.extract_strided_slice %11 {offsets = [128, 0], sizes = [16, 8], strides = [1, 1]} : vector<256x8xbf16> to vector<16x8xbf16>
    %c304 = arith.constant 304 : index
    %c0_18 = arith.constant 0 : index
    %29 = vector.load %arg8[%c304, %c0_18] : memref<608x8xbf16, #tpu.memory_space<vmem>>, vector<16x8xbf16>
    tpu.vector_store %arg8[%c304, %c0_18], %28 {strides = array<i32>} : memref<608x8xbf16, #tpu.memory_space<vmem>>, vector<16x8xbf16>,
    %30 = vector.extract_strided_slice %11 {offsets = [144, 0], sizes = [16, 8], strides = [1, 1]} : vector<256x8xbf16> to vector<16x8xbf16>
    %c336 = arith.constant 336 : index
    %c0_19 = arith.constant 0 : index
    %31 = vector.load %arg8[%c336, %c0_19] : memref<608x8xbf16, #tpu.memory_space<vmem>>, vector<16x8xbf16>
    tpu.vector_store %arg8[%c336, %c0_19], %30 {strides = array<i32>} : memref<608x8xbf16, #tpu.memory_space<vmem>>, vector<16x8xbf16>,
    %32 = vector.extract_strided_slice %11 {offsets = [160, 0], sizes = [16, 8], strides = [1, 1]} : vector<256x8xbf16> to vector<16x8xbf16>
    %c368 = arith.constant 368 : index
    %c0_20 = arith.constant 0 : index
    %33 = vector.load %arg8[%c368, %c0_20] : memref<608x8xbf16, #tpu.memory_space<vmem>>, vector<16x8xbf16>
    tpu.vector_store %arg8[%c368, %c0_20], %32 {strides = array<i32>} : memref<608x8xbf16, #tpu.memory_space<vmem>>, vector<16x8xbf16>,
    %34 = vector.extract_strided_slice %11 {offsets = [176, 0], sizes = [16, 8], strides = [1, 1]} : vector<256x8xbf16> to vector<16x8xbf16>
    %c400 = arith.constant 400 : index
    %c0_21 = arith.constant 0 : index
    %35 = vector.load %arg8[%c400, %c0_21] : memref<608x8xbf16, #tpu.memory_space<vmem>>, vector<16x8xbf16>
    tpu.vector_store %arg8[%c400, %c0_21], %34 {strides = array<i32>} : memref<608x8xbf16, #tpu.memory_space<vmem>>, vector<16x8xbf16>,
    %36 = vector.extract_strided_slice %11 {offsets = [192, 0], sizes = [16, 8], strides = [1, 1]} : vector<256x8xbf16> to vector<16x8xbf16>
    %c432 = arith.constant 432 : index
    %c0_22 = arith.constant 0 : index
    %37 = vector.load %arg8[%c432, %c0_22] : memref<608x8xbf16, #tpu.memory_space<vmem>>, vector<16x8xbf16>
    tpu.vector_store %arg8[%c432, %c0_22], %36 {strides = array<i32>} : memref<608x8xbf16, #tpu.memory_space<vmem>>, vector<16x8xbf16>,
    %38 = vector.extract_strided_slice %11 {offsets = [208, 0], sizes = [16, 8], strides = [1, 1]} : vector<256x8xbf16> to vector<16x8xbf16>
    %c464 = arith.constant 464 : index
    %c0_23 = arith.constant 0 : index
    %39 = vector.load %arg8[%c464, %c0_23] : memref<608x8xbf16, #tpu.memory_space<vmem>>, vector<16x8xbf16>
    tpu.vector_store %arg8[%c464, %c0_23], %38 {strides = array<i32>} : memref<608x8xbf16, #tpu.memory_space<vmem>>, vector<16x8xbf16>,
    %40 = vector.extract_strided_slice %11 {offsets = [224, 0], sizes = [16, 8], strides = [1, 1]} : vector<256x8xbf16> to vector<16x8xbf16>
    %c496 = arith.constant 496 : index
    %c0_24 = arith.constant 0 : index
    %41 = vector.load %arg8[%c496, %c0_24] : memref<608x8xbf16, #tpu.memory_space<vmem>>, vector<16x8xbf16>
    tpu.vector_store %arg8[%c496, %c0_24], %40 {strides = array<i32>} : memref<608x8xbf16, #tpu.memory_space<vmem>>, vector<16x8xbf16>,
    %42 = vector.extract_strided_slice %11 {offsets = [240, 0], sizes = [16, 8], strides = [1, 1]} : vector<256x8xbf16> to vector<16x8xbf16>
    %c528 = arith.constant 528 : index
    %c0_25 = arith.constant 0 : index
    %43 = vector.load %arg8[%c528, %c0_25] : memref<608x8xbf16, #tpu.memory_space<vmem>>, vector<16x8xbf16>
    tpu.vector_store %arg8[%c528, %c0_25], %42 {strides = array<i32>} : memref<608x8xbf16, #tpu.memory_space<vmem>>, vector<16x8xbf16>,
    %44 = tpu.iota {dimensions = array<i32: 0>} : vector<512x1xi32>
    %c32_i32 = arith.constant 32 : i32
    %c0_i32 = arith.constant 0 : i32
    %45 = arith.cmpi eq, %c32_i32, %c0_i32 : i32
    %c1_i32 = arith.constant 1 : i32
    %46 = arith.select %45, %c1_i32, %c32_i32 : i32
    %47 = vector.broadcast %46 : i32 to vector<512x1xi32>
    %48 = arith.remsi %44, %47 : vector<512x1xi32>
    %c0_i32_26 = arith.constant 0 : i32
    %49 = vector.broadcast %c0_i32_26 : i32 to vector<512x1xi32>
    %50 = arith.cmpi ne, %48, %49 : vector<512x1xi32>
    %c0_i32_27 = arith.constant 0 : i32
    %51 = vector.broadcast %c0_i32_27 : i32 to vector<512x1xi32>
    %52 = arith.cmpi slt, %48, %51 : vector<512x1xi32>
    %c0_i32_28 = arith.constant 0 : i32
    %53 = arith.cmpi slt, %46, %c0_i32_28 : i32
    %54 = vector.broadcast %53 : i1 to vector<512x1xi1>
    %55 = vector.broadcast %54 : vector<512x1xi1> to vector<512x1xi1>
    %56 = arith.xori %52, %55 : vector<512x1xi1>
    %57 = arith.andi %56, %50 : vector<512x1xi1>
    %58 = vector.broadcast %46 : i32 to vector<512x1xi32>
    %59 = arith.addi %48, %58 : vector<512x1xi32>
    %60 = arith.select %57, %59, %48 : vector<512x1xi1>, vector<512x1xi32>
    %c16_i32 = arith.constant 16 : i32
    %61 = vector.broadcast %c16_i32 : i32 to vector<512x1xi32>
    %62 = arith.cmpi slt, %60, %61 : vector<512x1xi32>
    %cst_29 = arith.constant 0.000000e+00 : f32
    %63 = vector.broadcast %cst_29 : f32 to vector<1x8xf32>
    %cst_30 = arith.constant 0.000000e+00 : f32
    %64 = vector.broadcast %cst_30 : f32 to vector<512x8xf32>
    %c15 = arith.constant 15 : index
    %c0_31 = arith.constant 0 : index
    %65 = vector.load %arg8[%c15, %c0_31] : memref<608x8xbf16, #tpu.memory_space<vmem>>, vector<576x8xbf16>
    %66 = vector.extract_strided_slice %65 {offsets = [0, 0], sizes = [512, 8], strides = [1, 1]} : vector<576x8xbf16> to vector<512x8xbf16>
    %c0_32 = arith.constant 0 : index
    %c0_33 = arith.constant 0 : index
    %c0_34 = arith.constant 0 : index
    %67 = vector.load %arg4[%c0_32, %c0_33, %c0_34] : memref<9x8x8xbf16, #tpu.memory_space<vmem>>, vector<1x8x8xbf16>
    %68 = vector.shape_cast %67 : vector<1x8x8xbf16> to vector<8x8xbf16>
    %cst_35 = arith.constant dense<0.000000e+00> : vector<512x8xf32>
    %69 = tpu.matmul %66, %68, %cst_35 {dimension_numbers = #tpu.dot_dimension_numbers<[1], [0], [0], [1], [0, 0, 1, 1], [], []>} : vector<512x8xbf16>, vector<8x8xbf16>, vector<512x8xf32> -> vector<512x8xf32>
    %70 = arith.addf %64, %69 : vector<512x8xf32>
    %71 = vector.extract_strided_slice %65 {offsets = [32, 0], sizes = [512, 8], strides = [1, 1]} : vector<576x8xbf16> to vector<512x8xbf16>
    %c3 = arith.constant 3 : index
    %c0_36 = arith.constant 0 : index
    %c0_37 = arith.constant 0 : index
    %72 = vector.load %arg4[%c3, %c0_36, %c0_37] : memref<9x8x8xbf16, #tpu.memory_space<vmem>>, vector<1x8x8xbf16>
    %73 = vector.shape_cast %72 : vector<1x8x8xbf16> to vector<8x8xbf16>
    %cst_38 = arith.constant dense<0.000000e+00> : vector<512x8xf32>
    %74 = tpu.matmul %71, %73, %cst_38 {dimension_numbers = #tpu.dot_dimension_numbers<[1], [0], [0], [1], [0, 0, 1, 1], [], []>} : vector<512x8xbf16>, vector<8x8xbf16>, vector<512x8xf32> -> vector<512x8xf32>
    %75 = arith.addf %70, %74 : vector<512x8xf32>
    %76 = vector.extract_strided_slice %65 {offsets = [64, 0], sizes = [512, 8], strides = [1, 1]} : vector<576x8xbf16> to vector<512x8xbf16>
    %c6 = arith.constant 6 : index
    %c0_39 = arith.constant 0 : index
    %c0_40 = arith.constant 0 : index
    %77 = vector.load %arg4[%c6, %c0_39, %c0_40] : memref<9x8x8xbf16, #tpu.memory_space<vmem>>, vector<1x8x8xbf16>
    %78 = vector.shape_cast %77 : vector<1x8x8xbf16> to vector<8x8xbf16>
    %cst_41 = arith.constant dense<0.000000e+00> : vector<512x8xf32>
    %79 = tpu.matmul %76, %78, %cst_41 {dimension_numbers = #tpu.dot_dimension_numbers<[1], [0], [0], [1], [0, 0, 1, 1], [], []>} : vector<512x8xbf16>, vector<8x8xbf16>, vector<512x8xf32> -> vector<512x8xf32>
    %80 = arith.addf %75, %79 : vector<512x8xf32>
    %c16 = arith.constant 16 : index
    %c0_42 = arith.constant 0 : index
    %81 = vector.load %arg8[%c16, %c0_42] : memref<608x8xbf16, #tpu.memory_space<vmem>>, vector<576x8xbf16>
    %82 = vector.extract_strided_slice %81 {offsets = [0, 0], sizes = [512, 8], strides = [1, 1]} : vector<576x8xbf16> to vector<512x8xbf16>
    %c1 = arith.constant 1 : index
    %c0_43 = arith.constant 0 : index
    %c0_44 = arith.constant 0 : index
    %83 = vector.load %arg4[%c1, %c0_43, %c0_44] : memref<9x8x8xbf16, #tpu.memory_space<vmem>>, vector<1x8x8xbf16>
    %84 = vector.shape_cast %83 : vector<1x8x8xbf16> to vector<8x8xbf16>
    %cst_45 = arith.constant dense<0.000000e+00> : vector<512x8xf32>
    %85 = tpu.matmul %82, %84, %cst_45 {dimension_numbers = #tpu.dot_dimension_numbers<[1], [0], [0], [1], [0, 0, 1, 1], [], []>} : vector<512x8xbf16>, vector<8x8xbf16>, vector<512x8xf32> -> vector<512x8xf32>
    %86 = arith.addf %80, %85 : vector<512x8xf32>
    %87 = vector.extract_strided_slice %81 {offsets = [32, 0], sizes = [512, 8], strides = [1, 1]} : vector<576x8xbf16> to vector<512x8xbf16>
    %c4 = arith.constant 4 : index
    %c0_46 = arith.constant 0 : index
    %c0_47 = arith.constant 0 : index
    %88 = vector.load %arg4[%c4, %c0_46, %c0_47] : memref<9x8x8xbf16, #tpu.memory_space<vmem>>, vector<1x8x8xbf16>
    %89 = vector.shape_cast %88 : vector<1x8x8xbf16> to vector<8x8xbf16>
    %cst_48 = arith.constant dense<0.000000e+00> : vector<512x8xf32>
    %90 = tpu.matmul %87, %89, %cst_48 {dimension_numbers = #tpu.dot_dimension_numbers<[1], [0], [0], [1], [0, 0, 1, 1], [], []>} : vector<512x8xbf16>, vector<8x8xbf16>, vector<512x8xf32> -> vector<512x8xf32>
    %91 = arith.addf %86, %90 : vector<512x8xf32>
    %92 = vector.extract_strided_slice %81 {offsets = [64, 0], sizes = [512, 8], strides = [1, 1]} : vector<576x8xbf16> to vector<512x8xbf16>
    %c7 = arith.constant 7 : index
    %c0_49 = arith.constant 0 : index
    %c0_50 = arith.constant 0 : index
    %93 = vector.load %arg4[%c7, %c0_49, %c0_50] : memref<9x8x8xbf16, #tpu.memory_space<vmem>>, vector<1x8x8xbf16>
    %94 = vector.shape_cast %93 : vector<1x8x8xbf16> to vector<8x8xbf16>
    %cst_51 = arith.constant dense<0.000000e+00> : vector<512x8xf32>
    %95 = tpu.matmul %92, %94, %cst_51 {dimension_numbers = #tpu.dot_dimension_numbers<[1], [0], [0], [1], [0, 0, 1, 1], [], []>} : vector<512x8xbf16>, vector<8x8xbf16>, vector<512x8xf32> -> vector<512x8xf32>
    %96 = arith.addf %91, %95 : vector<512x8xf32>
    %c17 = arith.constant 17 : index
    %c0_52 = arith.constant 0 : index
    %97 = vector.load %arg8[%c17, %c0_52] : memref<608x8xbf16, #tpu.memory_space<vmem>>, vector<576x8xbf16>
    %98 = vector.extract_strided_slice %97 {offsets = [0, 0], sizes = [512, 8], strides = [1, 1]} : vector<576x8xbf16> to vector<512x8xbf16>
    %c2 = arith.constant 2 : index
    %c0_53 = arith.constant 0 : index
    %c0_54 = arith.constant 0 : index
    %99 = vector.load %arg4[%c2, %c0_53, %c0_54] : memref<9x8x8xbf16, #tpu.memory_space<vmem>>, vector<1x8x8xbf16>
    %100 = vector.shape_cast %99 : vector<1x8x8xbf16> to vector<8x8xbf16>
    %cst_55 = arith.constant dense<0.000000e+00> : vector<512x8xf32>
    %101 = tpu.matmul %98, %100, %cst_55 {dimension_numbers = #tpu.dot_dimension_numbers<[1], [0], [0], [1], [0, 0, 1, 1], [], []>} : vector<512x8xbf16>, vector<8x8xbf16>, vector<512x8xf32> -> vector<512x8xf32>
    %102 = arith.addf %96, %101 : vector<512x8xf32>
    %103 = vector.extract_strided_slice %97 {offsets = [32, 0], sizes = [512, 8], strides = [1, 1]} : vector<576x8xbf16> to vector<512x8xbf16>
    %c5 = arith.constant 5 : index
    %c0_56 = arith.constant 0 : index
    %c0_57 = arith.constant 0 : index
    %104 = vector.load %arg4[%c5, %c0_56, %c0_57] : memref<9x8x8xbf16, #tpu.memory_space<vmem>>, vector<1x8x8xbf16>
    %105 = vector.shape_cast %104 : vector<1x8x8xbf16> to vector<8x8xbf16>
    %cst_58 = arith.constant dense<0.000000e+00> : vector<512x8xf32>
    %106 = tpu.matmul %103, %105, %cst_58 {dimension_numbers = #tpu.dot_dimension_numbers<[1], [0], [0], [1], [0, 0, 1, 1], [], []>} : vector<512x8xbf16>, vector<8x8xbf16>, vector<512x8xf32> -> vector<512x8xf32>
    %107 = arith.addf %102, %106 : vector<512x8xf32>
    %108 = vector.extract_strided_slice %97 {offsets = [64, 0], sizes = [512, 8], strides = [1, 1]} : vector<576x8xbf16> to vector<512x8xbf16>
    %c8 = arith.constant 8 : index
    %c0_59 = arith.constant 0 : index
    %c0_60 = arith.constant 0 : index
    %109 = vector.load %arg4[%c8, %c0_59, %c0_60] : memref<9x8x8xbf16, #tpu.memory_space<vmem>>, vector<1x8x8xbf16>
    %110 = vector.shape_cast %109 : vector<1x8x8xbf16> to vector<8x8xbf16>
    %cst_61 = arith.constant dense<0.000000e+00> : vector<512x8xf32>
    %111 = tpu.matmul %108, %110, %cst_61 {dimension_numbers = #tpu.dot_dimension_numbers<[1], [0], [0], [1], [0, 0, 1, 1], [], []>} : vector<512x8xbf16>, vector<8x8xbf16>, vector<512x8xf32> -> vector<512x8xf32>
    %112 = arith.addf %107, %111 : vector<512x8xf32>
    %c0_62 = arith.constant 0 : index
    %c0_63 = arith.constant 0 : index
    %113 = vector.load %arg5[%c0_62, %c0_63] : memref<1x8xf32, #tpu.memory_space<vmem>>, vector<1x8xf32>
    %114 = vector.broadcast %113 : vector<1x8xf32> to vector<512x8xf32>
    %115 = arith.addf %112, %114 : vector<512x8xf32>
    %cst_64 = arith.constant 0.000000e+00 : f32
    %116 = vector.broadcast %cst_64 : f32 to vector<512x8xf32>
    %117 = arith.maximumf %115, %116 : vector<512x8xf32>
    %cst_65 = arith.constant 0.000000e+00 : f32
    %118 = vector.shape_cast %62 : vector<512x1xi1> to vector<512x1xi1>
    %119 = vector.broadcast %118 : vector<512x1xi1> to vector<512x8xi1>
    %120 = vector.broadcast %cst_65 : f32 to vector<512x8xf32>
    %121 = arith.select %119, %117, %120 : vector<512x8xi1>, vector<512x8xf32>
    %cst_66 = arith.constant dense<0.000000e+00> : vector<8xf32>
    %122 = vector.multi_reduction <add>, %121, %cst_66 [0] : vector<512x8xf32> to vector<8xf32>
    %123 = vector.shape_cast %122 : vector<8xf32> to vector<1x8xf32>
    %124 = arith.addf %63, %123 : vector<1x8xf32>
    %125 = arith.truncf %117 : vector<512x8xf32> to vector<512x8xbf16>
    %126 = vector.extract_strided_slice %125 {offsets = [0, 0], sizes = [16, 8], strides = [1, 1]} : vector<512x8xbf16> to vector<16x8xbf16>
    %c0_67 = arith.constant 0 : index
    %c0_68 = arith.constant 0 : index
    %c0_69 = arith.constant 0 : index
    %127 = vector.load %arg6[%c0_67, %c0_68, %c0_69] : memref<1x256x8xbf16, #tpu.memory_space<vmem>>, vector<1x16x8xbf16>
    %128 = vector.shape_cast %127 : vector<1x16x8xbf16> to vector<16x8xbf16>
    %129 = vector.shape_cast %126 : vector<16x8xbf16> to vector<1x16x8xbf16>
    tpu.vector_store %arg6[%c0_67, %c0_68, %c0_69], %129 {strides = array<i32>} : memref<1x256x8xbf16, #tpu.memory_space<vmem>>, vector<1x16x8xbf16>,
    %130 = vector.extract_strided_slice %125 {offsets = [32, 0], sizes = [16, 8], strides = [1, 1]} : vector<512x8xbf16> to vector<16x8xbf16>
    %c0_70 = arith.constant 0 : index
    %c16_71 = arith.constant 16 : index
    %c0_72 = arith.constant 0 : index
    %131 = vector.load %arg6[%c0_70, %c16_71, %c0_72] : memref<1x256x8xbf16, #tpu.memory_space<vmem>>, vector<1x16x8xbf16>
    %132 = vector.shape_cast %131 : vector<1x16x8xbf16> to vector<16x8xbf16>
    %133 = vector.shape_cast %130 : vector<16x8xbf16> to vector<1x16x8xbf16>
    tpu.vector_store %arg6[%c0_70, %c16_71, %c0_72], %133 {strides = array<i32>} : memref<1x256x8xbf16, #tpu.memory_space<vmem>>, vector<1x16x8xbf16>,
    %134 = vector.extract_strided_slice %125 {offsets = [64, 0], sizes = [16, 8], strides = [1, 1]} : vector<512x8xbf16> to vector<16x8xbf16>
    %c0_73 = arith.constant 0 : index
    %c32 = arith.constant 32 : index
    %c0_74 = arith.constant 0 : index
    %135 = vector.load %arg6[%c0_73, %c32, %c0_74] : memref<1x256x8xbf16, #tpu.memory_space<vmem>>, vector<1x16x8xbf16>
    %136 = vector.shape_cast %135 : vector<1x16x8xbf16> to vector<16x8xbf16>
    %137 = vector.shape_cast %134 : vector<16x8xbf16> to vector<1x16x8xbf16>
    tpu.vector_store %arg6[%c0_73, %c32, %c0_74], %137 {strides = array<i32>} : memref<1x256x8xbf16, #tpu.memory_space<vmem>>, vector<1x16x8xbf16>,
    %138 = vector.extract_strided_slice %125 {offsets = [96, 0], sizes = [16, 8], strides = [1, 1]} : vector<512x8xbf16> to vector<16x8xbf16>
    %c0_75 = arith.constant 0 : index
    %c48_76 = arith.constant 48 : index
    %c0_77 = arith.constant 0 : index
    %139 = vector.load %arg6[%c0_75, %c48_76, %c0_77] : memref<1x256x8xbf16, #tpu.memory_space<vmem>>, vector<1x16x8xbf16>
    %140 = vector.shape_cast %139 : vector<1x16x8xbf16> to vector<16x8xbf16>
    %141 = vector.shape_cast %138 : vector<16x8xbf16> to vector<1x16x8xbf16>
    tpu.vector_store %arg6[%c0_75, %c48_76, %c0_77], %141 {strides = array<i32>} : memref<1x256x8xbf16, #tpu.memory_space<vmem>>, vector<1x16x8xbf16>,
    %142 = vector.extract_strided_slice %125 {offsets = [128, 0], sizes = [16, 8], strides = [1, 1]} : vector<512x8xbf16> to vector<16x8xbf16>
    %c0_78 = arith.constant 0 : index
    %c64 = arith.constant 64 : index
    %c0_79 = arith.constant 0 : index
    %143 = vector.load %arg6[%c0_78, %c64, %c0_79] : memref<1x256x8xbf16, #tpu.memory_space<vmem>>, vector<1x16x8xbf16>
    %144 = vector.shape_cast %143 : vector<1x16x8xbf16> to vector<16x8xbf16>
    %145 = vector.shape_cast %142 : vector<16x8xbf16> to vector<1x16x8xbf16>
    tpu.vector_store %arg6[%c0_78, %c64, %c0_79], %145 {strides = array<i32>} : memref<1x256x8xbf16, #tpu.memory_space<vmem>>, vector<1x16x8xbf16>,
    %146 = vector.extract_strided_slice %125 {offsets = [160, 0], sizes = [16, 8], strides = [1, 1]} : vector<512x8xbf16> to vector<16x8xbf16>
    %c0_80 = arith.constant 0 : index
    %c80_81 = arith.constant 80 : index
    %c0_82 = arith.constant 0 : index
    %147 = vector.load %arg6[%c0_80, %c80_81, %c0_82] : memref<1x256x8xbf16, #tpu.memory_space<vmem>>, vector<1x16x8xbf16>
    %148 = vector.shape_cast %147 : vector<1x16x8xbf16> to vector<16x8xbf16>
    %149 = vector.shape_cast %146 : vector<16x8xbf16> to vector<1x16x8xbf16>
    tpu.vector_store %arg6[%c0_80, %c80_81, %c0_82], %149 {strides = array<i32>} : memref<1x256x8xbf16, #tpu.memory_space<vmem>>, vector<1x16x8xbf16>,
    %150 = vector.extract_strided_slice %125 {offsets = [192, 0], sizes = [16, 8], strides = [1, 1]} : vector<512x8xbf16> to vector<16x8xbf16>
    %c0_83 = arith.constant 0 : index
    %c96 = arith.constant 96 : index
    %c0_84 = arith.constant 0 : index
    %151 = vector.load %arg6[%c0_83, %c96, %c0_84] : memref<1x256x8xbf16, #tpu.memory_space<vmem>>, vector<1x16x8xbf16>
    %152 = vector.shape_cast %151 : vector<1x16x8xbf16> to vector<16x8xbf16>
    %153 = vector.shape_cast %150 : vector<16x8xbf16> to vector<1x16x8xbf16>
    tpu.vector_store %arg6[%c0_83, %c96, %c0_84], %153 {strides = array<i32>} : memref<1x256x8xbf16, #tpu.memory_space<vmem>>, vector<1x16x8xbf16>,
    %154 = vector.extract_strided_slice %125 {offsets = [224, 0], sizes = [16, 8], strides = [1, 1]} : vector<512x8xbf16> to vector<16x8xbf16>
    %c0_85 = arith.constant 0 : index
    %c112_86 = arith.constant 112 : index
    %c0_87 = arith.constant 0 : index
    %155 = vector.load %arg6[%c0_85, %c112_86, %c0_87] : memref<1x256x8xbf16, #tpu.memory_space<vmem>>, vector<1x16x8xbf16>
    %156 = vector.shape_cast %155 : vector<1x16x8xbf16> to vector<16x8xbf16>
    %157 = vector.shape_cast %154 : vector<16x8xbf16> to vector<1x16x8xbf16>
    tpu.vector_store %arg6[%c0_85, %c112_86, %c0_87], %157 {strides = array<i32>} : memref<1x256x8xbf16, #tpu.memory_space<vmem>>, vector<1x16x8xbf16>,
    %158 = vector.extract_strided_slice %125 {offsets = [256, 0], sizes = [16, 8], strides = [1, 1]} : vector<512x8xbf16> to vector<16x8xbf16>
    %c0_88 = arith.constant 0 : index
    %c128 = arith.constant 128 : index
    %c0_89 = arith.constant 0 : index
    %159 = vector.load %arg6[%c0_88, %c128, %c0_89] : memref<1x256x8xbf16, #tpu.memory_space<vmem>>, vector<1x16x8xbf16>
    %160 = vector.shape_cast %159 : vector<1x16x8xbf16> to vector<16x8xbf16>
    %161 = vector.shape_cast %158 : vector<16x8xbf16> to vector<1x16x8xbf16>
    tpu.vector_store %arg6[%c0_88, %c128, %c0_89], %161 {strides = array<i32>} : memref<1x256x8xbf16, #tpu.memory_space<vmem>>, vector<1x16x8xbf16>,
    %162 = vector.extract_strided_slice %125 {offsets = [288, 0], sizes = [16, 8], strides = [1, 1]} : vector<512x8xbf16> to vector<16x8xbf16>
    %c0_90 = arith.constant 0 : index
    %c144_91 = arith.constant 144 : index
    %c0_92 = arith.constant 0 : index
    %163 = vector.load %arg6[%c0_90, %c144_91, %c0_92] : memref<1x256x8xbf16, #tpu.memory_space<vmem>>, vector<1x16x8xbf16>
    %164 = vector.shape_cast %163 : vector<1x16x8xbf16> to vector<16x8xbf16>
    %165 = vector.shape_cast %162 : vector<16x8xbf16> to vector<1x16x8xbf16>
    tpu.vector_store %arg6[%c0_90, %c144_91, %c0_92], %165 {strides = array<i32>} : memref<1x256x8xbf16, #tpu.memory_space<vmem>>, vector<1x16x8xbf16>,
    %166 = vector.extract_strided_slice %125 {offsets = [320, 0], sizes = [16, 8], strides = [1, 1]} : vector<512x8xbf16> to vector<16x8xbf16>
    %c0_93 = arith.constant 0 : index
    %c160 = arith.constant 160 : index
    %c0_94 = arith.constant 0 : index
    %167 = vector.load %arg6[%c0_93, %c160, %c0_94] : memref<1x256x8xbf16, #tpu.memory_space<vmem>>, vector<1x16x8xbf16>
    %168 = vector.shape_cast %167 : vector<1x16x8xbf16> to vector<16x8xbf16>
    %169 = vector.shape_cast %166 : vector<16x8xbf16> to vector<1x16x8xbf16>
    tpu.vector_store %arg6[%c0_93, %c160, %c0_94], %169 {strides = array<i32>} : memref<1x256x8xbf16, #tpu.memory_space<vmem>>, vector<1x16x8xbf16>,
    %170 = vector.extract_strided_slice %125 {offsets = [352, 0], sizes = [16, 8], strides = [1, 1]} : vector<512x8xbf16> to vector<16x8xbf16>
    %c0_95 = arith.constant 0 : index
    %c176_96 = arith.constant 176 : index
    %c0_97 = arith.constant 0 : index
    %171 = vector.load %arg6[%c0_95, %c176_96, %c0_97] : memref<1x256x8xbf16, #tpu.memory_space<vmem>>, vector<1x16x8xbf16>
    %172 = vector.shape_cast %171 : vector<1x16x8xbf16> to vector<16x8xbf16>
    %173 = vector.shape_cast %170 : vector<16x8xbf16> to vector<1x16x8xbf16>
    tpu.vector_store %arg6[%c0_95, %c176_96, %c0_97], %173 {strides = array<i32>} : memref<1x256x8xbf16, #tpu.memory_space<vmem>>, vector<1x16x8xbf16>,
    %174 = vector.extract_strided_slice %125 {offsets = [384, 0], sizes = [16, 8], strides = [1, 1]} : vector<512x8xbf16> to vector<16x8xbf16>
    %c0_98 = arith.constant 0 : index
    %c192 = arith.constant 192 : index
    %c0_99 = arith.constant 0 : index
    %175 = vector.load %arg6[%c0_98, %c192, %c0_99] : memref<1x256x8xbf16, #tpu.memory_space<vmem>>, vector<1x16x8xbf16>
    %176 = vector.shape_cast %175 : vector<1x16x8xbf16> to vector<16x8xbf16>
    %177 = vector.shape_cast %174 : vector<16x8xbf16> to vector<1x16x8xbf16>
    tpu.vector_store %arg6[%c0_98, %c192, %c0_99], %177 {strides = array<i32>} : memref<1x256x8xbf16, #tpu.memory_space<vmem>>, vector<1x16x8xbf16>,
    %178 = vector.extract_strided_slice %125 {offsets = [416, 0], sizes = [16, 8], strides = [1, 1]} : vector<512x8xbf16> to vector<16x8xbf16>
    %c0_100 = arith.constant 0 : index
    %c208_101 = arith.constant 208 : index
    %c0_102 = arith.constant 0 : index
    %179 = vector.load %arg6[%c0_100, %c208_101, %c0_102] : memref<1x256x8xbf16, #tpu.memory_space<vmem>>, vector<1x16x8xbf16>
    %180 = vector.shape_cast %179 : vector<1x16x8xbf16> to vector<16x8xbf16>
    %181 = vector.shape_cast %178 : vector<16x8xbf16> to vector<1x16x8xbf16>
    tpu.vector_store %arg6[%c0_100, %c208_101, %c0_102], %181 {strides = array<i32>} : memref<1x256x8xbf16, #tpu.memory_space<vmem>>, vector<1x16x8xbf16>,
    %182 = vector.extract_strided_slice %125 {offsets = [448, 0], sizes = [16, 8], strides = [1, 1]} : vector<512x8xbf16> to vector<16x8xbf16>
    %c0_103 = arith.constant 0 : index
    %c224 = arith.constant 224 : index
    %c0_104 = arith.constant 0 : index
    %183 = vector.load %arg6[%c0_103, %c224, %c0_104] : memref<1x256x8xbf16, #tpu.memory_space<vmem>>, vector<1x16x8xbf16>
    %184 = vector.shape_cast %183 : vector<1x16x8xbf16> to vector<16x8xbf16>
    %185 = vector.shape_cast %182 : vector<16x8xbf16> to vector<1x16x8xbf16>
    tpu.vector_store %arg6[%c0_103, %c224, %c0_104], %185 {strides = array<i32>} : memref<1x256x8xbf16, #tpu.memory_space<vmem>>, vector<1x16x8xbf16>,
    %186 = vector.extract_strided_slice %125 {offsets = [480, 0], sizes = [16, 8], strides = [1, 1]} : vector<512x8xbf16> to vector<16x8xbf16>
    %c0_105 = arith.constant 0 : index
    %c240_106 = arith.constant 240 : index
    %c0_107 = arith.constant 0 : index
    %187 = vector.load %arg6[%c0_105, %c240_106, %c0_107] : memref<1x256x8xbf16, #tpu.memory_space<vmem>>, vector<1x16x8xbf16>
    %188 = vector.shape_cast %187 : vector<1x16x8xbf16> to vector<16x8xbf16>
    %189 = vector.shape_cast %186 : vector<16x8xbf16> to vector<1x16x8xbf16>
    tpu.vector_store %arg6[%c0_105, %c240_106, %c0_107], %189 {strides = array<i32>} : memref<1x256x8xbf16, #tpu.memory_space<vmem>>, vector<1x16x8xbf16>,
    %cst_108 = arith.constant 3.906250e-03 : f32
    %190 = vector.broadcast %cst_108 : f32 to vector<1x8xf32>
    %191 = arith.mulf %124, %190 : vector<1x8xf32>
    %192 = vector.shape_cast %191 : vector<1x8xf32> to vector<1x1x8xf32>
    %c0_109 = arith.constant 0 : index
    %c0_110 = arith.constant 0 : index
    %c0_111 = arith.constant 0 : index
    %193 = vector.load %arg7[%c0_109, %c0_110, %c0_111] : memref<1x1x8xf32, #tpu.memory_space<vmem>>, vector<1x1x8xf32>
    tpu.vector_store %arg7[%c0_109, %c0_110, %c0_111], %192 {strides = array<i32>} : memref<1x1x8xf32, #tpu.memory_space<vmem>>, vector<1x1x8xf32>,
    return
  }
  func.func @transform_0(%arg0: i32) -> (i32, i32, i32) {
    %c0_i32 = arith.constant 0 : i32
    %c0_i32_0 = arith.constant 0 : i32
    %c0_i32_1 = arith.constant 0 : i32
    return %arg0, %c0_i32, %c0_i32_0 : i32, i32, i32
  }
  func.func @transform_1(%arg0: i32) -> (i32, i32) {
    %c0_i32 = arith.constant 0 : i32
    %c0_i32_0 = arith.constant 0 : i32
    %c0_i32_1 = arith.constant 0 : i32
    return %c0_i32, %c0_i32_0 : i32, i32
  }
  func.func @transform_2(%arg0: i32) -> (i32, i32) {
    %c0_i32 = arith.constant 0 : i32
    %c0_i32_0 = arith.constant 0 : i32
    %c0_i32_1 = arith.constant 0 : i32
    return %c0_i32, %c0_i32_0 : i32, i32
  }
  func.func @transform_3(%arg0: i32) -> (i32, i32, i32) {
    %c0_i32 = arith.constant 0 : i32
    %c0_i32_0 = arith.constant 0 : i32
    %c0_i32_1 = arith.constant 0 : i32
    %c0_i32_2 = arith.constant 0 : i32
    return %c0_i32, %c0_i32_0, %c0_i32_1 : i32, i32, i32
  }
  func.func @transform_4(%arg0: i32) -> (i32, i32) {
    %c0_i32 = arith.constant 0 : i32
    %c0_i32_0 = arith.constant 0 : i32
    %c0_i32_1 = arith.constant 0 : i32
    return %c0_i32, %c0_i32_0 : i32, i32
  }
  func.func @transform_5(%arg0: i32) -> (i32, i32, i32) {
    %c0_i32 = arith.constant 0 : i32
    %c0_i32_0 = arith.constant 0 : i32
    %c0_i32_1 = arith.constant 0 : i32
    return %arg0, %c0_i32, %c0_i32_0 : i32, i32, i32
  }
  func.func @transform_6(%arg0: i32) -> (i32, i32, i32) {
    %c0_i32 = arith.constant 0 : i32
    %c0_i32_0 = arith.constant 0 : i32
    %c0_i32_1 = arith.constant 0 : i32
    return %arg0, %c0_i32, %c0_i32_0 : i32, i32, i32
  }
}

module attributes {stable_mosaic.version = 11 : i64} {
  func.func @_conv3_gate_residual_kernel(%arg0: i32, %arg1: i32, %arg2: memref<1x256x8xbf16, #tpu.memory_space<vmem>>, %arg3: memref<8x32xbf16, #tpu.memory_space<vmem>>, %arg4: memref<1x32xf32, #tpu.memory_space<vmem>>, %arg5: memref<1x1x32xf32, #tpu.memory_space<vmem>>, %arg6: memref<1x256x32xbf16, #tpu.memory_space<vmem>>, %arg7: memref<1x256x32xbf16, #tpu.memory_space<vmem>>) attributes {dimension_semantics = [#tpu.dimension_semantics<parallel>, #tpu.dimension_semantics<parallel>], iteration_bounds = array<i64: 2, 1>, scalar_prefetch = 0 : i64, scratch_operands = 0 : i64, tpu.core_type = #tpu.core_type<tc>, window_params = [{transform_indices = @transform_0, window_bounds = array<i64: 1, 256, 8>}, {pipeline_mode = #tpu.pipeline_mode<synchronous>, transform_indices = @transform_1, window_bounds = array<i64: 8, 32>}, {pipeline_mode = #tpu.pipeline_mode<synchronous>, transform_indices = @transform_2, window_bounds = array<i64: 1, 32>}, {transform_indices = @transform_3, window_bounds = array<i64: 1, 1, 32>}, {transform_indices = @transform_4, window_bounds = array<i64: 1, 256, 32>}, {transform_indices = @transform_5, window_bounds = array<i64: 1, 256, 32>}]} {
    %c0 = arith.constant 0 : index
    %c0_0 = arith.constant 0 : index
    %c0_1 = arith.constant 0 : index
    %0 = vector.load %arg2[%c0, %c0_0, %c0_1] : memref<1x256x8xbf16, #tpu.memory_space<vmem>>, vector<1x256x8xbf16>
    %1 = vector.shape_cast %0 : vector<1x256x8xbf16> to vector<256x8xbf16>
    %c0_2 = arith.constant 0 : index
    %c0_3 = arith.constant 0 : index
    %2 = vector.load %arg3[%c0_2, %c0_3] : memref<8x32xbf16, #tpu.memory_space<vmem>>, vector<8x32xbf16>
    %cst = arith.constant dense<0.000000e+00> : vector<256x32xf32>
    %3 = tpu.matmul %1, %2, %cst {dimension_numbers = #tpu.dot_dimension_numbers<[1], [0], [0], [1], [0, 0, 1, 1], [], []>} : vector<256x8xbf16>, vector<8x32xbf16>, vector<256x32xf32> -> vector<256x32xf32>
    %c0_4 = arith.constant 0 : index
    %c0_5 = arith.constant 0 : index
    %4 = vector.load %arg4[%c0_4, %c0_5] : memref<1x32xf32, #tpu.memory_space<vmem>>, vector<1x32xf32>
    %5 = vector.broadcast %4 : vector<1x32xf32> to vector<256x32xf32>
    %6 = arith.addf %3, %5 : vector<256x32xf32>
    %c0_6 = arith.constant 0 : index
    %c0_7 = arith.constant 0 : index
    %c0_8 = arith.constant 0 : index
    %7 = vector.load %arg5[%c0_6, %c0_7, %c0_8] : memref<1x1x32xf32, #tpu.memory_space<vmem>>, vector<1x1x32xf32>
    %8 = vector.shape_cast %7 : vector<1x1x32xf32> to vector<1x32xf32>
    %9 = vector.broadcast %8 : vector<1x32xf32> to vector<256x32xf32>
    %10 = arith.mulf %9, %6 : vector<256x32xf32>
    %c0_9 = arith.constant 0 : index
    %c0_10 = arith.constant 0 : index
    %c0_11 = arith.constant 0 : index
    %11 = vector.load %arg6[%c0_9, %c0_10, %c0_11] : memref<1x256x32xbf16, #tpu.memory_space<vmem>>, vector<1x256x32xbf16>
    %12 = vector.shape_cast %11 : vector<1x256x32xbf16> to vector<256x32xbf16>
    %13 = arith.extf %12 : vector<256x32xbf16> to vector<256x32xf32>
    %14 = arith.addf %10, %13 : vector<256x32xf32>
    %cst_12 = arith.constant 0.000000e+00 : f32
    %15 = vector.broadcast %cst_12 : f32 to vector<256x32xf32>
    %16 = arith.maximumf %14, %15 : vector<256x32xf32>
    %17 = vector.shape_cast %16 : vector<256x32xf32> to vector<1x256x32xf32>
    %18 = arith.truncf %17 : vector<1x256x32xf32> to vector<1x256x32xbf16>
    %c0_13 = arith.constant 0 : index
    %c0_14 = arith.constant 0 : index
    %c0_15 = arith.constant 0 : index
    %19 = vector.load %arg7[%c0_13, %c0_14, %c0_15] : memref<1x256x32xbf16, #tpu.memory_space<vmem>>, vector<1x256x32xbf16>
    tpu.vector_store %arg7[%c0_13, %c0_14, %c0_15], %18 {strides = array<i32>} : memref<1x256x32xbf16, #tpu.memory_space<vmem>>, vector<1x256x32xbf16>,
    return
  }
  func.func @transform_0(%arg0: i32, %arg1: i32) -> (i32, i32, i32) {
    %c0_i32 = arith.constant 0 : i32
    %c0_i32_0 = arith.constant 0 : i32
    return %arg0, %arg1, %c0_i32 : i32, i32, i32
  }
  func.func @transform_1(%arg0: i32, %arg1: i32) -> (i32, i32) {
    %c0_i32 = arith.constant 0 : i32
    %c0_i32_0 = arith.constant 0 : i32
    %c0_i32_1 = arith.constant 0 : i32
    return %c0_i32, %c0_i32_0 : i32, i32
  }
  func.func @transform_2(%arg0: i32, %arg1: i32) -> (i32, i32) {
    %c0_i32 = arith.constant 0 : i32
    %c0_i32_0 = arith.constant 0 : i32
    %c0_i32_1 = arith.constant 0 : i32
    return %c0_i32, %c0_i32_0 : i32, i32
  }
  func.func @transform_3(%arg0: i32, %arg1: i32) -> (i32, i32, i32) {
    %c0_i32 = arith.constant 0 : i32
    %c0_i32_0 = arith.constant 0 : i32
    %c0_i32_1 = arith.constant 0 : i32
    return %arg0, %c0_i32, %c0_i32_0 : i32, i32, i32
  }
  func.func @transform_4(%arg0: i32, %arg1: i32) -> (i32, i32, i32) {
    %c0_i32 = arith.constant 0 : i32
    %c0_i32_0 = arith.constant 0 : i32
    return %arg0, %arg1, %c0_i32 : i32, i32, i32
  }
  func.func @transform_5(%arg0: i32, %arg1: i32) -> (i32, i32, i32) {
    %c0_i32 = arith.constant 0 : i32
    %c0_i32_0 = arith.constant 0 : i32
    return %arg0, %arg1, %c0_i32 : i32, i32, i32
  }
}

</mosaic_0001>

<bundles_post_ra>
// kernel: bottleneck_forward.3
= control target key start
LH: loop header
LB: loop body
LE: loop exit
PB: predicated region body
PF: predicated region fallthrough
CT: control target
= control target key end

     0   :  { %s1433_s18 = smov 0   ;;  %s1435_s19 = smov 0   ;;  %s1801_s0 = inlined_call_operand.vmem [shape: bf16[2,256,8], index: 0, kind: input, shape index: {}]   ;;  %s1802_s1 = inlined_call_operand.vmem [shape: bf16[8,32], index: 1, kind: input, shape index: {}]   ;;  %s1803_s2 = inlined_call_operand.vmem [shape: f32[1,32], index: 2, kind: input, shape index: {}]   ;;  %s1804_s3 = inlined_call_operand.vmem [shape: f32[2,1,32], index: 3, kind: input, shape index: {}]   ;;  %s1805_s4 = inlined_call_operand.vmem [shape: bf16[2,256,32], index: 4, kind: input, shape index: {}]   ;;  %s1806_s5 = inlined_call_operand.vmem [shape: bf16[2,256,32], index: 5, kind: output, shape index: {}]  }
   0x1   :  { %s1437_s20 = smov 0  }
   0x2 LB: > { %s27_s21 = sadd.s32 1, %s1397_s19  ;;  %p1095_p0 = scmp.ge.s32.totalorder %s1401_s20, 1  ;;  %s1401_s20 = sphi %s1437_s20, %s15_s20   ;;  %s1397_s19 = sphi %s1435_s19, %s1811_s19   ;;  %s1393_s18 = sphi %s1433_s18, %s1810_s18  }
   0x3   : > { %p29_p1 = scmp.ge.s32.totalorder %s27_s21, 2  ;;  %p233_p2 = scmp.lt.s32.totalorder %s1401_s20, 3 }
   0x5   : > { %s1813_s21 = smov (%p29_p1, %s27_s21), 0  ;;  %p234_p3 = pnand %p1095_p0, %p233_p2 }
   0x6   : > { %v347_v0 = vld [vmem:[%s1802_s1] sm:$0xf] (!%p234_p3)  ;;  %vm484_vm0 = vcmask (!%p234_p3), 1043456   ;;  %p282_p4 = scmp.lt.s32.totalorder (!%p234_p3), %s1393_s18, 1  ;;  %vm435_vm1 = vcmask (!%p234_p3), 64512   ;;  %vm944_vm2 = vcmask (!%p234_p3), 257024  }
   0x7   : > { %237 = sbr.rel (%p234_p3) target bundleno = 279 (0x117), region = 40  ;;  %1337 = vmatprep.subr.msk.bf16.mxu0 (!%p234_p3), %vm484_vm0, %v347_v0  ;;  %1338 = vmatprep.subr.msk.bf16.mxu1 (!%p234_p3), %vm484_vm0, %v347_v0  ;;  %v486_v1 = vsel (!%p234_p3), %vm484_vm0, %v347_v0, 0  ;;  %v1566_v46 = vld [vmem:[%s1803_s2] ss:$0 sm:$0xff] (!%p234_p3) }
   0x8   : > { %1302 = vmatpush3.bf16.msra.mxu0 (!%p234_p3), %v486_v1  ;;  %1336 = vmatpush3.bf16.msra.mxu1 (!%p234_p3), %v486_v1 }
   0xe   : > { %s1815_s18 = smov (!%p282_p4, %s1393_s18), 1 }
   0xf   : > { %s1457_s24 = sshll.u32 %s1815_s18, 7  ;;  %s293_s8 = scalar_lea.vmem %s1804_s3, %s1815_s18 }
  0x10   : > { %s1463_s27 = scalar_lea.vmem %s1801_s0, %s1457_s24  ;;  %s1501_s30 = scalar_lea.vmem %s1805_s4, %s1457_s24  ;;  %v1582_v58 = vld [vmem:[%s293_s8] ss:$0 sm:$0xff] }
  0x11   : > { %v1363_v2 = vld [vmem:[%s1463_s27] sm:$0xff]   ;;  %v1365_v4 = vld [vmem:[%s1463_s27 + $0x8] sm:$0xff]   ;;  %v1367_v6 = vld [vmem:[%s1463_s27 + $0x10] sm:$0xff]   ;;  %s1624_s13 = scalar_lea.vmem %s1806_s5, %s1457_s24 }
  0x12   : > { %v1364_v3 = vld [vmem:[%s1463_s27 + $0x40] sm:$0xff]   ;;  %1303 = vmatprep.mubr.msk.bf16.mxu0 %vm435_vm1, %v1363_v2  ;;  %v1366_v5 = vld [vmem:[%s1463_s27 + $0x48] sm:$0xff]   ;;  %v1368_v7 = vld [vmem:[%s1463_s27 + $0x50] sm:$0xff]  }
  0x13   : > { %1319 = vmatprep.mubr.msk.bf16.mxu1 %vm435_vm1, %v1364_v3  ;;  %1304 = vmatmul.mubr.msk.bf16.vlgmr.msra.gmra.mrb[0].mxu0 %vm435_vm1, %v1365_v4  ;;  %v1369_v8 = vld [vmem:[%s1463_s27 + $0x18] sm:$0xff]   ;;  %v1371_v10 = vld [vmem:[%s1463_s27 + $0x20] sm:$0xff]   ;;  %v1373_v12 = vld [vmem:[%s1463_s27 + $0x28] sm:$0xff]  }
  0x14   : > { %1320 = vmatmul.mubr.msk.bf16.vlgmr.msra.gmra.mrb[0].mxu1 %vm435_vm1, %v1366_v5  ;;  %1307 = vmatprep.mubr.msk.bf16.mxu0 %vm435_vm1, %v1367_v6  ;;  %v1370_v9 = vld [vmem:[%s1463_s27 + $0x58] sm:$0xff]   ;;  %v1372_v11 = vld [vmem:[%s1463_s27 + $0x60] sm:$0xff]   ;;  %v1374_v13 = vld [vmem:[%s1463_s27 + $0x68] sm:$0xff]  }
  0x15   : > { %1323 = vmatprep.mubr.msk.bf16.mxu1 %vm435_vm1, %v1368_v7  ;;  %v1375_v14 = vld [vmem:[%s1463_s27 + $0x30] sm:$0xff]   ;;  %v1377_v16 = vld [vmem:[%s1463_s27 + $0x38] sm:$0xff]   ;;  %v1504_v18 = vld [vmem:[%s1501_s30 + $0x8] sm:$0xff]  }
  0x16   : > { %v1376_v15 = vld [vmem:[%s1463_s27 + $0x70] sm:$0xff]   ;;  %v1378_v17 = vld [vmem:[%s1463_s27 + $0x78] sm:$0xff]   ;;  %v1507_v19 = vld [vmem:[%s1501_s30 + $0x48] sm:$0xff]   ;;  %v1211_v24 = vunpack.c.l.bf16 %v1504_v18  ;;  %v1212_v30 = vunpack.c.h.bf16 %v1504_v18 }
  0x17   : > { %v1510_v20 = vld [vmem:[%s1501_s30] sm:$0xff]   ;;  %v1516_v22 = vld [vmem:[%s1501_s30 + $0x18] sm:$0xff]   ;;  %v1243_v25 = vunpack.c.l.bf16 %v1507_v19  ;;  %v1524_v26 = vld [vmem:[%s1501_s30 + $0x10] sm:$0xff]   ;;  %v1244_v31 = vunpack.c.h.bf16 %v1507_v19 }
  0x18   : > { %v1513_v21 = vld [vmem:[%s1501_s30 + $0x40] sm:$0xff]   ;;  %v1519_v23 = vld [vmem:[%s1501_s30 + $0x58] sm:$0xff]   ;;  %v1527_v27 = vld [vmem:[%s1501_s30 + $0x50] sm:$0xff]   ;;  %v1207_v28 = vunpack.c.l.bf16 %v1510_v20  ;;  %v1208_v34 = vunpack.c.h.bf16 %v1510_v20  ;;  %v1219_v36 = vunpack.c.l.bf16 %v1516_v22  ;;  %v1215_v40 = vunpack.c.l.bf16 %v1524_v26 }
  0x19   : > { %v1239_v29 = vunpack.c.l.bf16 %v1513_v21  ;;  %v1534_v32 = vld [vmem:[%s1501_s30 + $0x28] sm:$0xff]   ;;  %v1240_v35 = vunpack.c.h.bf16 %v1513_v21  ;;  %v1251_v37 = vunpack.c.l.bf16 %v1519_v23  ;;  %v1544_v38 = vld [vmem:[%s1501_s30 + $0x20] sm:$0xff]   ;;  %v1247_v41 = vunpack.c.l.bf16 %v1527_v27  ;;  %v1558_v44 = vld [vmem:[%s1501_s30 + $0x38] sm:$0xff]  }
  0x1a   : > { %v1537_v33 = vld [vmem:[%s1501_s30 + $0x68] sm:$0xff]   ;;  %v1547_v39 = vld [vmem:[%s1501_s30 + $0x60] sm:$0xff]   ;;  %v1220_v42 = vunpack.c.h.bf16 %v1516_v22  ;;  %v1252_v43 = vunpack.c.h.bf16 %v1519_v23  ;;  %v1561_v45 = vld [vmem:[%s1501_s30 + $0x78] sm:$0xff]   ;;  %v1216_v47 = vunpack.c.h.bf16 %v1524_v26  ;;  %v1248_v48 = vunpack.c.h.bf16 %v1527_v27 }
  0x1b   : > { %1308 = vmatmul.mubr.msk.bf16.gmra.mrb[4].mxu0 %vm435_vm1, %v1369_v8  ;;  %v1227_v49 = vunpack.c.l.bf16 %v1534_v32  ;;  %v1259_v50 = vunpack.c.l.bf16 %v1537_v33  ;;  %v1573_v51 = vld [vmem:[%s1501_s30 + $0x30] sm:$0xff]   ;;  %v1223_v53 = vunpack.c.l.bf16 %v1544_v38  ;;  %v1255_v54 = vunpack.c.l.bf16 %v1547_v39 }
  0x1c   : > { %1324 = vmatmul.mubr.msk.bf16.gmra.mrb[4].mxu1 %vm435_vm1, %v1370_v9  ;;  %1311 = vmatprep.mubr.msk.bf16.mxu0 %vm435_vm1, %v1371_v10  ;;  %v1576_v52 = vld [vmem:[%s1501_s30 + $0x70] sm:$0xff]   ;;  %v1228_v55 = vunpack.c.h.bf16 %v1534_v32  ;;  %v1260_v56 = vunpack.c.h.bf16 %v1537_v33  ;;  %v1224_v59 = vunpack.c.h.bf16 %v1544_v38  ;;  %v1256_v60 = vunpack.c.h.bf16 %v1547_v39 }
  0x1d   : > { %1327 = vmatprep.mubr.msk.bf16.mxu1 %vm435_vm1, %v1372_v11  ;;  %v1235_v61 = vunpack.c.l.bf16 %v1558_v44  ;;  %v1267_v62 = vunpack.c.l.bf16 %v1561_v45  ;;  %v1231_v2 = vunpack.c.l.bf16 %v1573_v51  ;;  %v1263_v3 = vunpack.c.l.bf16 %v1576_v52 }
  0x1e   : > { %v1236_v4 = vunpack.c.h.bf16 %v1558_v44  ;;  %v1809_v44 = vunpack.c.h.bf16 %v1576_v52 }
  0x23   : > { %1312 = vmatmul.mubr.msk.bf16.gmra.mrb[8].mxu0 %vm435_vm1, %v1373_v12 }
  0x24   : > { %1328 = vmatmul.mubr.msk.bf16.gmra.mrb[8].mxu1 %vm435_vm1, %v1374_v13  ;;  %1315 = vmatprep.mubr.msk.bf16.mxu0 %vm435_vm1, %v1375_v14 }
  0x25   : > { %1331 = vmatprep.mubr.msk.bf16.mxu1 %vm435_vm1, %v1376_v15 }
  0x2b   : > { %1316 = vmatmul.mubr.msk.bf16.gmra.mrb[12].mxu0 %vm435_vm1, %v1377_v16 }
  0x2c   : > { %1332 = vmatmul.mubr.msk.bf16.gmra.mrb[12].mxu1 %vm435_vm1, %v1378_v17 }
  0xe6   : > { %v1305_v57 = vpop.f32.mrb[0].mxu0 }
  0xe7   : > { %v531_v63 = vadd.f32 %v1305_v57, %v1566_v46  ;;  %v1321_v0 = vpop.f32.mrb[0].mxu1  ;;  %v522_v1 = vpop.f32.mrb[1].mxu0 }
  0xe8   : > { %v595_v5 = vadd.f32 %v1321_v0, %v1566_v46  ;;  %v523_v6 = vadd.f32 %v1566_v46, %v522_v1  ;;  %v586_v7 = vpop.f32.mrb[1].mxu1  ;;  %v1306_v8 = vpop.f32.mrb[2].mxu0 }
  0xe9   : > { %v658_v11 = vmul.f32 %v1582_v58, %v531_v63  ;;  %v587_v12 = vadd.f32 %v1566_v46, %v586_v7  ;;  %v534_v13 = vadd.f32 %v1306_v8, %v1566_v46  ;;  %v1322_v14 = vpop.f32.mrb[2].mxu1  ;;  %v525_v15 = vpop.f32.mrb[3].mxu0 }
  0xea   : > { %v674_v17 = vmul.f32 %v1582_v58, %v595_v5  ;;  %v656_v57 = vmul.f32 %v1582_v58, %v523_v6  ;;  %v598_v0 = vadd.f32 %v1322_v14, %v1566_v46  ;;  %v526_v1 = vadd.f32 %v1566_v46, %v525_v15  ;;  %v589_v10 = vpop.f32.mrb[3].mxu1 }
  0xeb   : > { %v754_v63 = vadd.f32 %v1211_v24, %v658_v11  ;;  %v672_v7 = vmul.f32 %v1582_v58, %v587_v12  ;;  %v659_v8 = vmul.f32 %v1582_v58, %v534_v13  ;;  %v590_v9 = vadd.f32 %v1566_v46, %v589_v10 }
  0xec   : > { %v770_v5 = vadd.f32 %v1243_v25, %v674_v17  ;;  %v752_v6 = vadd.f32 %v1207_v28, %v656_v57  ;;  %v675_v14 = vmul.f32 %v1582_v58, %v598_v0  ;;  %v657_v15 = vmul.f32 %v1582_v58, %v526_v1 }
  0xed   : > { %v786_v16 = vmax.f32 %v754_v63, 0.0  ;;  %v768_v24 = vadd.f32 %v1239_v29, %v672_v7  ;;  %v755_v11 = vadd.f32 %v1212_v30, %v659_v8  ;;  %v673_v12 = vmul.f32 %v1582_v58, %v590_v9 }
  0xee   : > { %v802_v25 = vmax.f32 %v770_v5, 0.0  ;;  %v784_v28 = vmax.f32 %v752_v6, 0.0  ;;  %v771_v10 = vadd.f32 %v1244_v31, %v675_v14  ;;  %v753_v13 = vadd.f32 %v1208_v34, %v657_v15  ;;  %v1309_v29 = vpop.f32.mrb[4].mxu0 }
  0xef   : > { %v1175_v17 = vpack.c.bf16 %v786_v16, %v786_v16  ;;  %v800_v18 = vmax.f32 %v768_v24, 0.0  ;;  %v787_v30 = vmax.f32 %v755_v11, 0.0  ;;  %v769_v9 = vadd.f32 %v1240_v35, %v673_v12  ;;  %v1325_v57 = vpop.f32.mrb[4].mxu1  ;;  %v538_v0 = vpop.f32.mrb[5].mxu0 }
  0xf0   : > { %v1191_v1 = vpack.c.bf16 %v802_v25, %v802_v25  ;;  %v1173_v63 = vpack.c.bf16 %v784_v28, %v784_v28  ;;  %v803_v7 = vmax.f32 %v771_v10, 0.0  ;;  %v785_v19 = vmax.f32 %v753_v13, 0.0  ;;  %v602_v8 = vpop.f32.mrb[5].mxu1  ;;  %v1310_v31 = vpop.f32.mrb[6].mxu0 }
  0xf1   : > { %947 = vst.msk [vmem:[%s1624_s13 + $0x8] sm:$0xf] %vm944_vm2, %v1175_v17  ;;  %v1189_v20 = vpack.c.bf16 %v800_v18, %v800_v18  ;;  %v1176_v34 = vpack.c.bf16 %v787_v30, %v787_v30  ;;  %v801_v16 = vmax.f32 %v769_v9, 0.0  ;;  %v547_v21 = vadd.f32 %v1309_v29, %v1566_v46  ;;  %v1326_v35 = vpop.f32.mrb[6].mxu1  ;;  %v541_v5 = vpop.f32.mrb[7].mxu0 }
  0xf2   : > { %963 = vst.msk [vmem:[%s1624_s13 + $0x48] sm:$0xf] %vm944_vm2, %v1191_v1  ;;  %945 = vst.msk [vmem:[%s1624_s13] sm:$0xf] %vm944_vm2, %v1173_v63  ;;  %v1192_v6 = vpack.c.bf16 %v803_v7, %v803_v7  ;;  %v1174_v14 = vpack.c.bf16 %v785_v19, %v785_v19  ;;  %v611_v15 = vadd.f32 %v1325_v57, %v1566_v46  ;;  %v605_v11 = vpop.f32.mrb[7].mxu1 }
  0xf3   : > { %v539_v24 = vadd.f32 %v1566_v46, %v538_v0  ;;  %961 = vst.msk [vmem:[%s1624_s13 + $0x40] sm:$0xf] %vm944_vm2, %v1189_v20  ;;  %948 = vst.msk [vmem:[%s1624_s13 + $0xc] sm:$0xf] %vm944_vm2, %v1176_v34  ;;  %v1190_v12 = vpack.c.bf16 %v801_v16, %v801_v16  ;;  %v662_v25 = vmul.f32 %v1582_v58, %v547_v21 }
  0xf4   : > { %v603_v28 = vadd.f32 %v1566_v46, %v602_v8  ;;  %v550_v10 = vadd.f32 %v1310_v31, %v1566_v46  ;;  %964 = vst.msk [vmem:[%s1624_s13 + $0x4c] sm:$0xf] %vm944_vm2, %v1192_v6  ;;  %946 = vst.msk [vmem:[%s1624_s13 + $0x4] sm:$0xf] %vm944_vm2, %v1174_v14  ;;  %v678_v13 = vmul.f32 %v1582_v58, %v611_v15 }
  0xf5   : > { %v660_v29 = vmul.f32 %v1582_v58, %v539_v24  ;;  %v614_v17 = vadd.f32 %v1326_v35, %v1566_v46  ;;  %v542_v18 = vadd.f32 %v1566_v46, %v541_v5  ;;  %962 = vst.msk [vmem:[%s1624_s13 + $0x44] sm:$0xf] %vm944_vm2, %v1190_v12  ;;  %v758_v30 = vadd.f32 %v1219_v36, %v662_v25 }
  0xf6   : > { %v676_v9 = vmul.f32 %v1582_v58, %v603_v28  ;;  %v663_v57 = vmul.f32 %v1582_v58, %v550_v10  ;;  %v606_v0 = vadd.f32 %v1566_v46, %v605_v11  ;;  %v774_v1 = vadd.f32 %v1251_v37, %v678_v13  ;;  %v1313_v8 = vpop.f32.mrb[8].mxu0 }
  0xf7   : > { %v756_v63 = vadd.f32 %v1215_v40, %v660_v29  ;;  %v679_v7 = vmul.f32 %v1582_v58, %v614_v17  ;;  %v661_v19 = vmul.f32 %v1582_v58, %v542_v18  ;;  %v790_v31 = vmax.f32 %v758_v30, 0.0  ;;  %v1329_v16 = vpop.f32.mrb[8].mxu1  ;;  %v554_v21 = vpop.f32.mrb[9].mxu0 }
  0xf8   : > { %v772_v36 = vadd.f32 %v1247_v41, %v676_v9  ;;  %v759_v20 = vadd.f32 %v1220_v42, %v663_v57  ;;  %v677_v34 = vmul.f32 %v1582_v58, %v606_v0  ;;  %v806_v37 = vmax.f32 %v774_v1, 0.0  ;;  %v618_v6 = vpop.f32.mrb[9].mxu1  ;;  %v1314_v14 = vpop.f32.mrb[10].mxu0 }
  0xf9   : > { %v788_v35 = vmax.f32 %v756_v63, 0.0  ;;  %v775_v40 = vadd.f32 %v1252_v43, %v679_v7  ;;  %v757_v5 = vadd.f32 %v1216_v47, %v661_v19  ;;  %v1179_v15 = vpack.c.bf16 %v790_v31, %v790_v31  ;;  %v1330_v24 = vpop.f32.mrb[10].mxu1  ;;  %v557_v11 = vpop.f32.mrb[11].mxu0 }
  0xfa   : > { %v804_v41 = vmax.f32 %v772_v36, 0.0  ;;  %v791_v22 = vmax.f32 %v759_v20, 0.0  ;;  %v773_v42 = vadd.f32 %v1248_v48, %v677_v34  ;;  %v1195_v12 = vpack.c.bf16 %v806_v37, %v806_v37  ;;  %v621_v26 = vpop.f32.mrb[11].mxu1 }
  0xfb   : > { %v1177_v23 = vpack.c.bf16 %v788_v35, %v788_v35  ;;  %v807_v43 = vmax.f32 %v775_v40, 0.0  ;;  %v789_v25 = vmax.f32 %v757_v5, 0.0  ;;  %951 = vst.msk [vmem:[%s1624_s13 + $0x18] sm:$0xf] %vm944_vm2, %v1179_v15  ;;  %v563_v13 = vadd.f32 %v1313_v8, %v1566_v46 }
  0xfc   : > { %v1193_v47 = vpack.c.bf16 %v804_v41, %v804_v41  ;;  %v1180_v28 = vpack.c.bf16 %v791_v22, %v791_v22  ;;  %v805_v10 = vmax.f32 %v773_v42, 0.0  ;;  %967 = vst.msk [vmem:[%s1624_s13 + $0x58] sm:$0xf] %vm944_vm2, %v1195_v12  ;;  %v627_v29 = vadd.f32 %v1329_v16, %v1566_v46 }
  0xfd   : > { %949 = vst.msk [vmem:[%s1624_s13 + $0x10] sm:$0xf] %vm944_vm2, %v1177_v23  ;;  %v1196_v27 = vpack.c.bf16 %v807_v43, %v807_v43  ;;  %v1178_v48 = vpack.c.bf16 %v789_v25, %v789_v25  ;;  %v555_v17 = vadd.f32 %v1566_v46, %v554_v21  ;;  %v666_v30 = vmul.f32 %v1582_v58, %v563_v13 }
  0xfe   : > { %965 = vst.msk [vmem:[%s1624_s13 + $0x50] sm:$0xf] %vm944_vm2, %v1193_v47  ;;  %952 = vst.msk [vmem:[%s1624_s13 + $0x1c] sm:$0xf] %vm944_vm2, %v1180_v28  ;;  %v1194_v18 = vpack.c.bf16 %v805_v10, %v805_v10  ;;  %v619_v9 = vadd.f32 %v1566_v46, %v618_v6  ;;  %v566_v57 = vadd.f32 %v1314_v14, %v1566_v46  ;;  %v1317_v19 = vpop.f32.mrb[12].mxu0 }
  0xff   : > { %968 = vst.msk [vmem:[%s1624_s13 + $0x5c] sm:$0xf] %vm944_vm2, %v1196_v27  ;;  %950 = vst.msk [vmem:[%s1624_s13 + $0x14] sm:$0xf] %vm944_vm2, %v1178_v48  ;;  %v682_v0 = vmul.f32 %v1582_v58, %v627_v29  ;;  %v664_v1 = vmul.f32 %v1582_v58, %v555_v17  ;;  %v630_v63 = vadd.f32 %v1330_v24, %v1566_v46  ;;  %v1333_v34 = vpop.f32.mrb[12].mxu1  ;;  %v570_v16 = vpop.f32.mrb[13].mxu0 }
 0x100   : > { %v558_v7 = vadd.f32 %v1566_v46, %v557_v11  ;;  %966 = vst.msk [vmem:[%s1624_s13 + $0x54] sm:$0xf] %vm944_vm2, %v1194_v18  ;;  %v762_v8 = vadd.f32 %v1227_v49, %v666_v30  ;;  %v680_v31 = vmul.f32 %v1582_v58, %v619_v9  ;;  %v667_v36 = vmul.f32 %v1582_v58, %v566_v57  ;;  %v634_v5 = vpop.f32.mrb[13].mxu1  ;;  %v1318_v49 = vpop.f32.mrb[14].mxu0 }
 0x101   : > { %v622_v20 = vadd.f32 %v1566_v46, %v621_v26  ;;  %v778_v21 = vadd.f32 %v1259_v50, %v682_v0  ;;  %v760_v37 = vadd.f32 %v1223_v53, %v664_v1  ;;  %v683_v35 = vmul.f32 %v1582_v58, %v630_v63  ;;  %v1334_v50 = vpop.f32.mrb[14].mxu1  ;;  %v573_v22 = vpop.f32.mrb[15].mxu0 }
 0x102   : > { %v665_v40 = vmul.f32 %v1582_v58, %v558_v7  ;;  %v794_v6 = vmax.f32 %v762_v8, 0.0  ;;  %v776_v14 = vadd.f32 %v1255_v54, %v680_v31  ;;  %v763_v15 = vadd.f32 %v1228_v55, %v667_v36  ;;  %v637_v12 = vpop.f32.mrb[15].mxu1 }
 0x103   : > { %v681_v41 = vmul.f32 %v1582_v58, %v622_v20  ;;  %v810_v42 = vmax.f32 %v778_v21, 0.0  ;;  %v792_v53 = vmax.f32 %v760_v37, 0.0  ;;  %v779_v24 = vadd.f32 %v1260_v56, %v683_v35 }
 0x104   : > { %v761_v11 = vadd.f32 %v1224_v59, %v665_v40  ;;  %v1183_v54 = vpack.c.bf16 %v794_v6, %v794_v6  ;;  %v808_v23 = vmax.f32 %v776_v14, 0.0  ;;  %v795_v32 = vmax.f32 %v763_v15, 0.0 }
 0x105   : > { %v777_v55 = vadd.f32 %v1256_v60, %v681_v41  ;;  %v1199_v43 = vpack.c.bf16 %v810_v42, %v810_v42  ;;  %v1181_v25 = vpack.c.bf16 %v792_v53, %v792_v53  ;;  %v811_v26 = vmax.f32 %v779_v24, 0.0 }
 0x106   : > { %v793_v47 = vmax.f32 %v761_v11, 0.0  ;;  %955 = vst.msk [vmem:[%s1624_s13 + $0x28] sm:$0xf] %vm944_vm2, %v1183_v54  ;;  %v1197_v33 = vpack.c.bf16 %v808_v23, %v808_v23  ;;  %v1184_v38 = vpack.c.bf16 %v795_v32, %v795_v32  ;;  %v579_v59 = vadd.f32 %v1317_v19, %v1566_v46 }
 0x107   : > { %v809_v56 = vmax.f32 %v777_v55, 0.0  ;;  %971 = vst.msk [vmem:[%s1624_s13 + $0x68] sm:$0xf] %vm944_vm2, %v1199_v43  ;;  %953 = vst.msk [vmem:[%s1624_s13 + $0x20] sm:$0xf] %vm944_vm2, %v1181_v25  ;;  %v1200_v39 = vpack.c.bf16 %v811_v26, %v811_v26  ;;  %v643_v28 = vadd.f32 %v1333_v34, %v1566_v46  ;;  %v571_v10 = vadd.f32 %v1566_v46, %v570_v16 }
 0x108   : > { %v1182_v60 = vpack.c.bf16 %v793_v47, %v793_v47  ;;  %969 = vst.msk [vmem:[%s1624_s13 + $0x60] sm:$0xf] %vm944_vm2, %v1197_v33  ;;  %956 = vst.msk [vmem:[%s1624_s13 + $0x2c] sm:$0xf] %vm944_vm2, %v1184_v38  ;;  %v670_v27 = vmul.f32 %v1582_v58, %v579_v59  ;;  %v635_v48 = vadd.f32 %v1566_v46, %v634_v5  ;;  %v1807_v16 = vunpack.c.h.bf16 %v1561_v45 }
 0x109   : > { %v1198_v13 = vpack.c.bf16 %v809_v56, %v809_v56  ;;  %v582_v29 = vadd.f32 %v1318_v49, %v1566_v46  ;;  %972 = vst.msk [vmem:[%s1624_s13 + $0x6c] sm:$0xf] %vm944_vm2, %v1200_v39  ;;  %v686_v17 = vmul.f32 %v1582_v58, %v643_v28  ;;  %v668_v18 = vmul.f32 %v1582_v58, %v571_v10 }
 0x10a   : > { %954 = vst.msk [vmem:[%s1624_s13 + $0x24] sm:$0xf] %vm944_vm2, %v1182_v60  ;;  %v646_v30 = vadd.f32 %v1334_v50, %v1566_v46  ;;  %v574_v9 = vadd.f32 %v1566_v46, %v573_v22  ;;  %v766_v57 = vadd.f32 %v1235_v61, %v670_v27  ;;  %v684_v0 = vmul.f32 %v1582_v58, %v635_v48 }
 0x10b   : > { %970 = vst.msk [vmem:[%s1624_s13 + $0x64] sm:$0xf] %vm944_vm2, %v1198_v13  ;;  %v671_v1 = vmul.f32 %v1582_v58, %v582_v29  ;;  %v638_v63 = vadd.f32 %v1566_v46, %v637_v12  ;;  %v782_v7 = vadd.f32 %v1267_v62, %v686_v17  ;;  %v764_v19 = vadd.f32 %v1231_v2, %v668_v18 }
 0x10c   : > { %v687_v8 = vmul.f32 %v1582_v58, %v646_v30  ;;  %v669_v31 = vmul.f32 %v1582_v58, %v574_v9  ;;  %v798_v36 = vmax.f32 %v766_v57, 0.0  ;;  %v780_v61 = vadd.f32 %v1263_v3, %v684_v0 }
 0x10d   : > { %v767_v20 = vadd.f32 %v1236_v4, %v671_v1  ;;  %v685_v46 = vmul.f32 %v1582_v58, %v638_v63  ;;  %v814_v34 = vmax.f32 %v782_v7, 0.0  ;;  %v796_v62 = vmax.f32 %v764_v19, 0.0 }
 0x10e   : > { %v783_v2 = vadd.f32 %v1807_v16, %v687_v8  ;;  %v1808_v21 = vunpack.c.h.bf16 %v1573_v51  ;;  %v1187_v35 = vpack.c.bf16 %v798_v36, %v798_v36  ;;  %v812_v40 = vmax.f32 %v780_v61, 0.0 }
 0x10f   : > { %v799_v3 = vmax.f32 %v767_v20, 0.0  ;;  %v781_v4 = vadd.f32 %v1809_v44, %v685_v46  ;;  %v1203_v58 = vpack.c.bf16 %v814_v34, %v814_v34  ;;  %v1185_v5 = vpack.c.bf16 %v796_v62, %v796_v62 }
 0x110   : > { %v765_v37 = vadd.f32 %v1808_v21, %v669_v31  ;;  %v815_v49 = vmax.f32 %v783_v2, 0.0  ;;  %959 = vst.msk [vmem:[%s1624_s13 + $0x38] sm:$0xf] %vm944_vm2, %v1187_v35  ;;  %v1201_v6 = vpack.c.bf16 %v812_v40, %v812_v40 }
 0x111   : > { %v1188_v51 = vpack.c.bf16 %v799_v3, %v799_v3  ;;  %v813_v14 = vmax.f32 %v781_v4, 0.0  ;;  %975 = vst.msk [vmem:[%s1624_s13 + $0x78] sm:$0xf] %vm944_vm2, %v1203_v58  ;;  %957 = vst.msk [vmem:[%s1624_s13 + $0x30] sm:$0xf] %vm944_vm2, %v1185_v5 }
 0x112   : > { %v797_v45 = vmax.f32 %v765_v37, 0.0  ;;  %v1204_v15 = vpack.c.bf16 %v815_v49, %v815_v49  ;;  %973 = vst.msk [vmem:[%s1624_s13 + $0x70] sm:$0xf] %vm944_vm2, %v1201_v6 }
 0x113   : > { %960 = vst.msk [vmem:[%s1624_s13 + $0x3c] sm:$0xf] %vm944_vm2, %v1188_v51  ;;  %v1202_v52 = vpack.c.bf16 %v813_v14, %v813_v14 }
 0x114   : > { %v1186_v41 = vpack.c.bf16 %v797_v45, %v797_v45  ;;  %976 = vst.msk [vmem:[%s1624_s13 + $0x7c] sm:$0xf] %vm944_vm2, %v1204_v15 }
 0x115   : > { %974 = vst.msk [vmem:[%s1624_s13 + $0x74] sm:$0xf] %vm944_vm2, %v1202_v52 }
 0x116   : > { %958 = vst.msk [vmem:[%s1624_s13 + $0x34] sm:$0xf] %vm944_vm2, %v1186_v41 }
 0x117 PF: > { %s15_s20 = sadd.s32 1, %s1401_s20   ;;  %s1810_s18 = smov %s1397_s19 }
 0x118   : > { %p12_p5 = scmp.ge.s32.totalorder %s15_s20, 4   ;;  %s1811_s19 = smov %s1813_s21 }
 0x11a   :  { %14 = sbr.rel (!%p12_p5) target bundleno = 2 (0x2), region = 76 }

// kernel: bottleneck_forward.2
= control target key start
LH: loop header
LB: loop body
LE: loop exit
PB: predicated region body
PF: predicated region fallthrough
CT: control target
= control target key end

     0   :  { %s7798_s21 = smov 0   ;;  %s9818_s0 = inlined_call_operand.vmem [shape: bf16[2,256,32], index: 0, kind: input, shape index: {}]   ;;  %s9819_s1 = inlined_call_operand.vmem [shape: bf16[32,8], index: 1, kind: input, shape index: {}]   ;;  %s9820_s2 = inlined_call_operand.vmem [shape: f32[1,8], index: 2, kind: input, shape index: {}]   ;;  %s9821_s3 = inlined_call_operand.vmem [shape: bf16[9,8,8], index: 3, kind: input, shape index: {}]   ;;  %s9822_s4 = inlined_call_operand.vmem [shape: f32[1,8], index: 4, kind: input, shape index: {}]   ;;  %s9823_s5 = inlined_call_operand.vmem [shape: bf16[2,256,8], index: 5, kind: output, shape index: {0}]   ;;  %s9824_s6 = inlined_call_operand.vmem [shape: f32[2,1,8], index: 6, kind: output, shape index: {1}]  }
   0x1 LB: > { %s6354_s22 = sadd.s32 4294967295, %s7760_s21   ;;  %p6358_p0 = scmp.ge.s32.totalorder %s7760_s21, 1  ;;  %s7760_s21 = sphi %s7798_s21, %s17_s21  }
   0x2   : > { %p215_p1 = scmp.lt.s32.totalorder %s7760_s21, 3 }
   0x4   : > { %p216_p2 = pnand %p6358_p0, %p215_p1 }
   0x6   : > { %219 = sbr.rel (%p216_p2) target bundleno = 1114 (0x45a), region = 40 }
   0xd   : > { %v7729_v0 = vld [vmem:[%s9819_s1] sm:$0xff]   ;;  %p248_p3 = scmp.lt.s32.totalorder %s6354_s22, 1  ;;  %v7730_v1 = vld [vmem:[%s9819_s1 + $0x8] sm:$0xff]   ;;  %vm436_vm0 = vcmask 261120   ;;  %vm262_vm1 = vcmask 64512   ;;  %v7762_v18 = vmov 0  }
   0xe   : > { %7078 = vmatprep.subr.bf16.mxu0 %v7729_v0  ;;  %268 = vst.msk [vmem:[#allocation2 + $0x28] sm:$0xff] %vm262_vm1, %v7762_v18  ;;  %263 = vst.msk [vmem:[#allocation2] sm:$0xff] %vm262_vm1, %v7762_v18  ;;  %v6398_v19 = vld [vmem:[%s9821_s3 + $0xc] sm:$0xf]  ;;  %vm2004_vm2 = vcmask 1043456   ;;  %vm6133_vm5 = vcmask 60416  }
   0xf   : > { %s9892_s22 = smov (!%p248_p3, %s6354_s22), 1  ;;  %7079 = vmatpush3.bf16.msra.mxu0 %v7729_v0  ;;  %264 = vst.msk [vmem:[#allocation2 + $0x8] sm:$0xff] %vm262_vm1, %v7762_v18  ;;  %265 = vst.msk [vmem:[#allocation2 + $0x10] sm:$0xff] %vm262_vm1, %v7762_v18  ;;  %v2006_v20 = vsel %vm2004_vm2, %v6398_v19, 0  ;;  %7711 = vmatprep.subr.msk.bf16.mxu1 %vm2004_vm2, %v6398_v19  ;;  %v7901_v21 = vld [vmem:[%s9821_s3 + $0x18] sm:$0xf] }
  0x10   : > { %7080 = vmatprep.subr.bf16.mxu0 %v7730_v1  ;;  %s6729_s27 = sshll.u32 %s9892_s22, 7  ;;  %266 = vst.msk [vmem:[#allocation2 + $0x18] sm:$0xff] %vm262_vm1, %v7762_v18  ;;  %267 = vst.msk [vmem:[#allocation2 + $0x20] sm:$0xff] %vm262_vm1, %v7762_v18  ;;  %7709 = vmatpush3.bf16.msra.mxu1 %v2006_v20  ;;  %v7908_v22 = vld [vmem:[%s9821_s3] sm:$0xf]  ;;  %s260_s12 = scalar_lea.vmem %s9824_s6, %s9892_s22  ;;  %vm6272_vm6 = vcmask 57344  }
  0x11   : > { %s7820_s30 = scalar_lea.vmem %s9818_s0, %s6729_s27  ;;  %269 = vst.msk [vmem:[#allocation2 + $0x30] sm:$0xff] %vm262_vm1, %v7762_v18  ;;  %270 = vst.msk [vmem:[#allocation2 + $0x38] sm:$0xff] %vm262_vm1, %v7762_v18  ;;  %7713 = vmatprep.subr.msk.bf16.mxu1 %vm2004_vm2, %v7901_v21  ;;  %v7915_v23 = vld [vmem:[%s9820_s2] ss:$0 sm:$0xff]  ;;  %vm1647_vm3 = vsmask.f32 256  ;;  %s9629_s10 = scalar_lea.vmem %s9823_s5, %s6729_s27 }
  0x12   : > { %v7731_v2 = vld [vmem:[%s7820_s30] sm:$0xff]   ;;  %v7732_v3 = vld [vmem:[%s7820_s30 + $0x8] sm:$0xff]   ;;  %v7733_v4 = vld [vmem:[%s7820_s30 + $0x10] sm:$0xff]   ;;  %271 = vst.msk [vmem:[#allocation2 + $0x40] sm:$0xff] %vm262_vm1, %v7762_v18  ;;  %vm4176_vm4 = vsmask.f32 7424 }
  0x13   : > { %7081 = vmatpush3.bf16.msra.mxu0 %v7730_v1  ;;  %7082 = vmatprep.mubr.msk.bf16.mxu0 %vm436_vm0, %v7731_v2  ;;  %v7734_v5 = vld [vmem:[%s7820_s30 + $0x18] sm:$0xff]   ;;  %v7735_v6 = vld [vmem:[%s7820_s30 + $0x20] sm:$0xff]   ;;  %v7736_v7 = vld [vmem:[%s7820_s30 + $0x28] sm:$0xff]   ;;  %272 = vst.msk [vmem:[#allocation2 + $0x48] sm:$0xff] %vm262_vm1, %v7762_v18 }
  0x14   : > { %v7737_v8 = vld [vmem:[%s7820_s30 + $0x30] sm:$0xff]   ;;  %v7738_v9 = vld [vmem:[%s7820_s30 + $0x38] sm:$0xff]   ;;  %v7739_v10 = vld [vmem:[%s7820_s30 + $0x40] sm:$0xff]   ;;  %273 = vst.msk [vmem:[#allocation2 + $0x50] sm:$0xff] %vm262_vm1, %v7762_v18  ;;  %7710 = vmatprep.subr.msk.bf16.mxu0 %vm2004_vm2, %v6398_v19 }
  0x15   : > { %v7740_v11 = vld [vmem:[%s7820_s30 + $0x48] sm:$0xff]   ;;  %v7741_v12 = vld [vmem:[%s7820_s30 + $0x50] sm:$0xff]   ;;  %v7742_v13 = vld [vmem:[%s7820_s30 + $0x58] sm:$0xff]   ;;  %274 = vst.msk [vmem:[#allocation2 + $0x58] sm:$0xff] %vm262_vm1, %v7762_v18 }
  0x16   : > { %7083 = vmatmul.mubr.msk.bf16.vlgmr.msra.gmra.mrb[0].mxu0 %vm436_vm0, %v7732_v3  ;;  %v7743_v14 = vld [vmem:[%s7820_s30 + $0x60] sm:$0xff]   ;;  %v7744_v15 = vld [vmem:[%s7820_s30 + $0x68] sm:$0xff]   ;;  %v7745_v16 = vld [vmem:[%s7820_s30 + $0x70] sm:$0xff]   ;;  %275 = vst.msk [vmem:[#allocation2 + $0x60] sm:$0xff] %vm262_vm1, %v7762_v18 }
  0x17   : > { %7086 = vmatprep.mubr.msk.bf16.mxu0 %vm436_vm0, %v7733_v4  ;;  %v7746_v17 = vld [vmem:[%s7820_s30 + $0x78] sm:$0xff]   ;;  %276 = vst.msk [vmem:[#allocation2 + $0x68] sm:$0xff] %vm262_vm1, %v7762_v18  ;;  %277 = vst.msk [vmem:[#allocation2 + $0x70] sm:$0xff] %vm262_vm1, %v7762_v18  ;;  %7115 = vmatpush3.bf16.msra.mxu0 %v2006_v20  ;;  %v7927_v44 = vld [vmem:[#allocation2 + $0x20] sm:$0xff] }
  0x18   : > { %278 = vst.msk [vmem:[#allocation2 + $0x78] sm:$0xff] %vm262_vm1, %v7762_v18  ;;  %279 = vst.msk [vmem:[#allocation2 + $0x80] sm:$0xff] %vm262_vm1, %v7762_v18  ;;  %7712 = vmatprep.subr.msk.bf16.mxu0 %vm2004_vm2, %v7908_v22  ;;  %v7923_v41 = vld [vmem:[#allocation2 + $0x30] sm:$0xff]  ;;  %v1661_v53 = vshrl.u32 %v7927_v44, 16 }
  0x19   : > { %280 = vst.msk [vmem:[#allocation2 + $0x88] sm:$0xff] %vm262_vm1, %v7762_v18  ;;  %281 = vst.msk [vmem:[#allocation2 + $0x90] sm:$0xff] %vm262_vm1, %v7762_v18  ;;  %v7930_v47 = vld [vmem:[#allocation2 + $0x10] sm:$0xff]  ;;  %v1677_v50 = vshrl.u32 %v7923_v41, 16  ;;  %v7938_v58 = vld [vmem:[#allocation2 + $0x40] sm:$0xff]  ;;  %v1680_v0 = vshll.u32 %v7923_v41, 16 }
  0x1a   : > { %282 = vst.msk [vmem:[#allocation2 + $0x98] sm:$0xff] %vm262_vm1, %v7762_v18  ;;  %283 = vst.msk [vmem:[#allocation2 + $0xa0] sm:$0xff] %vm262_vm1, %v7762_v18  ;;  %v1649_v56 = vshrl.u32 %v7930_v47, 16  ;;  %v1663_v4 = vrot.slane %v1661_v53, 7 }
  0x1b   : > { %284 = vst.msk [vmem:[#allocation2 + $0xa8] sm:$0xff] %vm262_vm1, %v7762_v18  ;;  %285 = vst.msk [vmem:[#allocation2 + $0xb0] sm:$0xff] %vm262_vm1, %v7762_v18  ;;  %v7933_v49 = vld [vmem:[#allocation2 + $0x50] sm:$0xff]  ;;  %v7943_v63 = vrot.slane %v1677_v50, 7 }
  0x1c   : > { %286 = vst.msk [vmem:[#allocation2 + $0xb8] sm:$0xff] %vm262_vm1, %v7762_v18  ;;  %287 = vst.msk [vmem:[#allocation2 + $0xc0] sm:$0xff] %vm262_vm1, %v7762_v18  ;;  %v1709_v59 = vshrl.u32 %v7933_v49, 16 }
  0x1d   : > { %288 = vst.msk [vmem:[#allocation2 + $0xc8] sm:$0xff] %vm262_vm1, %v7762_v18  ;;  %289 = vst.msk [vmem:[#allocation2 + $0xd0] sm:$0xff] %vm262_vm1, %v7762_v18 }
  0x1e   : > { %7087 = vmatmul.mubr.msk.bf16.gmra.mrb[4].mxu0 %vm436_vm0, %v7734_v5  ;;  %290 = vst.msk [vmem:[#allocation2 + $0xd8] sm:$0xff] %vm262_vm1, %v7762_v18  ;;  %291 = vst.msk [vmem:[#allocation2 + $0xe0] sm:$0xff] %vm262_vm1, %v7762_v18  ;;  %v1664_v5 = vshll.u32 %v7927_v44, 16 }
  0x1f   : > { %7090 = vmatprep.mubr.msk.bf16.mxu0 %vm436_vm0, %v7735_v6  ;;  %292 = vst.msk [vmem:[#allocation2 + $0xe8] sm:$0xff] %vm262_vm1, %v7762_v18  ;;  %293 = vst.msk [vmem:[#allocation2 + $0xf0] sm:$0xff] %vm262_vm1, %v7762_v18 }
  0x20   : > { %294 = vst.msk [vmem:[#allocation2 + $0xf8] sm:$0xff] %vm262_vm1, %v7762_v18  ;;  %295 = vst.msk [vmem:[#allocation2 + $0x100] sm:$0xff] %vm262_vm1, %v7762_v18 }
  0x21   : > { %296 = vst.msk [vmem:[#allocation2 + $0x108] sm:$0xff] %vm262_vm1, %v7762_v18  ;;  %297 = vst.msk [vmem:[#allocation2 + $0x110] sm:$0xff] %vm262_vm1, %v7762_v18 }
  0x22   : > { %298 = vst.msk [vmem:[#allocation2 + $0x118] sm:$0xff] %vm262_vm1, %v7762_v18  ;;  %299 = vst.msk [vmem:[#allocation2 + $0x120] sm:$0xff] %vm262_vm1, %v7762_v18 }
  0x23   : > { %300 = vst.msk [vmem:[#allocation2 + $0x128] sm:$0xff] %vm262_vm1, %v7762_v18 }
  0x26   : > { %7091 = vmatmul.mubr.msk.bf16.gmra.mrb[8].mxu0 %vm436_vm0, %v7736_v7 }
  0x27   : > { %7094 = vmatprep.mubr.msk.bf16.mxu0 %vm436_vm0, %v7737_v8 }
  0x2e   : > { %7095 = vmatmul.mubr.msk.bf16.gmra.mrb[12].mxu0 %vm436_vm0, %v7738_v9  ;;  %v7954_v9 = vrot.slane %v1649_v56, 7  ;;  %v1607_v56 = vld [vmem:[#allocation2] sm:$0x80] }
  0x2f   : > { %7098 = vmatprep.mubr.msk.bf16.mxu0 %vm436_vm0, %v7739_v10 }
  0x36   : > { %7099 = vmatmul.mubr.msk.bf16.gmra.mrb[16].mxu0 %vm436_vm0, %v7740_v11  ;;  %v1693_v11 = vshrl.u32 %v7938_v58, 16 }
  0x37   : > { %7102 = vmatprep.mubr.msk.bf16.mxu0 %vm436_vm0, %v7741_v12 }
  0x3e   : > { %7103 = vmatmul.mubr.msk.bf16.gmra.mrb[20].mxu0 %vm436_vm0, %v7742_v13 }
  0x3f   : > { %7106 = vmatprep.mubr.msk.bf16.mxu0 %vm436_vm0, %v7743_v14 }
  0x46   : > { %7107 = vmatmul.mubr.msk.bf16.gmra.mrb[24].mxu0 %vm436_vm0, %v7744_v15  ;;  %v7961_v15 = vrot.slane %v1709_v59, 7 }
  0x47   : > { %7110 = vmatprep.mubr.msk.bf16.mxu0 %vm436_vm0, %v7745_v16  ;;  %v1712_v16 = vshll.u32 %v7933_v49, 16 }
  0x4e   : > { %7111 = vmatmul.mubr.msk.bf16.gmra.mrb[28].mxu0 %vm436_vm0, %v7746_v17 }
  0xe9   : > { %v7084_v24 = vpop.f32.mrb[0].mxu0 }
  0xea   : > { %v528_v25 = vadd.f32 %v7084_v24, %v7915_v23  ;;  %v519_v26 = vpop.f32.mrb[1].mxu0 }
  0xeb   : > { %v520_v27 = vadd.f32 %v7915_v23, %v519_v26  ;;  %v7085_v28 = vpop.f32.mrb[2].mxu0  ;;  %v1666_v26 = vor.u32 %v1664_v5, %v1663_v4 }
  0xec   : > { %v531_v29 = vadd.f32 %v7085_v28, %v7915_v23  ;;  %v522_v30 = vpop.f32.mrb[3].mxu0  ;;  %v648_v32 = vmax.f32 %v528_v25, 0.0 }
  0xed   : > { %v523_v31 = vadd.f32 %v7915_v23, %v522_v30  ;;  %v646_v34 = vmax.f32 %v520_v27, 0.0 }
  0xee   : > { %v649_v33 = vmax.f32 %v531_v29, 0.0 }
  0xef   : > { %v647_v35 = vmax.f32 %v523_v31, 0.0  ;;  %v7968_v31 = vld [vmem:[#allocation2 + $0x60] sm:$0xff] }
  0xf0   : > { %v679_v36 = vpack.c.bf16 %v649_v33, %v648_v32  ;;  %v7970_v33 = vrot.slane %v1693_v11, 7  ;;  %v1696_v11 = vshll.u32 %v7938_v58, 16 }
  0xf1   : > { %v678_v37 = vpack.c.bf16 %v647_v35, %v646_v34  ;;  %v7088_v38 = vpop.f32.mrb[4].mxu0  ;;  %v1682_v34 = vor.u32 %v1680_v0, %v7943_v63  ;;  %v7973_v35 = vld [vmem:[#allocation2 + $0x8] sm:$0xff] }
  0xf2   : > { %695 = vst.msk [vmem:[#allocation2 + $0x28] sm:$0xff] %vm262_vm1, %v679_v36  ;;  %v544_v39 = vadd.f32 %v7088_v38, %v7915_v23  ;;  %v535_v40 = vpop.f32.mrb[5].mxu0 }
  0xf3   : > { %694 = vst.msk [vmem:[#allocation2 + $0x18] sm:$0xff] %vm262_vm1, %v678_v37  ;;  %v536_v42 = vadd.f32 %v7915_v23, %v535_v40  ;;  %v7089_v43 = vpop.f32.mrb[6].mxu0  ;;  %v1714_v40 = vor.u32 %v1712_v16, %v7961_v15 }
  0xf4   : > { %v547_v45 = vadd.f32 %v7089_v43, %v7915_v23  ;;  %v538_v46 = vpop.f32.mrb[7].mxu0  ;;  %v652_v51 = vmax.f32 %v544_v39, 0.0 }
  0xf5   : > { %v539_v48 = vadd.f32 %v7915_v23, %v538_v46  ;;  %v650_v54 = vmax.f32 %v536_v42, 0.0  ;;  %v2320_v42 = vsel %vm2004_vm2, %v7908_v22, 0  ;;  %v7998_v22 = vld [vmem:[%s9821_s3 + $0x4] sm:$0xf] }
  0xf6   : > { %v653_v52 = vmax.f32 %v547_v45, 0.0 }
  0xf7   : > { %v651_v55 = vmax.f32 %v539_v48, 0.0 }
  0xf8   : > { %v681_v57 = vpack.c.bf16 %v653_v52, %v652_v51  ;;  %v1725_v51 = vshrl.u32 %v7968_v31, 16 }
  0xf9   : > { %v680_v60 = vpack.c.bf16 %v651_v55, %v650_v54  ;;  %v7092_v61 = vpop.f32.mrb[8].mxu0  ;;  %v7941_v62 = vld [vmem:[#allocation2 + $0x28] sm:$0xff] }
  0xfa   : > { %697 = vst.msk [vmem:[#allocation2 + $0x48] sm:$0xff] %vm262_vm1, %v681_v57  ;;  %v560_v1 = vadd.f32 %v7092_v61, %v7915_v23  ;;  %v551_v2 = vpop.f32.mrb[9].mxu0  ;;  %v7948_v3 = vld [vmem:[#allocation2 + $0x18] sm:$0xff]  ;;  %v1669_v6 = vshrl.u32 %v7941_v62, 16  ;;  %v1672_v20 = vshll.u32 %v7941_v62, 16  ;;  %v2302_v57 = vshrl.u32 %v7973_v35, 16 }
  0xfb   : > { %696 = vst.msk [vmem:[#allocation2 + $0x38] sm:$0xff] %vm262_vm1, %v680_v60  ;;  %v552_v7 = vadd.f32 %v7915_v23, %v551_v2  ;;  %v7093_v8 = vpop.f32.mrb[10].mxu0  ;;  %v1653_v10 = vshrl.u32 %v7948_v3, 16  ;;  %v1656_v19 = vshll.u32 %v7948_v3, 16 }
  0xfc   : > { %v563_v12 = vadd.f32 %v7093_v8, %v7915_v23  ;;  %v554_v13 = vpop.f32.mrb[11].mxu0  ;;  %v7959_v14 = vrot.slane %v1669_v6, 7  ;;  %v656_v24 = vmax.f32 %v560_v1, 0.0 }
  0xfd   : > { %v555_v17 = vadd.f32 %v7915_v23, %v554_v13  ;;  %v1655_v18 = vrot.slane %v1653_v10, 7  ;;  %v654_v27 = vmax.f32 %v552_v7, 0.0  ;;  %v8017_v7 = vld [vmem:[#allocation2 + $0x70] sm:$0xff] }
  0xfe   : > { %v657_v25 = vmax.f32 %v563_v12, 0.0  ;;  %v1674_v30 = vor.u32 %v1672_v20, %v7959_v14  ;;  %v2298_v12 = vshrl.u32 %v1607_v56, 16 }
  0xff   : > { %v655_v28 = vmax.f32 %v555_v17, 0.0  ;;  %v1658_v29 = vor.u32 %v1656_v19, %v1655_v18  ;;  %v7988_v43 = vsel %vm1647_vm3, %v1655_v18, %v1666_v26  ;;  %v8023_v17 = vrot.slane %v2302_v57, 7 }
 0x100   : > { %v683_v32 = vpack.c.bf16 %v657_v25, %v656_v24  ;;  %v8004_v52 = vsel %vm1647_vm3, %v1663_v4, %v1674_v30  ;;  %v2305_v18 = vshll.u32 %v7973_v35, 16  ;;  %v2636_v24 = vsel %vm2004_vm2, %v7901_v21, 0 }
 0x101   : > { %v682_v36 = vpack.c.bf16 %v655_v28, %v654_v27  ;;  %v7977_v37 = vsel %vm1647_vm3, %v7954_v9, %v1658_v29  ;;  %v7096_v38 = vpop.f32.mrb[12].mxu0  ;;  %v7979_v39 = vld [vmem:[#allocation2 + $0x48] sm:$0xff]  ;;  %v1741_v25 = vshrl.u32 %v8017_v7, 16  ;;  %v1727_v28 = vrot.slane %v1725_v51, 7 }
 0x102   : > { %699 = vst.msk [vmem:[#allocation2 + $0x68] sm:$0xff] %vm262_vm1, %v683_v32  ;;  %7116 = vmatprep.mubr.msk.bf16.mxu0 %vm262_vm1, %v7977_v37  ;;  %v576_v45 = vadd.f32 %v7096_v38, %v7915_v23  ;;  %v567_v46 = vpop.f32.mrb[13].mxu0  ;;  %v1701_v48 = vshrl.u32 %v7979_v39, 16  ;;  %v7992_v50 = vld [vmem:[#allocation2 + $0x38] sm:$0xff]  ;;  %v1704_v1 = vshll.u32 %v7979_v39, 16  ;;  %v1728_v29 = vshll.u32 %v7968_v31, 16 }
 0x103   : > { %698 = vst.msk [vmem:[#allocation2 + $0x58] sm:$0xff] %vm262_vm1, %v682_v36  ;;  %7117 = vmatmul.mubr.msk.bf16.vlgmr.msra.gmra.mrb[32].mxu0 %vm262_vm1, %v7988_v43  ;;  %v568_v53 = vadd.f32 %v7915_v23, %v567_v46  ;;  %v7097_v54 = vpop.f32.mrb[14].mxu0  ;;  %v1685_v55 = vshrl.u32 %v7992_v50, 16  ;;  %v1688_v6 = vshll.u32 %v7992_v50, 16  ;;  %v8044_v36 = vld [vmem:[%s9821_s3 + $0x10] sm:$0xf]  ;;  %v8051_v21 = vsel %vm1647_vm3, %v7959_v14, %v1682_v34 }
 0x104   : > { %v660_v59 = vmax.f32 %v576_v45, 0.0  ;;  %7120 = vmatprep.mubr.msk.bf16.mxu0 %vm262_vm1, %v8004_v52  ;;  %v579_v60 = vadd.f32 %v7097_v54, %v7915_v23  ;;  %v570_v61 = vpop.f32.mrb[15].mxu0  ;;  %v1703_v0 = vrot.slane %v1701_v48, 7  ;;  %7181 = vmatpush3.bf16.msra.mxu0 %v2320_v42  ;;  %v2300_v46 = vrot.slane %v2298_v12, 7 }
 0x105   : > { %v658_v2 = vmax.f32 %v568_v53, 0.0  ;;  %v571_v4 = vadd.f32 %v7915_v23, %v570_v61  ;;  %v8014_v5 = vrot.slane %v1685_v55, 7  ;;  %7714 = vmatprep.subr.msk.bf16.mxu0 %vm2004_vm2, %v7998_v22  ;;  %v2307_v53 = vor.u32 %v2305_v18, %v8023_v17 }
 0x106   : > { %v661_v8 = vmax.f32 %v579_v60, 0.0  ;;  %v1706_v10 = vor.u32 %v1704_v1, %v1703_v0  ;;  %v8036_v27 = vsel %vm1647_vm3, %v1703_v0, %v1714_v40  ;;  %v1698_v1 = vor.u32 %v1696_v11, %v7970_v33 }
 0x107   : > { %v659_v13 = vmax.f32 %v571_v4, 0.0  ;;  %v1690_v16 = vor.u32 %v1688_v6, %v8014_v5  ;;  %v2309_v12 = vshll.u32 %v7930_v47, 16 }
 0x108   : > { %v685_v19 = vpack.c.bf16 %v661_v8, %v660_v59  ;;  %v8028_v20 = vsel %vm1647_vm3, %v7970_v33, %v1706_v10  ;;  %v8086_v33 = vsel %vm1647_vm3, %v8014_v5, %v1698_v1 }
 0x109   : > { %v684_v26 = vpack.c.bf16 %v659_v13, %v658_v2  ;;  %7128 = vmatprep.mubr.msk.bf16.mxu1 %vm262_vm1, %v8028_v20  ;;  %v7100_v30 = vpop.f32.mrb[16].mxu0  ;;  %v8039_v32 = vld [vmem:[#allocation2 + $0x68] sm:$0xff]  ;;  %v8062_v48 = vsel %vm1647_vm3, %v7943_v63, %v1690_v16  ;;  %v1730_v2 = vor.u32 %v1728_v29, %v1727_v28 }
 0x10a   : > { %701 = vst.msk [vmem:[#allocation2 + $0x88] sm:$0xff] %vm262_vm1, %v685_v19  ;;  %7129 = vmatmul.mubr.msk.bf16.vlgmr.msra.gmra.mrb[0].mxu1 %vm262_vm1, %v8036_v27  ;;  %v8053_v38 = vld [vmem:[#allocation2 + $0x58] sm:$0xff]  ;;  %v592_v40 = vadd.f32 %v7100_v30, %v7915_v23  ;;  %v1733_v42 = vshrl.u32 %v8039_v32, 16  ;;  %v583_v45 = vpop.f32.mrb[17].mxu0  ;;  %v1736_v56 = vshll.u32 %v8039_v32, 16  ;;  %v2308_v19 = vsel %vm1647_vm3, %v2300_v46, %v2307_v53  ;;  %v8095_v30 = vld [vmem:[#allocation2 + $0x80] sm:$0xff] }
 0x10b   : > { %700 = vst.msk [vmem:[#allocation2 + $0x78] sm:$0xff] %vm262_vm1, %v684_v26  ;;  %7121 = vmatmul.mubr.msk.bf16.gmra.mrb[36].mxu0 %vm262_vm1, %v8051_v21  ;;  %7247 = vmatpush3.bf16.msra.mxu1 %v2636_v24  ;;  %v1717_v14 = vshrl.u32 %v8053_v38, 16  ;;  %v584_v34 = vadd.f32 %v7915_v23, %v583_v45  ;;  %v7101_v51 = vpop.f32.mrb[18].mxu0  ;;  %v1720_v60 = vshll.u32 %v8053_v38, 16  ;;  %v1743_v24 = vrot.slane %v1741_v25, 7 }
 0x10c   : > { %7124 = vmatprep.mubr.msk.bf16.mxu0 %vm262_vm1, %v8062_v48  ;;  %v664_v54 = vmax.f32 %v592_v40, 0.0  ;;  %v1735_v55 = vrot.slane %v1733_v42, 7  ;;  %v595_v57 = vadd.f32 %v7101_v51, %v7915_v23  ;;  %v586_v59 = vpop.f32.mrb[19].mxu0  ;;  %7715 = vmatprep.subr.msk.bf16.mxu1 %vm2004_vm2, %v8044_v36 }
 0x10d   : > { %v1719_v63 = vrot.slane %v1717_v14, 7  ;;  %v662_v61 = vmax.f32 %v584_v34, 0.0  ;;  %v587_v0 = vadd.f32 %v7915_v23, %v586_v59  ;;  %v2311_v34 = vor.u32 %v2309_v12, %v7954_v9 }
 0x10e   : > { %v665_v4 = vmax.f32 %v595_v57, 0.0  ;;  %v1738_v8 = vor.u32 %v1736_v56, %v1735_v55  ;;  %v1757_v57 = vshrl.u32 %v8095_v30, 16 }
 0x10f   : > { %v1722_v6 = vor.u32 %v1720_v60, %v1719_v63  ;;  %v663_v10 = vmax.f32 %v587_v0, 0.0  ;;  %v8089_v11 = vsel %vm1647_vm3, %v1719_v63, %v1730_v2  ;;  %v2312_v2 = vsel %vm1647_vm3, %v8023_v17, %v2311_v34 }
 0x110   : > { %v687_v13 = vpack.c.bf16 %v665_v4, %v664_v54  ;;  %v8103_v5 = vsel %vm1647_vm3, %v1727_v28, %v1738_v8  ;;  %v1759_v8 = vrot.slane %v1757_v57, 7  ;;  %v3058_v17 = vsel %vm2004_vm2, %v7998_v22, 0 }
 0x111   : > { %v8079_v16 = vsel %vm1647_vm3, %v7961_v15, %v1722_v6  ;;  %v686_v18 = vpack.c.bf16 %v663_v10, %v662_v61  ;;  %v7104_v26 = vpop.f32.mrb[20].mxu0  ;;  %v1744_v15 = vshll.u32 %v8017_v7, 16  ;;  %v8113_v53 = vld [vmem:[#allocation2 + $0x88] sm:$0xff] }
 0x112   : > { %7132 = vmatprep.mubr.msk.bf16.mxu1 %vm262_vm1, %v8079_v16  ;;  %703 = vst.msk [vmem:[#allocation2 + $0xa8] sm:$0xff] %vm262_vm1, %v687_v13  ;;  %v8093_v29 = vld [vmem:[#allocation2 + $0x78] sm:$0xff]  ;;  %v608_v25 = vadd.f32 %v7104_v26, %v7915_v23  ;;  %v599_v40 = vpop.f32.mrb[21].mxu0  ;;  %v1765_v0 = vshrl.u32 %v8113_v53, 16 }
 0x113   : > { %7125 = vmatmul.mubr.msk.bf16.gmra.mrb[40].mxu0 %vm262_vm1, %v8086_v33  ;;  %7133 = vmatmul.mubr.msk.bf16.gmra.mrb[4].mxu1 %vm262_vm1, %v8089_v11  ;;  %702 = vst.msk [vmem:[#allocation2 + $0x98] sm:$0xff] %vm262_vm1, %v686_v18  ;;  %v1749_v42 = vshrl.u32 %v8093_v29, 16  ;;  %v1752_v45 = vshll.u32 %v8093_v29, 16  ;;  %v600_v46 = vadd.f32 %v7915_v23, %v599_v40  ;;  %v7105_v14 = vpop.f32.mrb[22].mxu0  ;;  %v1746_v60 = vor.u32 %v1744_v15, %v1743_v24 }
 0x114   : > { %7136 = vmatprep.mubr.msk.bf16.mxu1 %vm262_vm1, %v8103_v5  ;;  %7182 = vmatprep.mubr.msk.bf16.mxu0 %vm262_vm1, %v2308_v19  ;;  %v668_v51 = vmax.f32 %v608_v25, 0.0  ;;  %v611_v28 = vadd.f32 %v7105_v14, %v7915_v23  ;;  %v602_v54 = vpop.f32.mrb[23].mxu0  ;;  %v1760_v18 = vshll.u32 %v8095_v30, 16  ;;  %v8139_v25 = vld [vmem:[#allocation2 + $0x90] sm:$0xff] }
 0x115   : > { %v1751_v56 = vrot.slane %v1749_v42, 7  ;;  %v666_v59 = vmax.f32 %v600_v46, 0.0  ;;  %v603_v63 = vadd.f32 %v7915_v23, %v602_v54  ;;  %v8125_v13 = vsel %vm1647_vm3, %v1735_v55, %v1746_v60 }
 0x116   : > { %v669_v61 = vmax.f32 %v611_v28, 0.0  ;;  %v1768_v55 = vshll.u32 %v8113_v53, 16  ;;  %v1762_v28 = vor.u32 %v1760_v18, %v1759_v8  ;;  %v1773_v54 = vshrl.u32 %v8139_v25, 16 }
 0x117   : > { %v1754_v9 = vor.u32 %v1752_v45, %v1751_v56  ;;  %v667_v1 = vmax.f32 %v603_v63, 0.0 }
 0x118   : > { %v689_v4 = vpack.c.bf16 %v669_v61, %v668_v51 }
 0x119   : > { %v8122_v6 = vsel %vm1647_vm3, %v1743_v24, %v1754_v9  ;;  %v688_v10 = vpack.c.bf16 %v667_v1, %v666_v59  ;;  %v7108_v12 = vpop.f32.mrb[24].mxu0  ;;  %v1767_v24 = vrot.slane %v1765_v0, 7  ;;  %v8152_v1 = vsel %vm1647_vm3, %v1751_v56, %v1762_v28 }
 0x11a   : > { %705 = vst.msk [vmem:[#allocation2 + $0xc8] sm:$0xff] %vm262_vm1, %v689_v4  ;;  %v8129_v19 = vld [vmem:[#allocation2 + $0x98] sm:$0xff]  ;;  %v624_v26 = vadd.f32 %v7108_v12, %v7915_v23  ;;  %v615_v15 = vpop.f32.mrb[25].mxu0  ;;  %v1776_v4 = vshll.u32 %v8139_v25, 16 }
 0x11b   : > { %7137 = vmatmul.mubr.msk.bf16.gmra.mrb[8].mxu1 %vm262_vm1, %v8125_v13  ;;  %7183 = vmatmul.mubr.msk.bf16.vlgmr.msra.gmra.mrb[44].mxu0 %vm262_vm1, %v2312_v2  ;;  %704 = vst.msk [vmem:[#allocation2 + $0xb8] sm:$0xff] %vm262_vm1, %v688_v10  ;;  %v616_v40 = vadd.f32 %v7915_v23, %v615_v15  ;;  %v7109_v42 = vpop.f32.mrb[26].mxu0  ;;  %v1781_v14 = vshrl.u32 %v8129_v19, 16  ;;  %v1770_v59 = vor.u32 %v1768_v55, %v1767_v24  ;;  %v1784_v61 = vshll.u32 %v8129_v19, 16 }
 0x11c   : > { %7186 = vmatprep.mubr.msk.bf16.mxu0 %vm262_vm1, %v7977_v37  ;;  %7140 = vmatprep.mubr.msk.bf16.mxu1 %vm262_vm1, %v8122_v6  ;;  %v672_v22 = vmax.f32 %v624_v26, 0.0  ;;  %v627_v45 = vadd.f32 %v7109_v42, %v7915_v23  ;;  %v618_v46 = vpop.f32.mrb[27].mxu0  ;;  %v1775_v2 = vrot.slane %v1773_v54, 7  ;;  %v8164_v26 = vld [vmem:[#allocation2 + $0xa0] sm:$0xff] }
 0x11d   : > { %v670_v34 = vmax.f32 %v616_v40, 0.0  ;;  %v619_v51 = vadd.f32 %v7915_v23, %v618_v46  ;;  %7313 = vmatpush3.bf16.msra.mxu0 %v3058_v17  ;;  %v1783_v60 = vrot.slane %v1781_v14, 7  ;;  %v8162_v18 = vsel %vm1647_vm3, %v1759_v8, %v1770_v59  ;;  %v8172_v17 = vld [vmem:[#allocation2 + $0xa8] sm:$0xff] }
 0x11e   : > { %v673_v57 = vmax.f32 %v627_v45, 0.0  ;;  %v1778_v45 = vor.u32 %v1776_v4, %v1775_v2  ;;  %v1789_v46 = vshrl.u32 %v8164_v26, 16 }
 0x11f   : > { %v671_v63 = vmax.f32 %v619_v51, 0.0  ;;  %v1786_v40 = vor.u32 %v1784_v61, %v1783_v60 }
 0x120   : > { %v691_v37 = vpack.c.bf16 %v673_v57, %v672_v22  ;;  %v8182_v59 = vsel %vm1647_vm3, %v1767_v24, %v1778_v45 }
 0x121   : > { %v690_v9 = vpack.c.bf16 %v671_v63, %v670_v34  ;;  %v7112_v0 = vpop.f32.mrb[28].mxu0  ;;  %v1797_v34 = vshrl.u32 %v8172_v17, 16  ;;  %v8179_v54 = vsel %vm1647_vm3, %v1775_v2, %v1786_v40  ;;  %v1791_v63 = vrot.slane %v1789_v46, 7  ;;  %v8214_v40 = vld [vmem:[#allocation2 + $0xc0] sm:$0xff] }
 0x122   : > { %707 = vst.msk [vmem:[#allocation2 + $0xe8] sm:$0xff] %vm262_vm1, %v691_v37  ;;  %v640_v10 = vadd.f32 %v7112_v0, %v7915_v23  ;;  %v631_v12 = vpop.f32.mrb[29].mxu0  ;;  %v1792_v37 = vshll.u32 %v8164_v26, 16  ;;  %v8185_v61 = vld [vmem:[#allocation2 + $0xb8] sm:$0xff]  ;;  %v8193_v0 = vld [vmem:[#allocation2 + $0xb0] sm:$0xff]  ;;  %9846 = vst [vmem:[#allocation4_spill] sm:$0xff] %v8214_v40 }
 0x123   : > { %7141 = vmatmul.mubr.msk.bf16.gmra.mrb[12].mxu1 %vm262_vm1, %v8152_v1  ;;  %7187 = vmatmul.mubr.msk.bf16.gmra.mrb[48].mxu0 %vm262_vm1, %v7988_v43  ;;  %706 = vst.msk [vmem:[#allocation2 + $0xd8] sm:$0xff] %vm262_vm1, %v690_v9  ;;  %v632_v56 = vadd.f32 %v7915_v23, %v631_v12  ;;  %v7113_v15 = vpop.f32.mrb[30].mxu0  ;;  %9845 = vst [vmem:[#allocation3_spill] sm:$0xff] %v8185_v61  ;;  %v1800_v9 = vshll.u32 %v8172_v17, 16  ;;  %v1813_v24 = vshrl.u32 %v8185_v61, 16  ;;  %v1805_v4 = vshrl.u32 %v8193_v0, 16 }
 0x124   : > { %7144 = vmatprep.mubr.msk.bf16.mxu1 %vm262_vm1, %v8162_v18  ;;  %7190 = vmatprep.mubr.msk.bf16.mxu0 %vm262_vm1, %v8004_v52  ;;  %v676_v55 = vmax.f32 %v640_v10, 0.0  ;;  %v643_v43 = vadd.f32 %v7113_v15, %v7915_v23  ;;  %v634_v8 = vpop.f32.mrb[31].mxu0  ;;  %v1794_v2 = vor.u32 %v1792_v37, %v1791_v63  ;;  %v1821_v45 = vshrl.u32 %v8214_v40, 16 }
 0x125   : > { %v674_v42 = vmax.f32 %v632_v56, 0.0  ;;  %v635_v22 = vadd.f32 %v7915_v23, %v634_v8  ;;  %v1799_v23 = vrot.slane %v1797_v34, 7  ;;  %v1815_v12 = vrot.slane %v1813_v24, 7 }
 0x126   : > { %v677_v14 = vmax.f32 %v643_v43, 0.0  ;;  %v1816_v56 = vshll.u32 %v8185_v61, 16  ;;  %v8204_v15 = vsel %vm1647_vm3, %v1783_v60, %v1794_v2  ;;  %v1808_v43 = vshll.u32 %v8193_v0, 16  ;;  %v8220_v60 = vld [vmem:[#allocation2 + $0xc8] sm:$0xff]  ;;  %v8324_v61 = vld [vmem:[#allocation2 + $0x110] sm:$0xff] }
 0x127   : > { %v675_v51 = vmax.f32 %v635_v22, 0.0  ;;  %v1802_v10 = vor.u32 %v1800_v9, %v1799_v23  ;;  %9847 = vst [vmem:[#allocation5_spill] sm:$0xff] %v8220_v60  ;;  %v1829_v46 = vshrl.u32 %v8220_v60, 16  ;;  %v1832_v37 = vshll.u32 %v8220_v60, 16  ;;  %v8238_v9 = vld [vmem:[#allocation2 + $0xd0] sm:$0xff] }
 0x128   : > { %v693_v28 = vpack.c.bf16 %v677_v14, %v676_v55  ;;  %v1807_v55 = vrot.slane %v1805_v4, 7  ;;  %9849 = vst [vmem:[#allocation7_spill] sm:$0xff] %v8238_v9  ;;  %v1837_v2 = vshrl.u32 %v8238_v9, 16 }
 0x129   : > { %v692_v57 = vpack.c.bf16 %v675_v51, %v674_v42  ;;  %v8212_v8 = vsel %vm1647_vm3, %v1791_v63, %v1802_v10  ;;  %v1818_v42 = vor.u32 %v1816_v56, %v1815_v12  ;;  %v1823_v51 = vrot.slane %v1821_v45, 7  ;;  %v8258_v45 = vld [vmem:[#allocation2 + $0xe0] sm:$0xff] }
 0x12a   : > { %709 = vst.msk [vmem:[#allocation2 + $0x108] sm:$0xff] %vm262_vm1, %v693_v28  ;;  %v1810_v22 = vor.u32 %v1808_v43, %v1807_v55  ;;  %v1824_v28 = vshll.u32 %v8214_v40, 16  ;;  %v1831_v63 = vrot.slane %v1829_v46, 7  ;;  %v1839_v43 = vrot.slane %v1837_v2, 7  ;;  %9850 = vst [vmem:[#allocation8_spill] sm:$0xff] %v8258_v45  ;;  %v8302_v40 = vld [vmem:[#allocation2 + $0x100] sm:$0xff] }
 0x12b   : > { %7145 = vmatmul.mubr.msk.bf16.gmra.mrb[16].mxu1 %vm262_vm1, %v8182_v59  ;;  %7191 = vmatmul.mubr.msk.bf16.gmra.mrb[52].mxu0 %vm262_vm1, %v8051_v21  ;;  %708 = vst.msk [vmem:[#allocation2 + $0xf8] sm:$0xff] %vm262_vm1, %v692_v57  ;;  %v8225_v14 = vsel %vm1647_vm3, %v1807_v55, %v1818_v42  ;;  %v8231_v57 = vld [vmem:[#allocation2 + $0xd8] sm:$0xff]  ;;  %v1840_v42 = vshll.u32 %v8238_v9, 16  ;;  %v8282_v9 = vld [vmem:[#allocation2 + $0xf0] sm:$0xff] }
 0x12c   : > { %7194 = vmatprep.mubr.msk.bf16.mxu0 %vm262_vm1, %v8062_v48  ;;  %7148 = vmatprep.mubr.msk.bf16.mxu1 %vm262_vm1, %v8179_v54  ;;  %v8228_v34 = vsel %vm1647_vm3, %v1799_v23, %v1810_v22  ;;  %9848 = vst [vmem:[#allocation6_spill] sm:$0xff] %v8231_v57  ;;  %v1845_v23 = vshrl.u32 %v8231_v57, 16  ;;  %v1826_v24 = vor.u32 %v1824_v28, %v1823_v51  ;;  %v1848_v56 = vshll.u32 %v8231_v57, 16 }
 0x12d   : > { %v1834_v4 = vor.u32 %v1832_v37, %v1831_v63  ;;  %v1842_v28 = vor.u32 %v1840_v42, %v1839_v43  ;;  %v1853_v37 = vshrl.u32 %v8258_v45, 16  ;;  %9853 = vst [vmem:[#allocation11_spill] sm:$0xff] %v8282_v9  ;;  %v1872_v60 = vshll.u32 %v8282_v9, 16 }
 0x12e   : > { %v1847_v10 = vrot.slane %v1845_v23, 7  ;;  %v8248_v55 = vsel %vm1647_vm3, %v1815_v12, %v1826_v24  ;;  %v8264_v12 = vld [vmem:[#allocation2 + $0xe8] sm:$0xff] }
 0x12f   : > { %v8256_v22 = vsel %vm1647_vm3, %v1823_v51, %v1834_v4  ;;  %9851 = vst [vmem:[#allocation9_spill] sm:$0xff] %v8264_v12  ;;  %v1861_v23 = vshrl.u32 %v8264_v12, 16  ;;  %v8272_v51 = vsel %vm1647_vm3, %v1831_v63, %v1842_v28  ;;  %v1855_v2 = vrot.slane %v1853_v37, 7 }
 0x130   : > { %v1850_v46 = vor.u32 %v1848_v56, %v1847_v10  ;;  %v1856_v4 = vshll.u32 %v8258_v45, 16  ;;  %v1864_v42 = vshll.u32 %v8264_v12, 16 }
 0x131   : > { %v1863_v56 = vrot.slane %v1861_v23, 7 }
 0x132   : > { %v8269_v24 = vsel %vm1647_vm3, %v1839_v43, %v1850_v46  ;;  %v8275_v57 = vld [vmem:[#allocation2 + $0xf8] sm:$0xff]  ;;  %v1858_v43 = vor.u32 %v1856_v4, %v1855_v2  ;;  %v1869_v46 = vshrl.u32 %v8282_v9, 16  ;;  %v1888_v9 = vshll.u32 %v8302_v40, 16 }
 0x133   : > { %7149 = vmatmul.mubr.msk.bf16.gmra.mrb[20].mxu1 %vm262_vm1, %v8204_v15  ;;  %7195 = vmatmul.mubr.msk.bf16.gmra.mrb[56].mxu0 %vm262_vm1, %v8086_v33  ;;  %9852 = vst [vmem:[#allocation10_spill] sm:$0xff] %v8275_v57  ;;  %v1877_v63 = vshrl.u32 %v8275_v57, 16  ;;  %v1866_v28 = vor.u32 %v1864_v42, %v1863_v56  ;;  %v1880_v45 = vshll.u32 %v8275_v57, 16 }
 0x134   : > { %7152 = vmatprep.mubr.msk.bf16.mxu1 %vm262_vm1, %v8212_v8  ;;  %7198 = vmatprep.mubr.msk.bf16.mxu0 %vm262_vm1, %v8028_v20  ;;  %v8292_v23 = vsel %vm1647_vm3, %v1847_v10, %v1858_v43  ;;  %v1871_v12 = vrot.slane %v1869_v46, 7  ;;  %v8308_v10 = vld [vmem:[#allocation2 + $0x108] sm:$0xff]  ;;  %v1885_v43 = vshrl.u32 %v8302_v40, 16 }
 0x135   : > { %v1879_v37 = vrot.slane %v1877_v63, 7  ;;  %v8300_v4 = vsel %vm1647_vm3, %v1855_v2, %v1866_v28  ;;  %9854 = vst [vmem:[#allocation12_spill] sm:$0xff] %v8308_v10  ;;  %v1893_v46 = vshrl.u32 %v8308_v10, 16 }
 0x136   : > { %v1874_v63 = vor.u32 %v1872_v60, %v1871_v12  ;;  %v1887_v28 = vrot.slane %v1885_v43, 7 }
 0x137   : > { %v1882_v42 = vor.u32 %v1880_v45, %v1879_v37  ;;  %v1895_v60 = vrot.slane %v1893_v46, 7  ;;  %v1896_v45 = vshll.u32 %v8308_v10, 16  ;;  %v1904_v46 = vshll.u32 %v8324_v61, 16 }
 0x138   : > { %v8316_v2 = vsel %vm1647_vm3, %v1863_v56, %v1874_v63  ;;  %v1901_v56 = vshrl.u32 %v8324_v61, 16 }
 0x139   : > { %v8313_v57 = vsel %vm1647_vm3, %v1871_v12, %v1882_v42  ;;  %v1890_v12 = vor.u32 %v1888_v9, %v1887_v28  ;;  %v1898_v42 = vor.u32 %v1896_v45, %v1895_v60  ;;  %v8369_v45 = vld [vmem:[%s9821_s3 + $0x8] sm:$0xf] }
 0x13a   : > { %v8334_v43 = vrot.slane %v1901_v56, 7 }
 0x13b   : > { %7153 = vmatmul.mubr.msk.bf16.gmra.mrb[24].mxu1 %vm262_vm1, %v8228_v34  ;;  %7199 = vmatmul.mubr.msk.bf16.gmra.mrb[60].mxu0 %vm262_vm1, %v8036_v27  ;;  %v8332_v63 = vsel %vm1647_vm3, %v1879_v37, %v1890_v12  ;;  %v8342_v10 = vsel %vm1647_vm3, %v1887_v28, %v1898_v42  ;;  %v6562_v28 = vld [vmem:[%s9821_s3 + $0x1c] sm:$0xf] }
 0x13c   : > { %7202 = vmatprep.mubr.msk.bf16.mxu0 %vm262_vm1, %v8079_v16  ;;  %7156 = vmatprep.mubr.msk.bf16.mxu1 %vm262_vm1, %v8225_v14  ;;  %v1906_v9 = vor.u32 %v1904_v46, %v8334_v43 }
 0x13d   : > { %7716 = vmatprep.subr.msk.bf16.mxu0 %vm2004_vm2, %v6562_v28 }
 0x13e   : > { %v8350_v37 = vsel %vm1647_vm3, %v1895_v60, %v1906_v9  ;;  %v3420_v60 = vsel %vm2004_vm2, %v8044_v36, 0 }
 0x143   : > { %7157 = vmatmul.mubr.msk.bf16.gmra.mrb[28].mxu1 %vm262_vm1, %v8248_v55  ;;  %7203 = vmatmul.mubr.msk.bf16.gmra.mrb[64].mxu0 %vm262_vm1, %v8089_v11 }
 0x144   : > { %7160 = vmatprep.mubr.msk.bf16.mxu1 %vm262_vm1, %v8256_v22  ;;  %7206 = vmatprep.mubr.msk.bf16.mxu0 %vm262_vm1, %v8103_v5 }
 0x14b   : > { %7161 = vmatmul.mubr.msk.bf16.gmra.mrb[32].mxu1 %vm262_vm1, %v8272_v51  ;;  %7207 = vmatmul.mubr.msk.bf16.gmra.mrb[68].mxu0 %vm262_vm1, %v8125_v13 }
 0x14c   : > { %7210 = vmatprep.mubr.msk.bf16.mxu0 %vm262_vm1, %v8122_v6  ;;  %7164 = vmatprep.mubr.msk.bf16.mxu1 %vm262_vm1, %v8269_v24 }
 0x153   : > { %7165 = vmatmul.mubr.msk.bf16.gmra.mrb[36].mxu1 %vm262_vm1, %v8292_v23  ;;  %7211 = vmatmul.mubr.msk.bf16.gmra.mrb[72].mxu0 %vm262_vm1, %v8152_v1 }
 0x154   : > { %7168 = vmatprep.mubr.msk.bf16.mxu1 %vm262_vm1, %v8300_v4  ;;  %7214 = vmatprep.mubr.msk.bf16.mxu0 %vm262_vm1, %v8162_v18 }
 0x15b   : > { %7169 = vmatmul.mubr.msk.bf16.gmra.mrb[40].mxu1 %vm262_vm1, %v8316_v2  ;;  %7215 = vmatmul.mubr.msk.bf16.gmra.mrb[76].mxu0 %vm262_vm1, %v8182_v59 }
 0x15c   : > { %7218 = vmatprep.mubr.msk.bf16.mxu0 %vm262_vm1, %v8179_v54  ;;  %7172 = vmatprep.mubr.msk.bf16.mxu1 %vm262_vm1, %v8313_v57 }
 0x163   : > { %7173 = vmatmul.mubr.msk.bf16.gmra.mrb[44].mxu1 %vm262_vm1, %v8332_v63  ;;  %7219 = vmatmul.mubr.msk.bf16.gmra.mrb[80].mxu0 %vm262_vm1, %v8204_v15 }
 0x164   : > { %7176 = vmatprep.mubr.msk.bf16.mxu1 %vm262_vm1, %v8342_v10  ;;  %7222 = vmatprep.mubr.msk.bf16.mxu0 %vm262_vm1, %v8212_v8 }
 0x16b   : > { %7177 = vmatmul.mubr.msk.bf16.gmra.mrb[48].mxu1 %vm262_vm1, %v8350_v37  ;;  %7223 = vmatmul.mubr.msk.bf16.gmra.mrb[84].mxu0 %vm262_vm1, %v8228_v34 }
 0x16c   : > { %7226 = vmatprep.mubr.msk.bf16.mxu0 %vm262_vm1, %v8225_v14  ;;  %7248 = vmatprep.mubr.msk.bf16.mxu1 %vm262_vm1, %v8004_v52  ;;  %v3782_v52 = vsel %vm2004_vm2, %v6562_v28, 0 }
 0x173   : > { %7227 = vmatmul.mubr.msk.bf16.gmra.mrb[88].mxu0 %vm262_vm1, %v8248_v55  ;;  %7249 = vmatmul.mubr.msk.bf16.vlgmr.msra.gmra.mrb[52].mxu1 %vm262_vm1, %v8051_v21  ;;  %v8482_v21 = vld [vmem:[#allocation2 + $0x120] sm:$0xff] }
 0x174   : > { %7379 = vmatpush3.bf16.msra.mxu1 %v3420_v60  ;;  %7230 = vmatprep.mubr.msk.bf16.mxu0 %vm262_vm1, %v8256_v22 }
 0x175   : > { %7252 = vmatprep.mubr.msk.bf16.mxu1 %vm262_vm1, %v8062_v48  ;;  %7717 = vmatprep.subr.msk.bf16.mxu1 %vm2004_vm2, %v8369_v45  ;;  %v2622_v48 = vshrl.u32 %v8482_v21, 16 }
 0x17b   : > { %7231 = vmatmul.mubr.msk.bf16.gmra.mrb[92].mxu0 %vm262_vm1, %v8272_v51  ;;  %7253 = vmatmul.mubr.msk.bf16.gmra.mrb[56].mxu1 %vm262_vm1, %v8086_v33 }
 0x17c   : > { %7234 = vmatprep.mubr.msk.bf16.mxu0 %vm262_vm1, %v8269_v24  ;;  %7256 = vmatprep.mubr.msk.bf16.mxu1 %vm262_vm1, %v8028_v20 }
 0x183   : > { %7235 = vmatmul.mubr.msk.bf16.gmra.mrb[96].mxu0 %vm262_vm1, %v8292_v23  ;;  %7257 = vmatmul.mubr.msk.bf16.gmra.mrb[60].mxu1 %vm262_vm1, %v8036_v27 }
 0x184   : > { %7238 = vmatprep.mubr.msk.bf16.mxu0 %vm262_vm1, %v8300_v4  ;;  %7260 = vmatprep.mubr.msk.bf16.mxu1 %vm262_vm1, %v8079_v16 }
 0x18b   : > { %7239 = vmatmul.mubr.msk.bf16.gmra.mrb[100].mxu0 %vm262_vm1, %v8316_v2  ;;  %7261 = vmatmul.mubr.msk.bf16.gmra.mrb[64].mxu1 %vm262_vm1, %v8089_v11 }
 0x18c   : > { %7242 = vmatprep.mubr.msk.bf16.mxu0 %vm262_vm1, %v8313_v57  ;;  %7264 = vmatprep.mubr.msk.bf16.mxu1 %vm262_vm1, %v8103_v5 }
 0x193   : > { %7243 = vmatmul.mubr.msk.bf16.gmra.mrb[104].mxu0 %vm262_vm1, %v8332_v63  ;;  %7265 = vmatmul.mubr.msk.bf16.gmra.mrb[68].mxu1 %vm262_vm1, %v8125_v13 }
 0x194   : > { %7268 = vmatprep.mubr.msk.bf16.mxu1 %vm262_vm1, %v8122_v6  ;;  %7314 = vmatprep.mubr.msk.bf16.mxu0 %vm262_vm1, %v7973_v35 }
 0x19b   : > { %7269 = vmatmul.mubr.msk.bf16.gmra.mrb[72].mxu1 %vm262_vm1, %v8152_v1  ;;  %7315 = vmatmul.mubr.msk.bf16.vlgmr.msra.gmra.mrb[108].mxu0 %vm262_vm1, %v7930_v47 }
 0x19c   : > { %7272 = vmatprep.mubr.msk.bf16.mxu1 %vm262_vm1, %v8162_v18  ;;  %7318 = vmatprep.mubr.msk.bf16.mxu0 %vm262_vm1, %v7948_v3 }
 0x19d   : > { %7445 = vmatpush3.bf16.msra.mxu0 %v3782_v52 }
 0x1a3   : > { %7273 = vmatmul.mubr.msk.bf16.gmra.mrb[76].mxu1 %vm262_vm1, %v8182_v59  ;;  %7319 = vmatmul.mubr.msk.bf16.gmra.mrb[112].mxu0 %vm262_vm1, %v7927_v44  ;;  %v2625_v59 = vshll.u32 %v8482_v21, 16 }
 0x1a4   : > { %7276 = vmatprep.mubr.msk.bf16.mxu1 %vm262_vm1, %v8179_v54  ;;  %7322 = vmatprep.mubr.msk.bf16.mxu0 %vm262_vm1, %v7941_v62  ;;  %v2624_v54 = vrot.slane %v2622_v48, 7 }
 0x1ab   : > { %7277 = vmatmul.mubr.msk.bf16.gmra.mrb[80].mxu1 %vm262_vm1, %v8204_v15  ;;  %7323 = vmatmul.mubr.msk.bf16.gmra.mrb[116].mxu0 %vm262_vm1, %v7923_v41  ;;  %v8470_v41 = vld [vmem:[#allocation2 + $0x118] sm:$0xff] }
 0x1ac   : > { %7280 = vmatprep.mubr.msk.bf16.mxu1 %vm262_vm1, %v8212_v8  ;;  %7326 = vmatprep.mubr.msk.bf16.mxu0 %vm262_vm1, %v7992_v50  ;;  %v2614_v47 = vshrl.u32 %v8470_v41, 16  ;;  %v2617_v36 = vshll.u32 %v8470_v41, 16 }
 0x1ae   : > { %v2616_v27 = vrot.slane %v2614_v47, 7  ;;  %v8539_v47 = vld [vmem:[%s9821_s3 + $0x20] sm:$0xf] }
 0x1b0   : > { %v2619_v33 = vor.u32 %v2617_v36, %v2616_v27 }
 0x1b2   : > { %v2620_v8 = vsel %vm1647_vm3, %v8334_v43, %v2619_v33 }
 0x1b3   : > { %7281 = vmatmul.mubr.msk.bf16.gmra.mrb[84].mxu1 %vm262_vm1, %v8228_v34  ;;  %7327 = vmatmul.mubr.msk.bf16.gmra.mrb[120].mxu0 %vm262_vm1, %v7938_v58 }
 0x1b4   : > { %7284 = vmatprep.mubr.msk.bf16.mxu1 %vm262_vm1, %v8225_v14  ;;  %7330 = vmatprep.mubr.msk.bf16.mxu0 %vm262_vm1, %v7979_v39  ;;  %v2627_v14 = vor.u32 %v2625_v59, %v2624_v54 }
 0x1bb   : > { %7285 = vmatmul.mubr.msk.bf16.gmra.mrb[88].mxu1 %vm262_vm1, %v8248_v55  ;;  %7331 = vmatmul.mubr.msk.bf16.gmra.mrb[124].mxu0 %vm262_vm1, %v7933_v49 }
 0x1bc   : > { %7288 = vmatprep.mubr.msk.bf16.mxu1 %vm262_vm1, %v8256_v22  ;;  %7334 = vmatprep.mubr.msk.bf16.mxu0 %vm262_vm1, %v8053_v38 }
 0x1c3   : > { %7289 = vmatmul.mubr.msk.bf16.gmra.mrb[92].mxu1 %vm262_vm1, %v8272_v51  ;;  %7335 = vmatmul.mubr.msk.bf16.gmra.mrb[128].mxu0 %vm262_vm1, %v7968_v31 }
 0x1c4   : > { %7292 = vmatprep.mubr.msk.bf16.mxu1 %vm262_vm1, %v8269_v24  ;;  %7338 = vmatprep.mubr.msk.bf16.mxu0 %vm262_vm1, %v8039_v32 }
 0x1cb   : > { %7293 = vmatmul.mubr.msk.bf16.gmra.mrb[96].mxu1 %vm262_vm1, %v8292_v23  ;;  %7339 = vmatmul.mubr.msk.bf16.gmra.mrb[132].mxu0 %vm262_vm1, %v8017_v7  ;;  %v2628_v23 = vsel %vm1647_vm3, %v2616_v27, %v2627_v14 }
 0x1cc   : > { %7296 = vmatprep.mubr.msk.bf16.mxu1 %vm262_vm1, %v8300_v4  ;;  %7342 = vmatprep.mubr.msk.bf16.mxu0 %vm262_vm1, %v8093_v29 }
 0x1d3   : > { %7297 = vmatmul.mubr.msk.bf16.gmra.mrb[100].mxu1 %vm262_vm1, %v8316_v2  ;;  %7343 = vmatmul.mubr.msk.bf16.gmra.mrb[136].mxu0 %vm262_vm1, %v8095_v30  ;;  %v9855_v2 = vld [vmem:[#allocation3_spill] sm:$0xff] }
 0x1d4   : > { %7300 = vmatprep.mubr.msk.bf16.mxu1 %vm262_vm1, %v8313_v57  ;;  %7346 = vmatprep.mubr.msk.bf16.mxu0 %vm262_vm1, %v8113_v53 }
 0x1d6   : > { %v7118_v49 = vpop.f32.mrb[32].mxu0 }
 0x1d7   : > { %v2042_v58 = vpop.f32.mrb[33].mxu0  ;;  %v9856_v49 = vld [vmem:[#allocation4_spill] sm:$0xff] }
 0x1d8   : > { %v7119_v35 = vpop.f32.mrb[34].mxu0 }
 0x1d9   : > { %v2045_v20 = vpop.f32.mrb[35].mxu0 }
 0x1db   : > { %7301 = vmatmul.mubr.msk.bf16.gmra.mrb[104].mxu1 %vm262_vm1, %v8332_v63  ;;  %7347 = vmatmul.mubr.msk.bf16.gmra.mrb[140].mxu0 %vm262_vm1, %v8139_v25 }
 0x1dc   : > { %7304 = vmatprep.mubr.msk.bf16.mxu1 %vm262_vm1, %v8342_v10  ;;  %7350 = vmatprep.mubr.msk.bf16.mxu0 %vm262_vm1, %v8129_v19 }
 0x1dd   : > { %v7130_v16 = vpop.f32.mrb[0].mxu1 }
 0x1de   : > { %v7122_v11 = vpop.f32.mrb[36].mxu0  ;;  %v8493_v5 = vpop.f32.mrb[1].mxu1 }
 0x1df   : > { %v2058_v6 = vpop.f32.mrb[37].mxu0  ;;  %v7131_v13 = vpop.f32.mrb[2].mxu1 }
 0x1e0   : > { %v7123_v1 = vpop.f32.mrb[38].mxu0  ;;  %v8495_v18 = vpop.f32.mrb[3].mxu1  ;;  %v9858_v13 = vld [vmem:[#allocation7_spill] sm:$0xff] }
 0x1e1   : > { %v2061_v15 = vpop.f32.mrb[39].mxu0  ;;  %v9859_v1 = vld [vmem:[#allocation6_spill] sm:$0xff] }
 0x1e3   : > { %7305 = vmatmul.mubr.msk.bf16.gmra.mrb[108].mxu1 %vm262_vm1, %v8350_v37  ;;  %7351 = vmatmul.mubr.msk.bf16.gmra.mrb[144].mxu0 %vm262_vm1, %v8164_v26  ;;  %v8526_v37 = vld [vmem:[%s9821_s3 + $0x14] sm:$0xf] }
 0x1e4   : > { %7354 = vmatprep.mubr.msk.bf16.mxu0 %vm262_vm1, %v8172_v17  ;;  %7308 = vmatprep.mubr.msk.bf16.mxu1 %vm262_vm1, %v2620_v8 }
 0x1e5   : > { %7718 = vmatprep.subr.msk.bf16.mxu0 %vm2004_vm2, %v8526_v37 }
 0x1e6   : > { %v7126_v34 = vpop.f32.mrb[40].mxu0  ;;  %v7134_v57 = vpop.f32.mrb[4].mxu1 }
 0x1e7   : > { %v2074_v55 = vpop.f32.mrb[41].mxu0  ;;  %v8507_v22 = vpop.f32.mrb[5].mxu1 }
 0x1e8   : > { %v7127_v24 = vpop.f32.mrb[42].mxu0  ;;  %v7135_v51 = vpop.f32.mrb[6].mxu1 }
 0x1e9   : > { %v2077_v4 = vpop.f32.mrb[43].mxu0  ;;  %v8510_v10 = vpop.f32.mrb[7].mxu1 }
 0x1eb   : > { %7309 = vmatmul.mubr.msk.bf16.gmra.mrb[112].mxu1 %vm262_vm1, %v2628_v23  ;;  %7355 = vmatmul.mubr.msk.bf16.gmra.mrb[148].mxu0 %vm262_vm1, %v8193_v0  ;;  %v9860_v23 = vld [vmem:[#allocation8_spill] sm:$0xff] }
 0x1ec   : > { %7358 = vmatprep.mubr.msk.bf16.mxu0 %vm262_vm1, %v9855_v2  ;;  %7380 = vmatprep.mubr.msk.bf16.mxu1 %vm262_vm1, %v7948_v3  ;;  %v4534_v3 = vsel %vm2004_vm2, %v8369_v45, 0 }
 0x1ee   : > { %v7138_v12 = vpop.f32.mrb[8].mxu1  ;;  %v7184_v56 = vpop.f32.mrb[44].mxu0 }
 0x1ef   : > { %v8519_v42 = vpop.f32.mrb[9].mxu1  ;;  %v2356_v63 = vpop.f32.mrb[45].mxu0  ;;  %v7748_v12 = vld [vmem:[#allocation2 + $0x40] sm:$0xff] }
 0x1f0   : > { %v8521_v43 = vadd.f32 %v2356_v63, %v2042_v58  ;;  %v7139_v46 = vpop.f32.mrb[10].mxu1  ;;  %v7185_v9 = vpop.f32.mrb[46].mxu0  ;;  %v9857_v58 = vld [vmem:[#allocation5_spill] sm:$0xff] }
 0x1f1   : > { %v8528_v28 = vpop.f32.mrb[11].mxu1  ;;  %v2359_v60 = vpop.f32.mrb[47].mxu0  ;;  %v9861_v56 = vld [vmem:[#allocation9_spill] sm:$0xff] }
 0x1f2   : > { %v8534_v52 = vadd.f32 %v2359_v60, %v2045_v20 }
 0x1f3   : > { %7359 = vmatmul.mubr.msk.bf16.gmra.mrb[152].mxu0 %vm262_vm1, %v9856_v49  ;;  %7381 = vmatmul.mubr.msk.bf16.vlgmr.msra.gmra.mrb[116].mxu1 %vm262_vm1, %v7927_v44 }
 0x1f4   : > { %7511 = vmatpush3.bf16.msra.mxu1 %v4534_v3  ;;  %7362 = vmatprep.mubr.msk.bf16.mxu0 %vm262_vm1, %v9857_v58 }
 0x1f5   : > { %7384 = vmatprep.mubr.msk.bf16.mxu1 %vm262_vm1, %v7941_v62  ;;  %7719 = vmatprep.subr.msk.bf16.mxu1 %vm2004_vm2, %v8539_v47  ;;  %v7747_v62 = vld [vmem:[#allocation2 + $0x30] sm:$0xff] }
 0x1f6   : > { %v7142_v45 = vpop.f32.mrb[12].mxu1  ;;  %v7188_v35 = vpop.f32.mrb[48].mxu0 }
 0x1f7   : > { %v8551_v20 = vpop.f32.mrb[13].mxu1  ;;  %v2372_v27 = vpop.f32.mrb[49].mxu0 }
 0x1f8   : > { %v8553_v36 = vadd.f32 %v2372_v27, %v2058_v6  ;;  %v7143_v48 = vpop.f32.mrb[14].mxu1  ;;  %v7189_v16 = vpop.f32.mrb[50].mxu0 }
 0x1f9   : > { %v8555_v44 = vpop.f32.mrb[15].mxu1  ;;  %v2375_v33 = vpop.f32.mrb[51].mxu0  ;;  %v9862_v48 = vld [vmem:[#allocation11_spill] sm:$0xff]  ;;  %v9863_v16 = vld [vmem:[#allocation10_spill] sm:$0xff] }
 0x1fa   : > { %v8557_v11 = vadd.f32 %v2375_v33, %v2061_v15 }
 0x1fb   : > { %7363 = vmatmul.mubr.msk.bf16.gmra.mrb[156].mxu0 %vm262_vm1, %v9858_v13  ;;  %7385 = vmatmul.mubr.msk.bf16.gmra.mrb[120].mxu1 %vm262_vm1, %v7747_v62 }
 0x1fc   : > { %7366 = vmatprep.mubr.msk.bf16.mxu0 %vm262_vm1, %v9859_v1  ;;  %7388 = vmatprep.mubr.msk.bf16.mxu1 %vm262_vm1, %v7992_v50 }
 0x1fe   : > { %v7146_v6 = vpop.f32.mrb[16].mxu1  ;;  %v7192_v54 = vpop.f32.mrb[52].mxu0 }
 0x1ff   : > { %v8566_v59 = vpop.f32.mrb[17].mxu1  ;;  %v2388_v8 = vpop.f32.mrb[53].mxu0 }
 0x200   : > { %v8568_v14 = vadd.f32 %v2388_v8, %v2074_v55  ;;  %v7147_v15 = vpop.f32.mrb[18].mxu1  ;;  %v7193_v34 = vpop.f32.mrb[54].mxu0 }
 0x201   : > { %v8570_v57 = vpop.f32.mrb[19].mxu1  ;;  %v2391_v24 = vpop.f32.mrb[55].mxu0 }
 0x202   : > { %v8572_v51 = vadd.f32 %v2391_v24, %v2077_v4 }
 0x203   : > { %7367 = vmatmul.mubr.msk.bf16.gmra.mrb[160].mxu0 %vm262_vm1, %v9860_v23  ;;  %7389 = vmatmul.mubr.msk.bf16.gmra.mrb[124].mxu1 %vm262_vm1, %v7748_v12 }
 0x204   : > { %7370 = vmatprep.mubr.msk.bf16.mxu0 %vm262_vm1, %v9861_v56  ;;  %7392 = vmatprep.mubr.msk.bf16.mxu1 %vm262_vm1, %v7979_v39  ;;  %v7749_v39 = vld [vmem:[#allocation2 + $0x50] sm:$0xff] }
 0x206   : > { %v7150_v55 = vpop.f32.mrb[20].mxu1  ;;  %v7196_v63 = vpop.f32.mrb[56].mxu0 }
 0x207   : > { %v8581_v46 = vpop.f32.mrb[21].mxu1  ;;  %v2404_v9 = vpop.f32.mrb[57].mxu0  ;;  %v7750_v63 = vld [vmem:[#allocation2 + $0x28] sm:$0xff] }
 0x208   : > { %v8584_v4 = vadd.f32 %v2404_v9, %v8493_v5  ;;  %v7151_v60 = vpop.f32.mrb[22].mxu1  ;;  %v7197_v3 = vpop.f32.mrb[58].mxu0 }
 0x209   : > { %v8586_v45 = vpop.f32.mrb[23].mxu1  ;;  %v2407_v35 = vpop.f32.mrb[59].mxu0 }
 0x20a   : > { %v8589_v27 = vadd.f32 %v2407_v35, %v8495_v18 }
 0x20b   : > { %7371 = vmatmul.mubr.msk.bf16.gmra.mrb[164].mxu0 %vm262_vm1, %v9862_v48  ;;  %7393 = vmatmul.mubr.msk.bf16.gmra.mrb[128].mxu1 %vm262_vm1, %v7749_v39 }
 0x20c   : > { %7374 = vmatprep.mubr.msk.bf16.mxu0 %vm262_vm1, %v9863_v16  ;;  %7396 = vmatprep.mubr.msk.bf16.mxu1 %vm262_vm1, %v8053_v38 }
 0x20e   : > { %v7154_v5 = vpop.f32.mrb[24].mxu1  ;;  %v7200_v33 = vpop.f32.mrb[60].mxu0 }
 0x20f   : > { %v8598_v6 = vpop.f32.mrb[25].mxu1  ;;  %v2420_v54 = vpop.f32.mrb[61].mxu0 }
 0x210   : > { %v8601_v18 = vadd.f32 %v2420_v54, %v8507_v22  ;;  %v7155_v8 = vpop.f32.mrb[26].mxu1  ;;  %v7201_v15 = vpop.f32.mrb[62].mxu0 }
 0x211   : > { %v8603_v34 = vpop.f32.mrb[27].mxu1  ;;  %v2423_v24 = vpop.f32.mrb[63].mxu0  ;;  %v4914_v8 = vsel %vm2004_vm2, %v8526_v37, 0 }
 0x212   : > { %v8606_v55 = vadd.f32 %v2423_v24, %v8510_v10 }
 0x213   : > { %7375 = vmatmul.mubr.msk.bf16.gmra.mrb[168].mxu0 %vm262_vm1, %v8302_v40  ;;  %7397 = vmatmul.mubr.msk.bf16.gmra.mrb[132].mxu1 %vm262_vm1, %v7968_v31 }
 0x214   : > { %7400 = vmatprep.mubr.msk.bf16.mxu1 %vm262_vm1, %v8039_v32  ;;  %7446 = vmatprep.mubr.msk.bf16.mxu0 %vm262_vm1, %v7750_v63 }
 0x216   : > { %v7158_v22 = vpop.f32.mrb[28].mxu1  ;;  %v7204_v9 = vpop.f32.mrb[64].mxu0 }
 0x217   : > { %v8615_v60 = vpop.f32.mrb[29].mxu1  ;;  %v2436_v3 = vpop.f32.mrb[65].mxu0 }
 0x218   : > { %v8618_v10 = vadd.f32 %v2436_v3, %v8519_v42  ;;  %v7159_v35 = vpop.f32.mrb[30].mxu1  ;;  %v7205_v5 = vpop.f32.mrb[66].mxu0 }
 0x219   : > { %v8620_v33 = vpop.f32.mrb[31].mxu1  ;;  %v2439_v54 = vpop.f32.mrb[67].mxu0 }
 0x21a   : > { %v8623_v31 = vadd.f32 %v2439_v54, %v8528_v28 }
 0x21b   : > { %7401 = vmatmul.mubr.msk.bf16.gmra.mrb[136].mxu1 %vm262_vm1, %v8017_v7  ;;  %7447 = vmatmul.mubr.msk.bf16.vlgmr.msra.gmra.mrb[172].mxu0 %vm262_vm1, %v7747_v62 }
 0x21c   : > { %7404 = vmatprep.mubr.msk.bf16.mxu1 %vm262_vm1, %v8093_v29  ;;  %7450 = vmatprep.mubr.msk.bf16.mxu0 %vm262_vm1, %v7992_v50  ;;  %v7751_v50 = vld [vmem:[#allocation2 + $0x48] sm:$0xff] }
 0x21d   : > { %7577 = vmatpush3.bf16.msra.mxu0 %v4914_v8 }
 0x21e   : > { %v7162_v42 = vpop.f32.mrb[32].mxu1  ;;  %v7208_v15 = vpop.f32.mrb[68].mxu0 }
 0x21f   : > { %v8634_v24 = vpop.f32.mrb[33].mxu1  ;;  %v2452_v28 = vpop.f32.mrb[69].mxu0 }
 0x220   : > { %v8637_v63 = vadd.f32 %v2452_v28, %v8551_v20  ;;  %v7163_v37 = vpop.f32.mrb[34].mxu1  ;;  %v7209_v22 = vpop.f32.mrb[70].mxu0 }
 0x221   : > { %v8639_v7 = vpop.f32.mrb[35].mxu1  ;;  %v2455_v62 = vpop.f32.mrb[71].mxu0 }
 0x222   : > { %v8642_v9 = vadd.f32 %v2455_v62, %v8555_v44 }
 0x223   : > { %7405 = vmatmul.mubr.msk.bf16.gmra.mrb[140].mxu1 %vm262_vm1, %v8095_v30  ;;  %7451 = vmatmul.mubr.msk.bf16.gmra.mrb[176].mxu0 %vm262_vm1, %v7748_v12 }
 0x224   : > { %7408 = vmatprep.mubr.msk.bf16.mxu1 %vm262_vm1, %v8113_v53  ;;  %7454 = vmatprep.mubr.msk.bf16.mxu0 %vm262_vm1, %v7751_v50 }
 0x226   : > { %v7166_v20 = vpop.f32.mrb[36].mxu1  ;;  %v7212_v3 = vpop.f32.mrb[72].mxu0 }
 0x227   : > { %v8650_v35 = vpop.f32.mrb[37].mxu1  ;;  %v2468_v5 = vpop.f32.mrb[73].mxu0 }
 0x228   : > { %v8653_v54 = vadd.f32 %v2468_v5, %v8566_v59  ;;  %v7167_v44 = vpop.f32.mrb[38].mxu1  ;;  %v7213_v8 = vpop.f32.mrb[74].mxu0 }
 0x229   : > { %v8655_v42 = vpop.f32.mrb[39].mxu1  ;;  %v2471_v15 = vpop.f32.mrb[75].mxu0 }
 0x22a   : > { %v8658_v12 = vadd.f32 %v2471_v15, %v8570_v57 }
 0x22b   : > { %7409 = vmatmul.mubr.msk.bf16.gmra.mrb[144].mxu1 %vm262_vm1, %v8139_v25  ;;  %7455 = vmatmul.mubr.msk.bf16.gmra.mrb[180].mxu0 %vm262_vm1, %v7749_v39 }
 0x22c   : > { %7412 = vmatprep.mubr.msk.bf16.mxu1 %vm262_vm1, %v8129_v19  ;;  %7458 = vmatprep.mubr.msk.bf16.mxu0 %vm262_vm1, %v8053_v38  ;;  %v7752_v38 = vld [vmem:[#allocation2 + $0x60] sm:$0xff] }
 0x22e   : > { %v7170_v59 = vpop.f32.mrb[40].mxu1  ;;  %v7216_v28 = vpop.f32.mrb[76].mxu0 }
 0x22f   : > { %v8667_v37 = vpop.f32.mrb[41].mxu1  ;;  %v2484_v22 = vpop.f32.mrb[77].mxu0 }
 0x230   : > { %v8670_v62 = vadd.f32 %v2484_v22, %v8581_v46  ;;  %v7171_v57 = vpop.f32.mrb[42].mxu1  ;;  %v7217_v50 = vpop.f32.mrb[78].mxu0 }
 0x231   : > { %v8672_v20 = vpop.f32.mrb[43].mxu1  ;;  %v2487_v3 = vpop.f32.mrb[79].mxu0 }
 0x232   : > { %v8675_v39 = vadd.f32 %v2487_v3, %v8586_v45 }
 0x233   : > { %7413 = vmatmul.mubr.msk.bf16.gmra.mrb[148].mxu1 %vm262_vm1, %v8164_v26  ;;  %7459 = vmatmul.mubr.msk.bf16.gmra.mrb[184].mxu0 %vm262_vm1, %v7752_v38 }
 0x234   : > { %7416 = vmatprep.mubr.msk.bf16.mxu1 %vm262_vm1, %v8172_v17  ;;  %7462 = vmatprep.mubr.msk.bf16.mxu0 %vm262_vm1, %v8039_v32  ;;  %v7753_v32 = vld [vmem:[#allocation2 + $0x70] sm:$0xff] }
 0x236   : > { %v7174_v46 = vpop.f32.mrb[44].mxu1  ;;  %v7220_v5 = vpop.f32.mrb[80].mxu0 }
 0x237   : > { %v8684_v44 = vpop.f32.mrb[45].mxu1  ;;  %v2500_v8 = vpop.f32.mrb[81].mxu0 }
 0x238   : > { %v8687_v45 = vadd.f32 %v2500_v8, %v8598_v6  ;;  %v7175_v15 = vpop.f32.mrb[46].mxu1  ;;  %v7221_v59 = vpop.f32.mrb[82].mxu0 }
 0x239   : > { %v8689_v28 = vpop.f32.mrb[47].mxu1  ;;  %v2503_v22 = vpop.f32.mrb[83].mxu0 }
 0x23a   : > { %v8692_v57 = vadd.f32 %v2503_v22, %v8603_v34 }
 0x23b   : > { %7417 = vmatmul.mubr.msk.bf16.gmra.mrb[152].mxu1 %vm262_vm1, %v8193_v0  ;;  %7463 = vmatmul.mubr.msk.bf16.gmra.mrb[188].mxu0 %vm262_vm1, %v7753_v32 }
 0x23c   : > { %7420 = vmatprep.mubr.msk.bf16.mxu1 %vm262_vm1, %v9855_v2  ;;  %7466 = vmatprep.mubr.msk.bf16.mxu0 %vm262_vm1, %v8093_v29 }
 0x23e   : > { %v7178_v6 = vpop.f32.mrb[48].mxu1  ;;  %v7224_v50 = vpop.f32.mrb[84].mxu0 }
 0x23f   : > { %v8701_v3 = vpop.f32.mrb[49].mxu1  ;;  %v2516_v38 = vpop.f32.mrb[85].mxu0 }
 0x240   : > { %v8704_v34 = vadd.f32 %v2516_v38, %v8615_v60  ;;  %v7179_v46 = vpop.f32.mrb[50].mxu1  ;;  %v7225_v5 = vpop.f32.mrb[86].mxu0 }
 0x241   : > { %v8706_v8 = vpop.f32.mrb[51].mxu1  ;;  %v2519_v15 = vpop.f32.mrb[87].mxu0 }
 0x242   : > { %v8709_v59 = vadd.f32 %v2519_v15, %v8620_v33 }
 0x243   : > { %7421 = vmatmul.mubr.msk.bf16.gmra.mrb[156].mxu1 %vm262_vm1, %v9856_v49  ;;  %7467 = vmatmul.mubr.msk.bf16.gmra.mrb[192].mxu0 %vm262_vm1, %v8095_v30 }
 0x244   : > { %7424 = vmatprep.mubr.msk.bf16.mxu1 %vm262_vm1, %v9857_v58  ;;  %7470 = vmatprep.mubr.msk.bf16.mxu0 %vm262_vm1, %v8113_v53 }
 0x246   : > { %v7228_v29 = vpop.f32.mrb[88].mxu0  ;;  %v7250_v60 = vpop.f32.mrb[52].mxu1 }
 0x247   : > { %v2532_v22 = vpop.f32.mrb[89].mxu0  ;;  %v2672_v32 = vpop.f32.mrb[53].mxu1 }
 0x248   : > { %v8720_v6 = vadd.f32 %v2532_v22, %v8634_v24  ;;  %v8723_v33 = vadd.f32 %v2672_v32, %v8521_v43  ;;  %v7229_v50 = vpop.f32.mrb[90].mxu0  ;;  %v7251_v38 = vpop.f32.mrb[54].mxu1 }
 0x249   : > { %v2535_v46 = vpop.f32.mrb[91].mxu0  ;;  %v2675_v30 = vpop.f32.mrb[55].mxu1 }
 0x24a   : > { %v8726_v5 = vadd.f32 %v2535_v46, %v8639_v7  ;;  %v8729_v15 = vadd.f32 %v2675_v30, %v8534_v52 }
 0x24b   : > { %7425 = vmatmul.mubr.msk.bf16.gmra.mrb[160].mxu1 %vm262_vm1, %v9858_v13  ;;  %7471 = vmatmul.mubr.msk.bf16.gmra.mrb[196].mxu0 %vm262_vm1, %v8139_v25 }
 0x24c   : > { %7428 = vmatprep.mubr.msk.bf16.mxu1 %vm262_vm1, %v9859_v1  ;;  %7474 = vmatprep.mubr.msk.bf16.mxu0 %vm262_vm1, %v8129_v19 }
 0x24e   : > { %v7232_v53 = vpop.f32.mrb[92].mxu0  ;;  %v7254_v43 = vpop.f32.mrb[56].mxu1 }
 0x24f   : > { %v2548_v24 = vpop.f32.mrb[93].mxu0  ;;  %v2688_v7 = vpop.f32.mrb[57].mxu1 }
 0x250   : > { %v8740_v29 = vadd.f32 %v2548_v24, %v8650_v35  ;;  %v8743_v52 = vadd.f32 %v2688_v7, %v8553_v36  ;;  %v7233_v60 = vpop.f32.mrb[94].mxu0  ;;  %v7255_v22 = vpop.f32.mrb[58].mxu1 }
 0x251   : > { %v2551_v32 = vpop.f32.mrb[95].mxu0  ;;  %v2691_v25 = vpop.f32.mrb[59].mxu1 }
 0x252   : > { %v8746_v50 = vadd.f32 %v2551_v32, %v8655_v42  ;;  %v8749_v38 = vadd.f32 %v2691_v25, %v8557_v11 }
 0x253   : > { %7429 = vmatmul.mubr.msk.bf16.gmra.mrb[164].mxu1 %vm262_vm1, %v9860_v23  ;;  %7475 = vmatmul.mubr.msk.bf16.gmra.mrb[200].mxu0 %vm262_vm1, %v8164_v26 }
 0x254   : > { %7432 = vmatprep.mubr.msk.bf16.mxu1 %vm262_vm1, %v9861_v56  ;;  %7478 = vmatprep.mubr.msk.bf16.mxu0 %vm262_vm1, %v8172_v17  ;;  %v4137_v17 = vld [vmem:[#allocation2 + $0x8] sm:$0xff] }
 0x256   : > { %v7236_v19 = vpop.f32.mrb[96].mxu0  ;;  %v7258_v36 = vpop.f32.mrb[60].mxu1 }
 0x257   : > { %v2564_v35 = vpop.f32.mrb[97].mxu0  ;;  %v2704_v42 = vpop.f32.mrb[61].mxu1 }
 0x258   : > { %v8760_v46 = vadd.f32 %v2564_v35, %v8667_v37  ;;  %v8763_v11 = vadd.f32 %v2704_v42, %v8568_v14  ;;  %v7237_v30 = vpop.f32.mrb[98].mxu0  ;;  %v7259_v53 = vpop.f32.mrb[62].mxu1  ;;  %v4180_v14 = vshll.u32 %v4137_v17, 16  ;;  %v4178_v42 = vshrl.u32 %v4137_v17, 16 }
 0x259   : > { %v2567_v43 = vpop.f32.mrb[99].mxu0  ;;  %v2707_v26 = vpop.f32.mrb[63].mxu1 }
 0x25a   : > { %v8766_v24 = vadd.f32 %v2567_v43, %v8672_v20  ;;  %v8769_v7 = vadd.f32 %v2707_v26, %v8572_v51  ;;  %v4182_v30 = vrot.slane %v4180_v14, 1  ;;  %v4139_v26 = vld [vmem:[#allocation2 + $0x18] sm:$0xff] }
 0x25b   : > { %7433 = vmatmul.mubr.msk.bf16.gmra.mrb[168].mxu1 %vm262_vm1, %v9862_v48  ;;  %7479 = vmatmul.mubr.msk.bf16.gmra.mrb[204].mxu0 %vm262_vm1, %v8193_v0  ;;  %v4138_v0 = vld [vmem:[#allocation2 + $0x10] sm:$0xff] }
 0x25c   : > { %7436 = vmatprep.mubr.msk.bf16.mxu1 %vm262_vm1, %v9863_v16  ;;  %7482 = vmatprep.mubr.msk.bf16.mxu0 %vm262_vm1, %v9855_v2  ;;  %v4183_v43 = vor.u32 %v4182_v30, %v4178_v42  ;;  %v4189_v30 = vshrl.u32 %v4138_v0, 16 }
 0x25e   : > { %v7240_v37 = vpop.f32.mrb[100].mxu0  ;;  %v7262_v20 = vpop.f32.mrb[64].mxu1 }
 0x25f   : > { %v2580_v60 = vpop.f32.mrb[101].mxu0  ;;  %v2720_v22 = vpop.f32.mrb[65].mxu1 }
 0x260   : > { %v8780_v51 = vadd.f32 %v2580_v60, %v8684_v44  ;;  %v8783_v32 = vadd.f32 %v2720_v22, %v8584_v4  ;;  %v7241_v25 = vpop.f32.mrb[102].mxu0  ;;  %v7263_v19 = vpop.f32.mrb[66].mxu1  ;;  %v4185_v4 = vshll.u32 %v4138_v0, 16  ;;  %v9864_v44 = vld [vmem:[#allocation12_spill] sm:$0xff] }
 0x261   : > { %v2583_v36 = vpop.f32.mrb[103].mxu0  ;;  %v2723_v35 = vpop.f32.mrb[67].mxu1  ;;  %v4193_v25 = vshll.u32 %v4139_v26, 16 }
 0x262   : > { %v8786_v2 = vadd.f32 %v2583_v36, %v8689_v28  ;;  %v8789_v53 = vadd.f32 %v2723_v35, %v8589_v27  ;;  %v4187_v37 = vrot.slane %v4185_v4, 1  ;;  %v4141_v4 = vld [vmem:[#allocation2 + $0x28] sm:$0xff] }
 0x263   : > { %7437 = vmatmul.mubr.msk.bf16.gmra.mrb[172].mxu1 %vm262_vm1, %v8302_v40  ;;  %7483 = vmatmul.mubr.msk.bf16.gmra.mrb[208].mxu0 %vm262_vm1, %v9856_v49 }
 0x264   : > { %7440 = vmatprep.mubr.msk.bf16.mxu1 %vm262_vm1, %v9864_v44  ;;  %7486 = vmatprep.mubr.msk.bf16.mxu0 %vm262_vm1, %v9857_v58  ;;  %v4188_v58 = vsel %vm4176_vm4, %v4183_v43, %v4187_v37 }
 0x266   : > { %v7244_v28 = vpop.f32.mrb[104].mxu0  ;;  %v7266_v17 = vpop.f32.mrb[68].mxu1 }
 0x267   : > { %v2596_v14 = vpop.f32.mrb[105].mxu0  ;;  %v2736_v27 = vpop.f32.mrb[69].mxu1  ;;  %v4197_v17 = vshrl.u32 %v4139_v26, 16 }
 0x268   : > { %v8800_v20 = vadd.f32 %v2596_v14, %v8701_v3  ;;  %v8803_v60 = vadd.f32 %v2736_v27, %v8601_v18  ;;  %v7245_v49 = vpop.f32.mrb[106].mxu0  ;;  %v7267_v22 = vpop.f32.mrb[70].mxu1  ;;  %v4140_v3 = vld [vmem:[#allocation2 + $0x20] sm:$0xff]  ;;  %v4195_v18 = vrot.slane %v4193_v25, 1  ;;  %v4209_v27 = vshll.u32 %v4141_v4, 16 }
 0x269   : > { %v2599_v19 = vpop.f32.mrb[107].mxu0  ;;  %v2739_v36 = vpop.f32.mrb[71].mxu1 }
 0x26a   : > { %v8807_v35 = vadd.f32 %v2599_v19, %v8706_v8  ;;  %v8810_v42 = vadd.f32 %v2739_v36, %v8606_v55  ;;  %v4201_v8 = vshll.u32 %v4140_v3, 16  ;;  %v4191_v55 = vor.u32 %v4189_v30, %v4187_v37  ;;  %v4142_v36 = vld [vmem:[#allocation2 + $0x30] sm:$0xff] }
 0x26b   : > { %7441 = vmatmul.mubr.msk.bf16.gmra.mrb[176].mxu1 %vm262_vm1, %v8324_v61  ;;  %7487 = vmatmul.mubr.msk.bf16.gmra.mrb[212].mxu0 %vm262_vm1, %v9858_v13  ;;  %v4199_v19 = vor.u32 %v4197_v17, %v4195_v18  ;;  %v4217_v17 = vshll.u32 %v4142_v36, 16 }
 0x26c   : > { %7490 = vmatprep.mubr.msk.bf16.mxu0 %vm262_vm1, %v9859_v1  ;;  %7512 = vmatprep.mubr.msk.bf16.mxu1 %vm262_vm1, %v4188_v58  ;;  %v4203_v37 = vrot.slane %v4201_v8, 1 }
 0x26e   : > { %v7270_v43 = vpop.f32.mrb[72].mxu1  ;;  %v7316_v28 = vpop.f32.mrb[108].mxu0 }
 0x26f   : > { %v2752_v0 = vpop.f32.mrb[73].mxu1  ;;  %v3094_v14 = vpop.f32.mrb[109].mxu0  ;;  %v5294_v43 = vsel %vm2004_vm2, %v8539_v47, 0  ;;  %v4211_v28 = vrot.slane %v4209_v27, 1  ;;  %v8840_v47 = vsel %vm4176_vm4, %v4199_v19, %v4203_v37 }
 0x270   : > { %v8820_v49 = vadd.f32 %v2752_v0, %v8618_v10  ;;  %v8823_v13 = vadd.f32 %v3094_v14, %v8723_v33  ;;  %v7271_v22 = vpop.f32.mrb[74].mxu1  ;;  %v7317_v1 = vpop.f32.mrb[110].mxu0  ;;  %v4196_v10 = vsel %vm4176_vm4, %v4191_v55, %v4195_v18  ;;  %v4205_v33 = vshrl.u32 %v4140_v3, 16 }
 0x271   : > { %v2755_v25 = vpop.f32.mrb[75].mxu1  ;;  %v3097_v58 = vpop.f32.mrb[111].mxu0  ;;  %v4219_v14 = vrot.slane %v4217_v17, 1 }
 0x272   : > { %v8828_v26 = vadd.f32 %v2755_v25, %v8623_v31  ;;  %v8831_v30 = vadd.f32 %v3097_v58, %v8729_v15  ;;  %v4143_v31 = vld [vmem:[#allocation2 + $0x38] sm:$0xff]  ;;  %v4213_v15 = vshrl.u32 %v4141_v4, 16  ;;  %v4207_v8 = vor.u32 %v4205_v33, %v4203_v37  ;;  %v4144_v33 = vld [vmem:[#allocation2 + $0x40] sm:$0xff] }
 0x273   : > { %7491 = vmatmul.mubr.msk.bf16.gmra.mrb[216].mxu0 %vm262_vm1, %v9860_v23  ;;  %7513 = vmatmul.mubr.msk.bf16.vlgmr.msra.gmra.mrb[180].mxu1 %vm262_vm1, %v4196_v10  ;;  %v4225_v27 = vshll.u32 %v4143_v31, 16  ;;  %v4221_v10 = vshrl.u32 %v4142_v36, 16  ;;  %v4233_v36 = vshll.u32 %v4144_v33, 16 }
 0x274   : > { %7643 = vmatpush3.bf16.msra.mxu1 %v5294_v43  ;;  %7494 = vmatprep.mubr.msk.bf16.mxu0 %vm262_vm1, %v9861_v56  ;;  %v4215_v0 = vor.u32 %v4213_v15, %v4211_v28  ;;  %v8857_v37 = vsel %vm4176_vm4, %v4207_v8, %v4211_v28 }
 0x275   : > { %7516 = vmatprep.mubr.msk.bf16.mxu1 %vm262_vm1, %v8840_v47  ;;  %v4223_v15 = vor.u32 %v4221_v10, %v4219_v14 }
 0x276   : > { %v7274_v3 = vpop.f32.mrb[76].mxu1  ;;  %v7320_v18 = vpop.f32.mrb[112].mxu0 }
 0x277   : > { %v2768_v23 = vpop.f32.mrb[77].mxu1  ;;  %v3110_v55 = vpop.f32.mrb[113].mxu0 }
 0x278   : > { %v8845_v22 = vadd.f32 %v2768_v23, %v8637_v63  ;;  %v8848_v56 = vadd.f32 %v3110_v55, %v8743_v52  ;;  %v7275_v1 = vpop.f32.mrb[78].mxu1  ;;  %v7321_v19 = vpop.f32.mrb[114].mxu0  ;;  %v8864_v63 = vsel %vm4176_vm4, %v4215_v0, %v4219_v14  ;;  %v4227_v52 = vrot.slane %v4225_v27, 1  ;;  %v4146_v27 = vld [vmem:[#allocation2 + $0x50] sm:$0xff] }
 0x279   : > { %v2771_v25 = vpop.f32.mrb[79].mxu1  ;;  %v3113_v58 = vpop.f32.mrb[115].mxu0 }
 0x27a   : > { %v8851_v4 = vadd.f32 %v2771_v25, %v8642_v9  ;;  %v8854_v43 = vadd.f32 %v3113_v58, %v8749_v38  ;;  %v4145_v9 = vld [vmem:[#allocation2 + $0x48] sm:$0xff]  ;;  %v4229_v38 = vshrl.u32 %v4143_v31, 16  ;;  %v4235_v31 = vrot.slane %v4233_v36, 1 }
 0x27b   : > { %7495 = vmatmul.mubr.msk.bf16.gmra.mrb[220].mxu0 %vm262_vm1, %v9862_v48  ;;  %7517 = vmatmul.mubr.msk.bf16.gmra.mrb[184].mxu1 %vm262_vm1, %v8857_v37  ;;  %v4241_v8 = vshll.u32 %v4145_v9, 16  ;;  %v8883_v58 = vsel %vm4176_vm4, %v4223_v15, %v4227_v52 }
 0x27c   : > { %7498 = vmatprep.mubr.msk.bf16.mxu0 %vm262_vm1, %v9863_v16  ;;  %7520 = vmatprep.mubr.msk.bf16.mxu1 %vm262_vm1, %v8864_v63  ;;  %v4231_v18 = vor.u32 %v4229_v38, %v4227_v52  ;;  %v4249_v38 = vshll.u32 %v4146_v27, 16 }
 0x27d   : > { %v4243_v10 = vrot.slane %v4241_v8, 1 }
 0x27e   : > { %v7278_v28 = vpop.f32.mrb[80].mxu1  ;;  %v7324_v17 = vpop.f32.mrb[116].mxu0  ;;  %v4251_v15 = vrot.slane %v4249_v38, 1 }
 0x27f   : > { %v2784_v48 = vpop.f32.mrb[81].mxu1  ;;  %v3126_v3 = vpop.f32.mrb[117].mxu0 }
 0x280   : > { %v8871_v23 = vadd.f32 %v2784_v48, %v8653_v54  ;;  %v8874_v55 = vadd.f32 %v3126_v3, %v8763_v11  ;;  %v7279_v16 = vpop.f32.mrb[82].mxu1  ;;  %v7325_v0 = vpop.f32.mrb[118].mxu0  ;;  %v4237_v54 = vshrl.u32 %v4144_v33, 16  ;;  %v8890_v11 = vsel %vm4176_vm4, %v4231_v18, %v4235_v31 }
 0x281   : > { %v2787_v1 = vpop.f32.mrb[83].mxu1  ;;  %v3129_v19 = vpop.f32.mrb[119].mxu0 }
 0x282   : > { %v8877_v25 = vadd.f32 %v2787_v1, %v8658_v12  ;;  %v8880_v14 = vadd.f32 %v3129_v19, %v8769_v7  ;;  %v4147_v12 = vld [vmem:[#allocation2 + $0x58] sm:$0xff]  ;;  %v4245_v7 = vshrl.u32 %v4145_v9, 16  ;;  %v4239_v36 = vor.u32 %v4237_v54, %v4235_v31  ;;  %v4148_v54 = vld [vmem:[#allocation2 + $0x60] sm:$0xff] }
 0x283   : > { %7499 = vmatmul.mubr.msk.bf16.gmra.mrb[224].mxu0 %vm262_vm1, %v8302_v40  ;;  %7521 = vmatmul.mubr.msk.bf16.gmra.mrb[188].mxu1 %vm262_vm1, %v8883_v58  ;;  %v4257_v48 = vshll.u32 %v4147_v12, 16  ;;  %v4253_v31 = vshrl.u32 %v4146_v27, 16  ;;  %v4265_v27 = vshll.u32 %v4148_v54, 16 }
 0x284   : > { %7502 = vmatprep.mubr.msk.bf16.mxu0 %vm262_vm1, %v9864_v44  ;;  %7524 = vmatprep.mubr.msk.bf16.mxu1 %vm262_vm1, %v8890_v11  ;;  %v4247_v17 = vor.u32 %v4245_v7, %v4243_v10  ;;  %v8909_v19 = vsel %vm4176_vm4, %v4239_v36, %v4243_v10 }
 0x285   : > { %v4255_v7 = vor.u32 %v4253_v31, %v4251_v15 }
 0x286   : > { %v7282_v33 = vpop.f32.mrb[84].mxu1  ;;  %v7328_v52 = vpop.f32.mrb[120].mxu0 }
 0x287   : > { %v2800_v40 = vpop.f32.mrb[85].mxu1  ;;  %v3142_v28 = vpop.f32.mrb[121].mxu0 }
 0x288   : > { %v8897_v3 = vadd.f32 %v2800_v40, %v8670_v62  ;;  %v8900_v18 = vadd.f32 %v3142_v28, %v8783_v32  ;;  %v7283_v44 = vpop.f32.mrb[86].mxu1  ;;  %v7329_v8 = vpop.f32.mrb[122].mxu0  ;;  %v8916_v62 = vsel %vm4176_vm4, %v4247_v17, %v4251_v15  ;;  %v4259_v32 = vrot.slane %v4257_v48, 1 }
 0x289   : > { %v2803_v16 = vpop.f32.mrb[87].mxu1  ;;  %v3145_v0 = vpop.f32.mrb[123].mxu0  ;;  %v4150_v44 = vld [vmem:[#allocation2 + $0x70] sm:$0xff] }
 0x28a   : > { %v8903_v9 = vadd.f32 %v2803_v16, %v8675_v39  ;;  %v8906_v1 = vadd.f32 %v3145_v0, %v8789_v53  ;;  %v4149_v39 = vld [vmem:[#allocation2 + $0x68] sm:$0xff]  ;;  %v4261_v53 = vshrl.u32 %v4147_v12, 16  ;;  %v4267_v12 = vrot.slane %v4265_v27, 1 }
 0x28b   : > { %7503 = vmatmul.mubr.msk.bf16.gmra.mrb[228].mxu0 %vm262_vm1, %v8324_v61  ;;  %7525 = vmatmul.mubr.msk.bf16.gmra.mrb[192].mxu1 %vm262_vm1, %v8909_v19  ;;  %v4273_v36 = vshll.u32 %v4149_v39, 16  ;;  %v8935_v0 = vsel %vm4176_vm4, %v4255_v7, %v4259_v32 }
 0x28c   : > { %7528 = vmatprep.mubr.msk.bf16.mxu1 %vm262_vm1, %v8916_v62  ;;  %7506 = vmatprep.mubr.msk.bf16.mxu0 %vm262_vm1, %v8470_v41  ;;  %v4263_v52 = vor.u32 %v4261_v53, %v4259_v32  ;;  %v4281_v53 = vshll.u32 %v4150_v44, 16 }
 0x28d   : > { %v4275_v31 = vrot.slane %v4273_v36, 1 }
 0x28e   : > { %v7286_v10 = vpop.f32.mrb[88].mxu1  ;;  %v7332_v38 = vpop.f32.mrb[124].mxu0  ;;  %v4283_v7 = vrot.slane %v4281_v53, 1 }
 0x28f   : > { %v2816_v61 = vpop.f32.mrb[89].mxu1  ;;  %v3158_v33 = vpop.f32.mrb[125].mxu0 }
 0x290   : > { %v8923_v40 = vadd.f32 %v2816_v61, %v8687_v45  ;;  %v8926_v28 = vadd.f32 %v3158_v33, %v8803_v60  ;;  %v7287_v17 = vpop.f32.mrb[90].mxu1  ;;  %v7333_v48 = vpop.f32.mrb[126].mxu0  ;;  %v4269_v45 = vshrl.u32 %v4148_v54, 16  ;;  %v8942_v60 = vsel %vm4176_vm4, %v4263_v52, %v4267_v12 }
 0x291   : > { %v2819_v41 = vpop.f32.mrb[91].mxu1  ;;  %v3161_v8 = vpop.f32.mrb[127].mxu0 }
 0x292   : > { %v8929_v16 = vadd.f32 %v2819_v41, %v8692_v57  ;;  %v8932_v15 = vadd.f32 %v3161_v8, %v8810_v42  ;;  %v4151_v57 = vld [vmem:[#allocation2 + $0x78] sm:$0xff]  ;;  %v4277_v42 = vshrl.u32 %v4149_v39, 16  ;;  %v4271_v27 = vor.u32 %v4269_v45, %v4267_v12  ;;  %v4152_v45 = vld [vmem:[#allocation2 + $0x80] sm:$0xff] }
 0x293   : > { %7507 = vmatmul.mubr.msk.bf16.gmra.mrb[232].mxu0 %vm262_vm1, %v8482_v21  ;;  %7529 = vmatmul.mubr.msk.bf16.gmra.mrb[196].mxu1 %vm262_vm1, %v8935_v0  ;;  %v4289_v61 = vshll.u32 %v4151_v57, 16  ;;  %v4285_v12 = vshrl.u32 %v4150_v44, 16  ;;  %v4297_v44 = vshll.u32 %v4152_v45, 16 }
 0x294   : > { %7532 = vmatprep.mubr.msk.bf16.mxu1 %vm262_vm1, %v8942_v60  ;;  %7578 = vmatprep.mubr.msk.bf16.mxu0 %vm262_vm1, %v8840_v47  ;;  %v4279_v38 = vor.u32 %v4277_v42, %v4275_v31  ;;  %v8961_v8 = vsel %vm4176_vm4, %v4271_v27, %v4275_v31 }
 0x295   : > { %v4287_v42 = vor.u32 %v4285_v12, %v4283_v7 }
 0x296   : > { %v7290_v54 = vpop.f32.mrb[92].mxu1  ;;  %v7336_v32 = vpop.f32.mrb[128].mxu0 }
 0x297   : > { %v2832_v21 = vpop.f32.mrb[93].mxu1  ;;  %v3174_v10 = vpop.f32.mrb[129].mxu0 }
 0x298   : > { %v8949_v33 = vadd.f32 %v2832_v21, %v8704_v34  ;;  %v8952_v52 = vadd.f32 %v3174_v10, %v8820_v49  ;;  %v7291_v36 = vpop.f32.mrb[94].mxu1  ;;  %v7337_v17 = vpop.f32.mrb[130].mxu0  ;;  %v8968_v34 = vsel %vm4176_vm4, %v4279_v38, %v4283_v7  ;;  %v4291_v49 = vrot.slane %v4289_v61, 1  ;;  %v4154_v61 = vld [vmem:[#allocation2 + $0x90] sm:$0xff] }
 0x299   : > { %v2835_v48 = vpop.f32.mrb[95].mxu1  ;;  %v3177_v47 = vpop.f32.mrb[131].mxu0 }
 0x29a   : > { %v8955_v39 = vadd.f32 %v2835_v48, %v8709_v59  ;;  %v8958_v41 = vadd.f32 %v3177_v47, %v8828_v26  ;;  %v4293_v59 = vshrl.u32 %v4151_v57, 16  ;;  %v4153_v26 = vld [vmem:[#allocation2 + $0x88] sm:$0xff]  ;;  %v4299_v48 = vrot.slane %v4297_v44, 1 }
 0x29b   : > { %7533 = vmatmul.mubr.msk.bf16.gmra.mrb[200].mxu1 %vm262_vm1, %v8961_v8  ;;  %7579 = vmatmul.mubr.msk.bf16.vlgmr.msra.gmra.mrb[236].mxu0 %vm262_vm1, %v8857_v37  ;;  %v4305_v37 = vshll.u32 %v4153_v26, 16  ;;  %v8987_v12 = vsel %vm4176_vm4, %v4287_v42, %v4291_v49  ;;  %v4309_v44 = vshrl.u32 %v4153_v26, 16 }
 0x29c   : > { %7536 = vmatprep.mubr.msk.bf16.mxu1 %vm262_vm1, %v8968_v34  ;;  %7582 = vmatprep.mubr.msk.bf16.mxu0 %vm262_vm1, %v8864_v63  ;;  %v4295_v27 = vor.u32 %v4293_v59, %v4291_v49 }
 0x29d   : > { %v4307_v59 = vrot.slane %v4305_v37, 1 }
 0x29e   : > { %v7294_v31 = vpop.f32.mrb[96].mxu1  ;;  %v7340_v53 = vpop.f32.mrb[132].mxu0 }
 0x29f   : > { %v2848_v54 = vpop.f32.mrb[97].mxu1  ;;  %v3190_v32 = vpop.f32.mrb[133].mxu0 }
 0x2a0   : > { %v8975_v21 = vadd.f32 %v2848_v54, %v8720_v6  ;;  %v8978_v57 = vadd.f32 %v3190_v32, %v8845_v22  ;;  %v7295_v10 = vpop.f32.mrb[98].mxu1  ;;  %v7341_v38 = vpop.f32.mrb[134].mxu0  ;;  %v4301_v6 = vshrl.u32 %v4152_v45, 16  ;;  %v8994_v22 = vsel %vm4176_vm4, %v4295_v27, %v4299_v48 }
 0x2a1   : > { %v2851_v36 = vpop.f32.mrb[99].mxu1  ;;  %v3193_v17 = vpop.f32.mrb[135].mxu0  ;;  %v4311_v54 = vor.u32 %v4309_v44, %v4307_v59  ;;  %v4317_v44 = vshrl.u32 %v4154_v61, 16 }
 0x2a2   : > { %v8981_v47 = vadd.f32 %v2851_v36, %v8726_v5  ;;  %v8984_v7 = vadd.f32 %v3193_v17, %v8851_v4  ;;  %v4313_v5 = vshll.u32 %v4154_v61, 16  ;;  %v4155_v4 = vld [vmem:[#allocation2 + $0x98] sm:$0xff]  ;;  %v4303_v31 = vor.u32 %v4301_v6, %v4299_v48 }
 0x2a3   : > { %7537 = vmatmul.mubr.msk.bf16.gmra.mrb[204].mxu1 %vm262_vm1, %v8987_v12  ;;  %7583 = vmatmul.mubr.msk.bf16.gmra.mrb[240].mxu0 %vm262_vm1, %v8883_v58  ;;  %v4321_v10 = vshll.u32 %v4155_v4, 16 }
 0x2a4   : > { %9865 = vst [vmem:[#allocation3_spill] sm:$0xff] %v8984_v7  ;;  %7540 = vmatprep.mubr.msk.bf16.mxu1 %vm262_vm1, %v8994_v22  ;;  %7586 = vmatprep.mubr.msk.bf16.mxu0 %vm262_vm1, %v8890_v11  ;;  %v4315_v32 = vrot.slane %v4313_v5, 1  ;;  %v9013_v6 = vsel %vm4176_vm4, %v4303_v31, %v4307_v59  ;;  %v4156_v5 = vld [vmem:[#allocation2 + $0xa0] sm:$0xff] }
 0x2a5   : > { %v4329_v61 = vshll.u32 %v4156_v5, 16 }
 0x2a6   : > { %v7298_v45 = vpop.f32.mrb[100].mxu1  ;;  %v7344_v49 = vpop.f32.mrb[136].mxu0 }
 0x2a7   : > { %v2864_v53 = vpop.f32.mrb[101].mxu1  ;;  %v3206_v42 = vpop.f32.mrb[137].mxu0  ;;  %v4319_v49 = vor.u32 %v4317_v44, %v4315_v32 }
 0x2a8   : > { %v9001_v27 = vadd.f32 %v2864_v53, %v8740_v29  ;;  %v9004_v26 = vadd.f32 %v3206_v42, %v8871_v23  ;;  %v7299_v37 = vpop.f32.mrb[102].mxu1  ;;  %v7345_v38 = vpop.f32.mrb[138].mxu0  ;;  %v9020_v29 = vsel %vm4176_vm4, %v4311_v54, %v4315_v32  ;;  %v4323_v23 = vrot.slane %v4321_v10, 1 }
 0x2a9   : > { %v2867_v36 = vpop.f32.mrb[103].mxu1  ;;  %v3209_v17 = vpop.f32.mrb[139].mxu0 }
 0x2aa   : > { %9866 = vst [vmem:[#allocation4_spill] sm:$0xff] %v9004_v26  ;;  %v9007_v7 = vadd.f32 %v2867_v36, %v8746_v50  ;;  %v9010_v48 = vadd.f32 %v3209_v17, %v8877_v25  ;;  %v4325_v50 = vshrl.u32 %v4155_v4, 16  ;;  %v4157_v25 = vld [vmem:[#allocation2 + $0xa8] sm:$0xff]  ;;  %v4158_v36 = vld [vmem:[#allocation2 + $0xb0] sm:$0xff]  ;;  %v4331_v26 = vrot.slane %v4329_v61, 1 }
 0x2ab   : > { %7541 = vmatmul.mubr.msk.bf16.gmra.mrb[208].mxu1 %vm262_vm1, %v9013_v6  ;;  %7587 = vmatmul.mubr.msk.bf16.gmra.mrb[244].mxu0 %vm262_vm1, %v8909_v19  ;;  %v4337_v37 = vshll.u32 %v4157_v25, 16  ;;  %v9039_v44 = vsel %vm4176_vm4, %v4319_v49, %v4323_v23  ;;  %v4341_v61 = vshrl.u32 %v4157_v25, 16 }
 0x2ac   : > { %9867 = vst [vmem:[#allocation5_spill] sm:$0xff] %v9010_v48  ;;  %7544 = vmatprep.mubr.msk.bf16.mxu1 %vm262_vm1, %v9020_v29  ;;  %7590 = vmatprep.mubr.msk.bf16.mxu0 %vm262_vm1, %v8916_v62  ;;  %v4327_v42 = vor.u32 %v4325_v50, %v4323_v23 }
 0x2ad   : > { %v4339_v50 = vrot.slane %v4337_v37, 1 }
 0x2ae   : > { %v7302_v59 = vpop.f32.mrb[104].mxu1  ;;  %v7348_v45 = vpop.f32.mrb[140].mxu0 }
 0x2af   : > { %v2880_v31 = vpop.f32.mrb[105].mxu1  ;;  %v3222_v53 = vpop.f32.mrb[141].mxu0 }
 0x2b0   : > { %v9027_v54 = vadd.f32 %v2880_v31, %v8760_v46  ;;  %v9030_v4 = vadd.f32 %v3222_v53, %v8897_v3  ;;  %v7303_v10 = vpop.f32.mrb[106].mxu1  ;;  %v7349_v38 = vpop.f32.mrb[142].mxu0  ;;  %v4333_v46 = vshrl.u32 %v4156_v5, 16  ;;  %v9046_v3 = vsel %vm4176_vm4, %v4327_v42, %v4331_v26 }
 0x2b1   : > { %v2883_v17 = vpop.f32.mrb[107].mxu1  ;;  %v3225_v48 = vpop.f32.mrb[143].mxu0  ;;  %v4343_v31 = vor.u32 %v4341_v61, %v4339_v50  ;;  %v4349_v61 = vshrl.u32 %v4158_v36, 16 }
 0x2b2   : > { %9868 = vst [vmem:[#allocation7_spill] sm:$0xff] %v9030_v4  ;;  %v9033_v59 = vadd.f32 %v2883_v17, %v8766_v24  ;;  %v9036_v32 = vadd.f32 %v3225_v48, %v8903_v9  ;;  %v4345_v24 = vshll.u32 %v4158_v36, 16  ;;  %v4159_v9 = vld [vmem:[#allocation2 + $0xb8] sm:$0xff]  ;;  %v4335_v23 = vor.u32 %v4333_v46, %v4331_v26 }
 0x2b3   : > { %7545 = vmatmul.mubr.msk.bf16.gmra.mrb[212].mxu1 %vm262_vm1, %v9039_v44  ;;  %7591 = vmatmul.mubr.msk.bf16.gmra.mrb[248].mxu0 %vm262_vm1, %v8935_v0  ;;  %v4353_v10 = vshll.u32 %v4159_v9, 16 }
 0x2b4   : > { %9869 = vst [vmem:[#allocation6_spill] sm:$0xff] %v9036_v32  ;;  %7548 = vmatprep.mubr.msk.bf16.mxu1 %vm262_vm1, %v9046_v3  ;;  %7594 = vmatprep.mubr.msk.bf16.mxu0 %vm262_vm1, %v8942_v60  ;;  %v4347_v53 = vrot.slane %v4345_v24, 1  ;;  %v9065_v46 = vsel %vm4176_vm4, %v4335_v23, %v4339_v50  ;;  %v4160_v24 = vld [vmem:[#allocation2 + $0xc0] sm:$0xff] }
 0x2b5   : > { %v4361_v36 = vshll.u32 %v4160_v24, 16 }
 0x2b6   : > { %v7306_v48 = vpop.f32.mrb[108].mxu1  ;;  %v7352_v5 = vpop.f32.mrb[144].mxu0 }
 0x2b7   : > { %v2896_v45 = vpop.f32.mrb[109].mxu1  ;;  %v3238_v49 = vpop.f32.mrb[145].mxu0  ;;  %v4351_v48 = vor.u32 %v4349_v61, %v4347_v53 }
 0x2b8   : > { %v9053_v42 = vadd.f32 %v2896_v45, %v8780_v51  ;;  %v9056_v25 = vadd.f32 %v3238_v49, %v8923_v40  ;;  %v7307_v37 = vpop.f32.mrb[110].mxu1  ;;  %v7353_v38 = vpop.f32.mrb[146].mxu0  ;;  %v9072_v51 = vsel %vm4176_vm4, %v4343_v31, %v4347_v53  ;;  %v4355_v40 = vrot.slane %v4353_v10, 1 }
 0x2b9   : > { %v2899_v17 = vpop.f32.mrb[111].mxu1  ;;  %v3241_v32 = vpop.f32.mrb[147].mxu0  ;;  %v4162_v38 = vld [vmem:[#allocation2 + $0xd0] sm:$0xff] }
 0x2ba   : > { %9870 = vst [vmem:[#allocation8_spill] sm:$0xff] %v9056_v25  ;;  %v9059_v4 = vadd.f32 %v2899_v17, %v8786_v2  ;;  %v9062_v26 = vadd.f32 %v3241_v32, %v8929_v16  ;;  %v4357_v2 = vshrl.u32 %v4159_v9, 16  ;;  %v4161_v16 = vld [vmem:[#allocation2 + $0xc8] sm:$0xff]  ;;  %v4363_v25 = vrot.slane %v4361_v36, 1 }
 0x2bb   : > { %7549 = vmatmul.mubr.msk.bf16.gmra.mrb[216].mxu1 %vm262_vm1, %v9065_v46  ;;  %7595 = vmatmul.mubr.msk.bf16.gmra.mrb[252].mxu0 %vm262_vm1, %v8961_v8  ;;  %v4369_v49 = vshll.u32 %v4161_v16, 16  ;;  %v9091_v61 = vsel %vm4176_vm4, %v4351_v48, %v4355_v40  ;;  %v4373_v36 = vshrl.u32 %v4161_v16, 16 }
 0x2bc   : > { %9871 = vst [vmem:[#allocation9_spill] sm:$0xff] %v9062_v26  ;;  %7552 = vmatprep.mubr.msk.bf16.mxu1 %vm262_vm1, %v9072_v51  ;;  %7598 = vmatprep.mubr.msk.bf16.mxu0 %vm262_vm1, %v8968_v34  ;;  %v4359_v45 = vor.u32 %v4357_v2, %v4355_v40 }
 0x2bd   : > { %v4371_v2 = vrot.slane %v4369_v49, 1 }
 0x2be   : > { %v7310_v32 = vpop.f32.mrb[112].mxu1  ;;  %v7356_v50 = vpop.f32.mrb[148].mxu0 }
 0x2bf   : > { %v2912_v5 = vpop.f32.mrb[113].mxu1  ;;  %v3254_v23 = vpop.f32.mrb[149].mxu0 }
 0x2c0   : > { %v9079_v31 = vadd.f32 %v2912_v5, %v8800_v20  ;;  %v9082_v9 = vadd.f32 %v3254_v23, %v8949_v33  ;;  %v7311_v10 = vpop.f32.mrb[114].mxu1  ;;  %v7357_v37 = vpop.f32.mrb[150].mxu0  ;;  %v4365_v20 = vshrl.u32 %v4160_v24, 16  ;;  %v9098_v33 = vsel %vm4176_vm4, %v4359_v45, %v4363_v25 }
 0x2c1   : > { %v2915_v17 = vpop.f32.mrb[115].mxu1  ;;  %v3257_v26 = vpop.f32.mrb[151].mxu0  ;;  %v4375_v5 = vor.u32 %v4373_v36, %v4371_v2  ;;  %v4381_v36 = vshrl.u32 %v4162_v38, 16 }
 0x2c2   : > { %9872 = vst [vmem:[#allocation11_spill] sm:$0xff] %v9082_v9  ;;  %v9085_v32 = vadd.f32 %v2915_v17, %v8807_v35  ;;  %v9088_v53 = vadd.f32 %v3257_v26, %v8955_v39  ;;  %v4377_v35 = vshll.u32 %v4162_v38, 16  ;;  %v4163_v39 = vld [vmem:[#allocation2 + $0xd8] sm:$0xff]  ;;  %v4367_v40 = vor.u32 %v4365_v20, %v4363_v25 }
 0x2c3   : > { %7553 = vmatmul.mubr.msk.bf16.gmra.mrb[220].mxu1 %vm262_vm1, %v9091_v61  ;;  %7599 = vmatmul.mubr.msk.bf16.gmra.mrb[0].mxu0 %vm262_vm1, %v8987_v12  ;;  %v4385_v10 = vshll.u32 %v4163_v39, 16 }
 0x2c4   : > { %9873 = vst [vmem:[#allocation10_spill] sm:$0xff] %v9088_v53  ;;  %7556 = vmatprep.mubr.msk.bf16.mxu1 %vm262_vm1, %v9098_v33  ;;  %7602 = vmatprep.mubr.msk.bf16.mxu0 %vm262_vm1, %v8994_v22  ;;  %v4379_v23 = vrot.slane %v4377_v35, 1  ;;  %v9117_v20 = vsel %vm4176_vm4, %v4367_v40, %v4371_v2  ;;  %v4164_v35 = vld [vmem:[#allocation2 + $0xe0] sm:$0xff] }
 0x2c5   : > { %v4393_v38 = vshll.u32 %v4164_v35, 16 }
 0x2c6   : > { %v7360_v26 = vpop.f32.mrb[152].mxu0  ;;  %v7382_v24 = vpop.f32.mrb[116].mxu1 }
 0x2c7   : > { %v3270_v50 = vpop.f32.mrb[153].mxu0  ;;  %v3456_v48 = vpop.f32.mrb[117].mxu1  ;;  %v4383_v26 = vor.u32 %v4381_v36, %v4379_v23 }
 0x2c8   : > { %v9105_v45 = vadd.f32 %v3270_v50, %v8975_v21  ;;  %v9108_v16 = vadd.f32 %v3456_v48, %v8823_v13  ;;  %v7361_v49 = vpop.f32.mrb[154].mxu0  ;;  %v7383_v37 = vpop.f32.mrb[118].mxu1  ;;  %v9124_v13 = vsel %vm4176_vm4, %v4375_v5, %v4379_v23  ;;  %v4387_v21 = vrot.slane %v4385_v10, 1 }
 0x2c9   : > { %v3273_v17 = vpop.f32.mrb[155].mxu0  ;;  %v3459_v53 = vpop.f32.mrb[119].mxu1  ;;  %v4166_v37 = vld [vmem:[#allocation2 + $0xf0] sm:$0xff] }
 0x2ca   : > { %9874 = vst [vmem:[#allocation12_spill] sm:$0xff] %v9105_v45  ;;  %v9111_v9 = vadd.f32 %v3273_v17, %v8981_v47  ;;  %v9114_v25 = vadd.f32 %v3459_v53, %v8831_v30  ;;  %v4389_v47 = vshrl.u32 %v4163_v39, 16  ;;  %v4165_v30 = vld [vmem:[#allocation2 + $0xe8] sm:$0xff]  ;;  %v4395_v45 = vrot.slane %v4393_v38, 1 }
 0x2cb   : > { %7557 = vmatmul.mubr.msk.bf16.gmra.mrb[224].mxu1 %vm262_vm1, %v9117_v20  ;;  %7603 = vmatmul.mubr.msk.bf16.gmra.mrb[4].mxu0 %vm262_vm1, %v9013_v6  ;;  %v4401_v48 = vshll.u32 %v4165_v30, 16  ;;  %v9143_v36 = vsel %vm4176_vm4, %v4383_v26, %v4387_v21  ;;  %v4405_v38 = vshrl.u32 %v4165_v30, 16 }
 0x2cc   : > { %9875 = vst [vmem:[#allocation13_spill] sm:$0xff] %v9111_v9  ;;  %7560 = vmatprep.mubr.msk.bf16.mxu1 %vm262_vm1, %v9124_v13  ;;  %7606 = vmatprep.mubr.msk.bf16.mxu0 %vm262_vm1, %v9020_v29  ;;  %v4391_v50 = vor.u32 %v4389_v47, %v4387_v21 }
 0x2cd   : > { %v4403_v47 = vrot.slane %v4401_v48, 1 }
 0x2ce   : > { %v7364_v53 = vpop.f32.mrb[156].mxu0  ;;  %v7386_v2 = vpop.f32.mrb[120].mxu1 }
 0x2cf   : > { %v3286_v24 = vpop.f32.mrb[157].mxu0  ;;  %v3472_v40 = vpop.f32.mrb[121].mxu1 }
 0x2d0   : > { %v9131_v5 = vadd.f32 %v3286_v24, %v9001_v27  ;;  %v9134_v39 = vadd.f32 %v3472_v40, %v8848_v56  ;;  %v7365_v10 = vpop.f32.mrb[158].mxu0  ;;  %v7387_v49 = vpop.f32.mrb[122].mxu1  ;;  %v4397_v27 = vshrl.u32 %v4164_v35, 16  ;;  %v9150_v56 = vsel %vm4176_vm4, %v4391_v50, %v4395_v45 }
 0x2d1   : > { %v3289_v17 = vpop.f32.mrb[159].mxu0  ;;  %v3475_v9 = vpop.f32.mrb[123].mxu1  ;;  %v4407_v24 = vor.u32 %v4405_v38, %v4403_v47  ;;  %v4413_v38 = vshrl.u32 %v4166_v37, 16 }
 0x2d2   : > { %9876 = vst [vmem:[#allocation14_spill] sm:$0xff] %v9131_v5  ;;  %v9137_v53 = vadd.f32 %v3289_v17, %v9007_v7  ;;  %v9140_v23 = vadd.f32 %v3475_v9, %v8854_v43  ;;  %v4409_v7 = vshll.u32 %v4166_v37, 16  ;;  %v4167_v43 = vld [vmem:[#allocation2 + $0xf8] sm:$0xff]  ;;  %v4399_v21 = vor.u32 %v4397_v27, %v4395_v45 }
 0x2d3   : > { %7561 = vmatmul.mubr.msk.bf16.gmra.mrb[228].mxu1 %vm262_vm1, %v9143_v36  ;;  %7607 = vmatmul.mubr.msk.bf16.gmra.mrb[8].mxu0 %vm262_vm1, %v9039_v44  ;;  %v4417_v10 = vshll.u32 %v4167_v43, 16 }
 0x2d4   : > { %9877 = vst [vmem:[#allocation15_spill] sm:$0xff] %v9137_v53  ;;  %7564 = vmatprep.mubr.msk.bf16.mxu1 %vm262_vm1, %v9150_v56  ;;  %7610 = vmatprep.mubr.msk.bf16.mxu0 %vm262_vm1, %v9046_v3  ;;  %v4411_v40 = vrot.slane %v4409_v7, 1  ;;  %v9169_v27 = vsel %vm4176_vm4, %v4399_v21, %v4403_v47  ;;  %v4168_v7 = vld [vmem:[#allocation2 + $0x100] sm:$0xff] }
 0x2d6   : > { %v7368_v9 = vpop.f32.mrb[160].mxu0  ;;  %v7390_v35 = vpop.f32.mrb[124].mxu1  ;;  %v4415_v47 = vor.u32 %v4413_v38, %v4411_v40 }
 0x2d7   : > { %v3302_v2 = vpop.f32.mrb[161].mxu0  ;;  %v3488_v26 = vpop.f32.mrb[125].mxu1 }
 0x2d8   : > { %v9157_v50 = vadd.f32 %v3302_v2, %v9027_v54  ;;  %v9160_v30 = vadd.f32 %v3488_v26, %v8874_v55  ;;  %v7369_v48 = vpop.f32.mrb[162].mxu0  ;;  %v7391_v49 = vpop.f32.mrb[126].mxu1  ;;  %v9176_v55 = vsel %vm4176_vm4, %v4407_v24, %v4411_v40  ;;  %v4419_v54 = vrot.slane %v4417_v10, 1 }
 0x2d9   : > { %v3305_v17 = vpop.f32.mrb[163].mxu0  ;;  %v3491_v53 = vpop.f32.mrb[127].mxu1 }
 0x2da   : > { %v9163_v5 = vadd.f32 %v3305_v17, %v9033_v59  ;;  %v9166_v45 = vadd.f32 %v3491_v53, %v8880_v14  ;;  %v4421_v59 = vshrl.u32 %v4167_v43, 16  ;;  %v4425_v14 = vshll.u32 %v4168_v7, 16  ;;  %v9188_v17 = vld [vmem:[#allocation2 + $0x108] sm:$0xff] }
 0x2db   : > { %7565 = vmatmul.mubr.msk.bf16.gmra.mrb[232].mxu1 %vm262_vm1, %v9169_v27  ;;  %7611 = vmatmul.mubr.msk.bf16.gmra.mrb[12].mxu0 %vm262_vm1, %v9065_v46  ;;  %v9197_v38 = vsel %vm4176_vm4, %v4415_v47, %v4419_v54 }
 0x2dc   : > { %7568 = vmatprep.mubr.msk.bf16.mxu1 %vm262_vm1, %v9176_v55  ;;  %7614 = vmatprep.mubr.msk.bf16.mxu0 %vm262_vm1, %v9072_v51  ;;  %v4423_v21 = vor.u32 %v4421_v59, %v4419_v54  ;;  %v4427_v49 = vrot.slane %v4425_v14, 1 }
 0x2de   : > { %v7372_v37 = vpop.f32.mrb[164].mxu0  ;;  %v7394_v53 = vpop.f32.mrb[128].mxu1 }
 0x2df   : > { %v3318_v9 = vpop.f32.mrb[165].mxu0  ;;  %v3504_v35 = vpop.f32.mrb[129].mxu1 }
 0x2e0   : > { %v9183_v2 = vadd.f32 %v3318_v9, %v9053_v42  ;;  %v9186_v26 = vadd.f32 %v3504_v35, %v8900_v18  ;;  %v7373_v43 = vpop.f32.mrb[166].mxu0  ;;  %v7395_v24 = vpop.f32.mrb[130].mxu1  ;;  %v4429_v42 = vshrl.u32 %v4168_v7, 16  ;;  %v9204_v18 = vsel %vm4176_vm4, %v4423_v21, %v4427_v49 }
 0x2e1   : > { %v3321_v10 = vpop.f32.mrb[167].mxu0  ;;  %v3507_v48 = vpop.f32.mrb[131].mxu1 }
 0x2e2   : > { %v9191_v37 = vadd.f32 %v3321_v10, %v9059_v4  ;;  %v9194_v40 = vadd.f32 %v3507_v48, %v8906_v1  ;;  %v4433_v1 = vshll.u32 %v9188_v17, 16  ;;  %v4431_v7 = vor.u32 %v4429_v42, %v4427_v49 }
 0x2e3   : > { %7569 = vmatmul.mubr.msk.bf16.gmra.mrb[236].mxu1 %vm262_vm1, %v9197_v38  ;;  %7615 = vmatmul.mubr.msk.bf16.gmra.mrb[16].mxu0 %vm262_vm1, %v9091_v61 }
 0x2e4   : > { %7572 = vmatprep.mubr.msk.bf16.mxu1 %vm262_vm1, %v9204_v18  ;;  %7618 = vmatprep.mubr.msk.bf16.mxu0 %vm262_vm1, %v9098_v33  ;;  %v9217_v21 = vrot.slane %v4433_v1, 1 }
 0x2e6   : > { %v7376_v4 = vpop.f32.mrb[168].mxu0  ;;  %v7398_v54 = vpop.f32.mrb[132].mxu1  ;;  %v9227_v49 = vsel %vm4176_vm4, %v4431_v7, %v9217_v21 }
 0x2e7   : > { %v3334_v59 = vpop.f32.mrb[169].mxu0  ;;  %v3520_v14 = vpop.f32.mrb[133].mxu1 }
 0x2e8   : > { %v9212_v53 = vadd.f32 %v3334_v59, %v9079_v31  ;;  %v9215_v47 = vadd.f32 %v3520_v14, %v8926_v28  ;;  %v7377_v9 = vpop.f32.mrb[170].mxu0  ;;  %v7399_v35 = vpop.f32.mrb[134].mxu1 }
 0x2e9   : > { %v3337_v43 = vpop.f32.mrb[171].mxu0  ;;  %v3523_v24 = vpop.f32.mrb[135].mxu1 }
 0x2ea   : > { %v9220_v10 = vadd.f32 %v3337_v43, %v9085_v32  ;;  %v9223_v48 = vadd.f32 %v3523_v24, %v8932_v15 }
 0x2eb   : > { %7573 = vmatmul.mubr.msk.bf16.gmra.mrb[240].mxu1 %vm262_vm1, %v9227_v49  ;;  %7619 = vmatmul.mubr.msk.bf16.gmra.mrb[20].mxu0 %vm262_vm1, %v9117_v20 }
 0x2ec   : > { %7622 = vmatprep.mubr.msk.bf16.mxu0 %vm262_vm1, %v9124_v13  ;;  %7644 = vmatprep.mubr.msk.bf16.mxu1 %vm262_vm1, %v8864_v63 }
 0x2ee   : > { %v7402_v28 = vpop.f32.mrb[136].mxu1  ;;  %v7448_v31 = vpop.f32.mrb[172].mxu0 }
 0x2ef   : > { %v3536_v15 = vpop.f32.mrb[137].mxu1  ;;  %v3818_v32 = vpop.f32.mrb[173].mxu0  ;;  %v9878_v31 = vld [vmem:[#allocation3_spill] sm:$0xff] }
 0x2f0   : > { %v9238_v42 = vadd.f32 %v3536_v15, %v8952_v52  ;;  %v9241_v1 = vadd.f32 %v3818_v32, %v9108_v16  ;;  %v7403_v4 = vpop.f32.mrb[138].mxu1  ;;  %v7449_v54 = vpop.f32.mrb[174].mxu0 }
 0x2f1   : > { %v3539_v7 = vpop.f32.mrb[139].mxu1  ;;  %v3821_v59 = vpop.f32.mrb[175].mxu0  ;;  %v9879_v54 = vld [vmem:[#allocation4_spill] sm:$0xff] }
 0x2f2   : > { %v9244_v14 = vadd.f32 %v3539_v7, %v8958_v41  ;;  %v9247_v9 = vadd.f32 %v3821_v59, %v9114_v25 }
 0x2f3   : > { %7623 = vmatmul.mubr.msk.bf16.gmra.mrb[24].mxu0 %vm262_vm1, %v9143_v36  ;;  %7645 = vmatmul.mubr.msk.bf16.vlgmr.msra.gmra.mrb[244].mxu1 %vm262_vm1, %v8883_v58 }
 0x2f4   : > { %7626 = vmatprep.mubr.msk.bf16.mxu0 %vm262_vm1, %v9150_v56  ;;  %7648 = vmatprep.mubr.msk.bf16.mxu1 %vm262_vm1, %v8890_v11 }
 0x2f6   : > { %v7406_v63 = vpop.f32.mrb[140].mxu1  ;;  %v7452_v52 = vpop.f32.mrb[176].mxu0 }
 0x2f7   : > { %v3552_v16 = vpop.f32.mrb[141].mxu1  ;;  %v3834_v41 = vpop.f32.mrb[177].mxu0  ;;  %v4170_v52 = vld [vmem:[#allocation2 + $0x110] sm:$0xff] }
 0x2f8   : > { %v9258_v35 = vadd.f32 %v3552_v16, %v8978_v57  ;;  %v9261_v25 = vadd.f32 %v3834_v41, %v9134_v39  ;;  %v7407_v43 = vpop.f32.mrb[142].mxu1  ;;  %v7453_v24 = vpop.f32.mrb[178].mxu0  ;;  %v9880_v41 = vld [vmem:[#allocation5_spill] sm:$0xff] }
 0x2f9   : > { %v3555_v28 = vpop.f32.mrb[143].mxu1  ;;  %v3837_v58 = vpop.f32.mrb[179].mxu0  ;;  %v4895_v24 = vshll.u32 %v4170_v52, 16 }
 0x2fa   : > { %v9264_v15 = vadd.f32 %v3555_v28, %v9878_v31  ;;  %v9267_v32 = vadd.f32 %v3837_v58, %v9140_v23  ;;  %v9298_v28 = vld [vmem:[#allocation2 + $0x118] sm:$0xff] }
 0x2fb   : > { %7627 = vmatmul.mubr.msk.bf16.gmra.mrb[28].mxu0 %vm262_vm1, %v9169_v27  ;;  %7649 = vmatmul.mubr.msk.bf16.gmra.mrb[248].mxu1 %vm262_vm1, %v8909_v19 }
 0x2fc   : > { %7630 = vmatprep.mubr.msk.bf16.mxu0 %vm262_vm1, %v9176_v55  ;;  %7652 = vmatprep.mubr.msk.bf16.mxu1 %vm262_vm1, %v8916_v62 }
 0x2fe   : > { %v7410_v11 = vpop.f32.mrb[144].mxu1  ;;  %v7456_v57 = vpop.f32.mrb[180].mxu0 }
 0x2ff   : > { %v3568_v39 = vpop.f32.mrb[145].mxu1  ;;  %v3850_v4 = vpop.f32.mrb[181].mxu0 }
 0x300   : > { %v9278_v7 = vadd.f32 %v3568_v39, %v9879_v54  ;;  %v9281_v23 = vadd.f32 %v3850_v4, %v9160_v30  ;;  %v7411_v59 = vpop.f32.mrb[146].mxu1  ;;  %v7457_v63 = vpop.f32.mrb[182].mxu0  ;;  %v4891_v30 = vshrl.u32 %v9188_v17, 16  ;;  %v4897_v39 = vrot.slane %v4895_v24, 1  ;;  %v9881_v4 = vld [vmem:[#allocation7_spill] sm:$0xff] }
 0x301   : > { %v3571_v19 = vpop.f32.mrb[147].mxu1  ;;  %v3853_v16 = vpop.f32.mrb[183].mxu0  ;;  %v4899_v63 = vshrl.u32 %v4170_v52, 16 }
 0x302   : > { %v9284_v43 = vadd.f32 %v3571_v19, %v9880_v41  ;;  %v9287_v62 = vadd.f32 %v3853_v16, %v9166_v45  ;;  %v4893_v57 = vor.u32 %v4891_v30, %v9217_v21  ;;  %v9882_v41 = vld [vmem:[#allocation6_spill] sm:$0xff] }
 0x303   : > { %7631 = vmatmul.mubr.msk.bf16.gmra.mrb[32].mxu0 %vm262_vm1, %v9197_v38  ;;  %7653 = vmatmul.mubr.msk.bf16.gmra.mrb[252].mxu1 %vm262_vm1, %v8935_v0  ;;  %v4901_v21 = vor.u32 %v4899_v63, %v4897_v39 }
 0x304   : > { %7634 = vmatprep.mubr.msk.bf16.mxu0 %vm262_vm1, %v9204_v18  ;;  %7656 = vmatprep.mubr.msk.bf16.mxu1 %vm262_vm1, %v8942_v60  ;;  %v4903_v60 = vshll.u32 %v9298_v28, 16 }
 0x306   : > { %v7414_v58 = vpop.f32.mrb[148].mxu1  ;;  %v7460_v45 = vpop.f32.mrb[184].mxu0  ;;  %v9321_v52 = vrot.slane %v4903_v60, 1  ;;  %v9884_v60 = vld [vmem:[#allocation9_spill] sm:$0xff] }
 0x307   : > { %v3584_v31 = vpop.f32.mrb[149].mxu1  ;;  %v3866_v11 = vpop.f32.mrb[185].mxu0 }
 0x308   : > { %v9302_v0 = vadd.f32 %v3584_v31, %v9881_v4  ;;  %v9305_v17 = vadd.f32 %v3866_v11, %v9186_v26  ;;  %v7415_v54 = vpop.f32.mrb[150].mxu1  ;;  %v7461_v59 = vpop.f32.mrb[186].mxu0  ;;  %v9319_v26 = vsel %vm4176_vm4, %v4893_v57, %v4897_v39  ;;  %v9329_v11 = vsel %vm4176_vm4, %v4901_v21, %v9321_v52 }
 0x309   : > { %v3587_v19 = vpop.f32.mrb[151].mxu1  ;;  %v3869_v16 = vpop.f32.mrb[187].mxu0 }
 0x30a   : > { %v9309_v58 = vadd.f32 %v3587_v19, %v9882_v41  ;;  %v9312_v45 = vadd.f32 %v3869_v16, %v9194_v40 }
 0x30b   : > { %7635 = vmatmul.mubr.msk.bf16.gmra.mrb[36].mxu0 %vm262_vm1, %v9227_v49  ;;  %7657 = vmatmul.mubr.msk.bf16.gmra.mrb[0].mxu1 %vm262_vm1, %v8961_v8  ;;  %v9883_v8 = vld [vmem:[#allocation8_spill] sm:$0xff] }
 0x30c   : > { %7638 = vmatprep.mubr.msk.bf16.mxu0 %vm262_vm1, %v9319_v26  ;;  %7660 = vmatprep.mubr.msk.bf16.mxu1 %vm262_vm1, %v8968_v34 }
 0x30e   : > { %v7418_v40 = vpop.f32.mrb[152].mxu1  ;;  %v7464_v30 = vpop.f32.mrb[188].mxu0 }
 0x30f   : > { %v3600_v24 = vpop.f32.mrb[153].mxu1  ;;  %v3882_v31 = vpop.f32.mrb[189].mxu0  ;;  %v9885_v40 = vld [vmem:[#allocation11_spill] sm:$0xff] }
 0x310   : > { %v9332_v57 = vadd.f32 %v3600_v24, %v9883_v8  ;;  %v9335_v39 = vadd.f32 %v3882_v31, %v9215_v47  ;;  %v7419_v4 = vpop.f32.mrb[154].mxu1  ;;  %v7465_v54 = vpop.f32.mrb[190].mxu0 }
 0x311   : > { %v3603_v59 = vpop.f32.mrb[155].mxu1  ;;  %v3885_v63 = vpop.f32.mrb[191].mxu0  ;;  %v9886_v54 = vld [vmem:[#allocation10_spill] sm:$0xff] }
 0x312   : > { %v9338_v34 = vadd.f32 %v3603_v59, %v9884_v60  ;;  %v9341_v19 = vadd.f32 %v3885_v63, %v9223_v48 }
 0x313   : > { %7639 = vmatmul.mubr.msk.bf16.gmra.mrb[40].mxu0 %vm262_vm1, %v9329_v11  ;;  %7661 = vmatmul.mubr.msk.bf16.gmra.mrb[4].mxu1 %vm262_vm1, %v8987_v12 }
 0x314   : > { %7664 = vmatprep.mubr.msk.bf16.mxu1 %vm262_vm1, %v8994_v22 }
 0x316   : > { %v7422_v47 = vpop.f32.mrb[156].mxu1  ;;  %v7468_v16 = vpop.f32.mrb[192].mxu0 }
 0x317   : > { %v3616_v41 = vpop.f32.mrb[157].mxu1  ;;  %v3898_v21 = vpop.f32.mrb[193].mxu0  ;;  %v9887_v47 = vld [vmem:[#allocation12_spill] sm:$0xff] }
 0x318   : > { %v9350_v30 = vadd.f32 %v3616_v41, %v9885_v40  ;;  %v9353_v24 = vadd.f32 %v3898_v21, %v9238_v42  ;;  %v7423_v48 = vpop.f32.mrb[158].mxu1  ;;  %v7469_v31 = vpop.f32.mrb[194].mxu0 }
 0x319   : > { %v3619_v8 = vpop.f32.mrb[159].mxu1  ;;  %v3901_v4 = vpop.f32.mrb[195].mxu0  ;;  %v9888_v31 = vld [vmem:[#allocation13_spill] sm:$0xff] }
 0x31a   : > { %v9356_v59 = vadd.f32 %v3619_v8, %v9886_v54  ;;  %v9359_v12 = vadd.f32 %v3901_v4, %v9244_v14 }
 0x31b   : > { %7665 = vmatmul.mubr.msk.bf16.gmra.mrb[8].mxu1 %vm262_vm1, %v9013_v6 }
 0x31c   : > { %7668 = vmatprep.mubr.msk.bf16.mxu1 %vm262_vm1, %v9020_v29 }
 0x31e   : > { %v7426_v22 = vpop.f32.mrb[160].mxu1  ;;  %v7472_v63 = vpop.f32.mrb[196].mxu0 }
 0x31f   : > { %v3632_v42 = vpop.f32.mrb[161].mxu1  ;;  %v3914_v60 = vpop.f32.mrb[197].mxu0  ;;  %v9889_v22 = vld [vmem:[#allocation14_spill] sm:$0xff] }
 0x320   : > { %v9366_v16 = vadd.f32 %v3632_v42, %v9887_v47  ;;  %v9369_v41 = vadd.f32 %v3914_v60, %v9258_v35  ;;  %v7427_v21 = vpop.f32.mrb[162].mxu1  ;;  %v7473_v40 = vpop.f32.mrb[198].mxu0 }
 0x321   : > { %v3635_v14 = vpop.f32.mrb[163].mxu1  ;;  %v3917_v48 = vpop.f32.mrb[199].mxu0  ;;  %v9890_v40 = vld [vmem:[#allocation15_spill] sm:$0xff] }
 0x322   : > { %v9372_v8 = vadd.f32 %v3635_v14, %v9888_v31  ;;  %v9375_v6 = vadd.f32 %v3917_v48, %v9264_v15 }
 0x323   : > { %7669 = vmatmul.mubr.msk.bf16.gmra.mrb[12].mxu1 %vm262_vm1, %v9039_v44 }
 0x324   : > { %7672 = vmatprep.mubr.msk.bf16.mxu1 %vm262_vm1, %v9046_v3 }
 0x326   : > { %v7430_v29 = vpop.f32.mrb[164].mxu1  ;;  %v7476_v4 = vpop.f32.mrb[200].mxu0 }
 0x327   : > { %v3648_v35 = vpop.f32.mrb[165].mxu1  ;;  %v3930_v54 = vpop.f32.mrb[201].mxu0 }
 0x328   : > { %v9382_v63 = vadd.f32 %v3648_v35, %v9889_v22  ;;  %v9385_v42 = vadd.f32 %v3930_v54, %v9278_v7  ;;  %v7431_v60 = vpop.f32.mrb[166].mxu1  ;;  %v7477_v47 = vpop.f32.mrb[202].mxu0 }
 0x329   : > { %v3651_v15 = vpop.f32.mrb[167].mxu1  ;;  %v3933_v21 = vpop.f32.mrb[203].mxu0 }
 0x32a   : > { %v9388_v14 = vadd.f32 %v3651_v15, %v9890_v40  ;;  %v9391_v44 = vadd.f32 %v3933_v21, %v9284_v43 }
 0x32b   : > { %7673 = vmatmul.mubr.msk.bf16.gmra.mrb[16].mxu1 %vm262_vm1, %v9065_v46 }
 0x32c   : > { %7676 = vmatprep.mubr.msk.bf16.mxu1 %vm262_vm1, %v9072_v51 }
 0x32e   : > { %v7434_v3 = vpop.f32.mrb[168].mxu1  ;;  %v7480_v48 = vpop.f32.mrb[204].mxu0 }
 0x32f   : > { %v3664_v7 = vpop.f32.mrb[169].mxu1  ;;  %v3946_v31 = vpop.f32.mrb[205].mxu0 }
 0x330   : > { %v9398_v29 = vadd.f32 %v3664_v7, %v9157_v50  ;;  %v9401_v4 = vadd.f32 %v3946_v31, %v9302_v0  ;;  %v7435_v35 = vpop.f32.mrb[170].mxu1  ;;  %v7481_v54 = vpop.f32.mrb[206].mxu0 }
 0x331   : > { %v3667_v43 = vpop.f32.mrb[171].mxu1  ;;  %v3949_v22 = vpop.f32.mrb[207].mxu0 }
 0x332   : > { %v9404_v60 = vadd.f32 %v3667_v43, %v9163_v5  ;;  %v9407_v46 = vadd.f32 %v3949_v22, %v9309_v58 }
 0x333   : > { %7677 = vmatmul.mubr.msk.bf16.gmra.mrb[20].mxu1 %vm262_vm1, %v9091_v61 }
 0x334   : > { %7680 = vmatprep.mubr.msk.bf16.mxu1 %vm262_vm1, %v9098_v33 }
 0x336   : > { %v7438_v51 = vpop.f32.mrb[172].mxu1  ;;  %v7484_v50 = vpop.f32.mrb[208].mxu0 }
 0x337   : > { %v3680_v0 = vpop.f32.mrb[173].mxu1  ;;  %v3962_v47 = vpop.f32.mrb[209].mxu0 }
 0x338   : > { %v9414_v15 = vadd.f32 %v3680_v0, %v9183_v2  ;;  %v9417_v21 = vadd.f32 %v3962_v47, %v9332_v57  ;;  %v7439_v5 = vpop.f32.mrb[174].mxu1  ;;  %v7485_v40 = vpop.f32.mrb[210].mxu0 }
 0x339   : > { %v3683_v58 = vpop.f32.mrb[175].mxu1  ;;  %v3965_v3 = vpop.f32.mrb[211].mxu0 }
 0x33a   : > { %v9420_v48 = vadd.f32 %v3683_v58, %v9191_v37  ;;  %v9423_v61 = vadd.f32 %v3965_v3, %v9338_v34 }
 0x33b   : > { %7681 = vmatmul.mubr.msk.bf16.gmra.mrb[24].mxu1 %vm262_vm1, %v9117_v20 }
 0x33c   : > { %7684 = vmatprep.mubr.msk.bf16.mxu1 %vm262_vm1, %v9124_v13 }
 0x33e   : > { %v7442_v33 = vpop.f32.mrb[176].mxu1  ;;  %v7488_v2 = vpop.f32.mrb[212].mxu0 }
 0x33f   : > { %v3696_v57 = vpop.f32.mrb[177].mxu1  ;;  %v3978_v7 = vpop.f32.mrb[213].mxu0 }
 0x340   : > { %v9430_v31 = vadd.f32 %v3696_v57, %v9212_v53  ;;  %v9433_v35 = vadd.f32 %v3978_v7, %v9350_v30  ;;  %v7443_v37 = vpop.f32.mrb[178].mxu1  ;;  %v7489_v54 = vpop.f32.mrb[214].mxu0 }
 0x341   : > { %v3699_v34 = vpop.f32.mrb[179].mxu1  ;;  %v3981_v43 = vpop.f32.mrb[215].mxu0 }
 0x342   : > { %v9436_v22 = vadd.f32 %v3699_v34, %v9220_v10  ;;  %v9439_v20 = vadd.f32 %v3981_v43, %v9356_v59 }
 0x343   : > { %7685 = vmatmul.mubr.msk.bf16.gmra.mrb[28].mxu1 %vm262_vm1, %v9143_v36 }
 0x344   : > { %7688 = vmatprep.mubr.msk.bf16.mxu1 %vm262_vm1, %v9150_v56 }
 0x346   : > { %v7492_v13 = vpop.f32.mrb[216].mxu0  ;;  %v7514_v53 = vpop.f32.mrb[180].mxu1 }
 0x347   : > { %v3994_v30 = vpop.f32.mrb[217].mxu0  ;;  %v4570_v51 = vpop.f32.mrb[181].mxu1 }
 0x348   : > { %v9446_v50 = vadd.f32 %v3994_v30, %v9366_v16  ;;  %v9449_v0 = vadd.f32 %v4570_v51, %v9241_v1  ;;  %v7493_v10 = vpop.f32.mrb[218].mxu0  ;;  %v7515_v47 = vpop.f32.mrb[182].mxu1 }
 0x349   : > { %v3997_v59 = vpop.f32.mrb[219].mxu0  ;;  %v4573_v5 = vpop.f32.mrb[183].mxu1 }
 0x34a   : > { %v9452_v40 = vadd.f32 %v3997_v59, %v9372_v8  ;;  %v9455_v36 = vadd.f32 %v4573_v5, %v9247_v9 }
 0x34b   : > { %7689 = vmatmul.mubr.msk.bf16.gmra.mrb[32].mxu1 %vm262_vm1, %v9169_v27 }
 0x34c   : > { %7692 = vmatprep.mubr.msk.bf16.mxu1 %vm262_vm1, %v9176_v55 }
 0x34e   : > { %v7496_v56 = vpop.f32.mrb[220].mxu0  ;;  %v7518_v16 = vpop.f32.mrb[184].mxu1 }
 0x34f   : > { %v4010_v1 = vpop.f32.mrb[221].mxu0  ;;  %v4586_v58 = vpop.f32.mrb[185].mxu1 }
 0x350   : > { %v9462_v3 = vadd.f32 %v4010_v1, %v9382_v63  ;;  %v9465_v33 = vadd.f32 %v4586_v58, %v9261_v25  ;;  %v7497_v8 = vpop.f32.mrb[222].mxu0  ;;  %v7519_v2 = vpop.f32.mrb[186].mxu1  ;;  %v4172_v25 = vld [vmem:[#allocation2 + $0x120] sm:$0xff] }
 0x351   : > { %v4013_v9 = vpop.f32.mrb[223].mxu0  ;;  %v4589_v57 = vpop.f32.mrb[187].mxu1  ;;  %v5275_v30 = vshll.u32 %v4172_v25, 16 }
 0x352   : > { %v9468_v7 = vadd.f32 %v4013_v9, %v9388_v14  ;;  %v9471_v27 = vadd.f32 %v4589_v57, %v9267_v32 }
 0x353   : > { %7693 = vmatmul.mubr.msk.bf16.gmra.mrb[36].mxu1 %vm262_vm1, %v9197_v38  ;;  %v5271_v38 = vshrl.u32 %v9298_v28, 16  ;;  %v5277_v10 = vrot.slane %v5275_v30, 1 }
 0x354   : > { %7696 = vmatprep.mubr.msk.bf16.mxu1 %vm262_vm1, %v9204_v18 }
 0x356   : > { %v7500_v55 = vpop.f32.mrb[224].mxu0  ;;  %v7522_v63 = vpop.f32.mrb[188].mxu1 }
 0x357   : > { %v4026_v37 = vpop.f32.mrb[225].mxu0  ;;  %v4602_v54 = vpop.f32.mrb[189].mxu1 }
 0x358   : > { %v9478_v34 = vadd.f32 %v4026_v37, %v9398_v29  ;;  %v9481_v14 = vadd.f32 %v4602_v54, %v9281_v23  ;;  %v7501_v43 = vpop.f32.mrb[226].mxu0  ;;  %v7523_v32 = vpop.f32.mrb[190].mxu1  ;;  %v4173_v23 = vld [vmem:[#allocation2 + $0x128] sm:$0x1]  ;;  %v5273_v29 = vor.u32 %v5271_v38, %v9321_v52 }
 0x359   : > { %v4029_v13 = vpop.f32.mrb[227].mxu0  ;;  %v4605_v53 = vpop.f32.mrb[191].mxu1  ;;  %v5283_v1 = vshll.u32 %v4173_v23, 16 }
 0x35a   : > { %v9485_v18 = vadd.f32 %v4029_v13, %v9404_v60  ;;  %v9488_v51 = vadd.f32 %v4605_v53, %v9287_v62  ;;  %v5278_v8 = vsel %vm4176_vm4, %v5273_v29, %v5277_v10 }
 0x35b   : > { %7697 = vmatmul.mubr.msk.bf16.gmra.mrb[40].mxu1 %vm262_vm1, %v9227_v49  ;;  %v5279_v49 = vshrl.u32 %v4172_v25, 16 }
 0x35c   : > { %7700 = vmatprep.mubr.msk.bf16.mxu1 %vm262_vm1, %v9319_v26 }
 0x35e   : > { %v7504_v47 = vpop.f32.mrb[228].mxu0  ;;  %v7526_v59 = vpop.f32.mrb[192].mxu1 }
 0x35f   : > { %v4042_v28 = vpop.f32.mrb[229].mxu0  ;;  %v4618_v5 = vpop.f32.mrb[193].mxu1 }
 0x360   : > { %v9496_v60 = vadd.f32 %v4042_v28, %v9414_v15  ;;  %v9499_v62 = vadd.f32 %v4618_v5, %v9305_v17  ;;  %v7505_v56 = vpop.f32.mrb[230].mxu0  ;;  %v7527_v16 = vpop.f32.mrb[194].mxu1  ;;  %v5281_v15 = vor.u32 %v5279_v49, %v5277_v10  ;;  %v5285_v17 = vrot.slane %v5283_v1, 1 }
 0x361   : > { %v4045_v58 = vpop.f32.mrb[231].mxu0  ;;  %v4621_v26 = vpop.f32.mrb[195].mxu1 }
 0x362   : > { %v9503_v52 = vadd.f32 %v4045_v58, %v9420_v48  ;;  %v9506_v2 = vadd.f32 %v4621_v26, %v9312_v45  ;;  %v5286_v45 = vsel %vm4176_vm4, %v5281_v15, %v5285_v17 }
 0x363   : > { %7701 = vmatmul.mubr.msk.bf16.gmra.mrb[44].mxu1 %vm262_vm1, %v9329_v11 }
 0x364   : > { %7704 = vmatprep.mubr.msk.bf16.mxu1 %vm262_vm1, %v5278_v8 }
 0x366   : > { %v7508_v9 = vpop.f32.mrb[232].mxu0  ;;  %v7530_v57 = vpop.f32.mrb[196].mxu1 }
 0x367   : > { %v4058_v55 = vpop.f32.mrb[233].mxu0  ;;  %v4634_v63 = vpop.f32.mrb[197].mxu1 }
 0x368   : > { %v9512_v25 = vadd.f32 %v4058_v55, %v9430_v31  ;;  %v4841_v48 = vadd.f32 %v4634_v63, %v9335_v39  ;;  %v7509_v37 = vpop.f32.mrb[234].mxu0  ;;  %v7531_v54 = vpop.f32.mrb[198].mxu1 }
 0x369   : > { %v4061_v43 = vpop.f32.mrb[235].mxu0  ;;  %v4637_v32 = vpop.f32.mrb[199].mxu1 }
 0x36a   : > { %v9517_v11 = vadd.f32 %v4061_v43, %v9436_v22  ;;  %v4842_v13 = vadd.f32 %v4637_v32, %v9341_v19 }
 0x36b   : > { %7705 = vmatmul.mubr.msk.bf16.gmra.mrb[48].mxu1 %vm262_vm1, %v5286_v45 }
 0x36e   : > { %v7534_v53 = vpop.f32.mrb[200].mxu1  ;;  %v7580_v38 = vpop.f32.mrb[236].mxu0 }
 0x36f   : > { %v4650_v30 = vpop.f32.mrb[201].mxu1  ;;  %v4950_v31 = vpop.f32.mrb[237].mxu0 }
 0x370   : > { %v4845_v23 = vadd.f32 %v4650_v30, %v9353_v24  ;;  %v9523_v39 = vadd.f32 %v4950_v31, %v9449_v0  ;;  %v7535_v29 = vpop.f32.mrb[202].mxu1  ;;  %v7581_v10 = vpop.f32.mrb[238].mxu0 }
 0x371   : > { %v4653_v47 = vpop.f32.mrb[203].mxu1  ;;  %v4953_v59 = vpop.f32.mrb[239].mxu0 }
 0x372   : > { %v4846_v22 = vadd.f32 %v4653_v47, %v9359_v12  ;;  %v9527_v28 = vadd.f32 %v4953_v59, %v9455_v36 }
 0x376   : > { %v7538_v19 = vpop.f32.mrb[204].mxu1  ;;  %v7584_v5 = vpop.f32.mrb[240].mxu0 }
 0x377   : > { %v4666_v56 = vpop.f32.mrb[205].mxu1  ;;  %v4966_v16 = vpop.f32.mrb[241].mxu0 }
 0x378   : > { %v4849_v49 = vadd.f32 %v4666_v56, %v9369_v41  ;;  %v9531_v24 = vadd.f32 %v4966_v16, %v9465_v33  ;;  %v7539_v0 = vpop.f32.mrb[206].mxu1  ;;  %v7585_v1 = vpop.f32.mrb[242].mxu0 }
 0x379   : > { %v4669_v58 = vpop.f32.mrb[207].mxu1  ;;  %v4969_v26 = vpop.f32.mrb[243].mxu0 }
 0x37a   : > { %v4850_v8 = vadd.f32 %v4669_v58, %v9375_v6  ;;  %v9535_v12 = vadd.f32 %v4969_v26, %v9471_v27 }
 0x37e   : > { %v7542_v36 = vpop.f32.mrb[208].mxu1  ;;  %v7588_v15 = vpop.f32.mrb[244].mxu0 }
 0x37f   : > { %v4682_v17 = vpop.f32.mrb[209].mxu1  ;;  %v4982_v9 = vpop.f32.mrb[245].mxu0 }
 0x380   : > { %v4853_v57 = vadd.f32 %v4682_v17, %v9385_v42  ;;  %v9539_v41 = vadd.f32 %v4982_v9, %v9481_v14  ;;  %v7543_v33 = vpop.f32.mrb[210].mxu1  ;;  %v7589_v55 = vpop.f32.mrb[246].mxu0 }
 0x381   : > { %v4685_v63 = vpop.f32.mrb[211].mxu1  ;;  %v4985_v37 = vpop.f32.mrb[247].mxu0 }
 0x382   : > { %v4854_v54 = vadd.f32 %v4685_v63, %v9391_v44  ;;  %v9543_v6 = vadd.f32 %v4985_v37, %v9488_v51 }
 0x386   : > { %v7546_v27 = vpop.f32.mrb[212].mxu1  ;;  %v7592_v45 = vpop.f32.mrb[248].mxu0 }
 0x387   : > { %v4698_v43 = vpop.f32.mrb[213].mxu1  ;;  %v4998_v32 = vpop.f32.mrb[249].mxu0 }
 0x388   : > { %v4857_v53 = vadd.f32 %v4698_v43, %v9401_v4  ;;  %v9547_v42 = vadd.f32 %v4998_v32, %v9499_v62  ;;  %v7547_v14 = vpop.f32.mrb[214].mxu1  ;;  %v7593_v38 = vpop.f32.mrb[250].mxu0 }
 0x389   : > { %v4701_v30 = vpop.f32.mrb[215].mxu1  ;;  %v5001_v31 = vpop.f32.mrb[251].mxu0 }
 0x38a   : > { %v4858_v29 = vadd.f32 %v4701_v30, %v9407_v46  ;;  %v9551_v44 = vadd.f32 %v5001_v31, %v9506_v2 }
 0x38e   : > { %v7550_v51 = vpop.f32.mrb[216].mxu1  ;;  %v7596_v10 = vpop.f32.mrb[252].mxu0 }
 0x38f   : > { %v4714_v47 = vpop.f32.mrb[217].mxu1  ;;  %v5014_v59 = vpop.f32.mrb[253].mxu0 }
 0x390   : > { %v4861_v19 = vadd.f32 %v4714_v47, %v9417_v21  ;;  %v9554_v5 = vadd.f32 %v5014_v59, %v4841_v48  ;;  %v7551_v4 = vpop.f32.mrb[218].mxu1  ;;  %v7597_v62 = vpop.f32.mrb[254].mxu0 }
 0x391   : > { %v4717_v56 = vpop.f32.mrb[219].mxu1  ;;  %v5017_v16 = vpop.f32.mrb[255].mxu0 }
 0x392   : > { %v4862_v0 = vadd.f32 %v4717_v56, %v9423_v61  ;;  %v9557_v1 = vadd.f32 %v5017_v16, %v4842_v13 }
 0x396   : > { %v7554_v46 = vpop.f32.mrb[220].mxu1  ;;  %v7600_v58 = vpop.f32.mrb[0].mxu0 }
 0x397   : > { %v4730_v2 = vpop.f32.mrb[221].mxu1  ;;  %v5030_v26 = vpop.f32.mrb[1].mxu0 }
 0x398   : > { %v4865_v36 = vadd.f32 %v4730_v2, %v9433_v35  ;;  %v9560_v15 = vadd.f32 %v5030_v26, %v4845_v23  ;;  %v7555_v17 = vpop.f32.mrb[222].mxu1  ;;  %v7601_v21 = vpop.f32.mrb[2].mxu0 }
 0x399   : > { %v4733_v48 = vpop.f32.mrb[223].mxu1  ;;  %v5033_v9 = vpop.f32.mrb[3].mxu0 }
 0x39a   : > { %v4866_v33 = vadd.f32 %v4733_v48, %v9439_v20  ;;  %v9563_v55 = vadd.f32 %v5033_v9, %v4846_v22 }
 0x39e   : > { %v7558_v63 = vpop.f32.mrb[224].mxu1  ;;  %v7604_v61 = vpop.f32.mrb[4].mxu0 }
 0x39f   : > { %v4746_v13 = vpop.f32.mrb[225].mxu1  ;;  %v5046_v37 = vpop.f32.mrb[5].mxu0 }
 0x3a0   : > { %v4869_v27 = vadd.f32 %v4746_v13, %v9446_v50  ;;  %v9566_v45 = vadd.f32 %v5046_v37, %v4849_v49  ;;  %v7559_v43 = vpop.f32.mrb[226].mxu1  ;;  %v7605_v35 = vpop.f32.mrb[6].mxu0 }
 0x3a1   : > { %v4749_v23 = vpop.f32.mrb[227].mxu1  ;;  %v5049_v32 = vpop.f32.mrb[7].mxu0 }
 0x3a2   : > { %v4870_v14 = vadd.f32 %v4749_v23, %v9452_v40  ;;  %v9569_v38 = vadd.f32 %v5049_v32, %v4850_v8 }
 0x3a6   : > { %v7562_v30 = vpop.f32.mrb[228].mxu1  ;;  %v7608_v20 = vpop.f32.mrb[8].mxu0 }
 0x3a7   : > { %v4762_v22 = vpop.f32.mrb[229].mxu1  ;;  %v5062_v31 = vpop.f32.mrb[9].mxu0 }
 0x3a8   : > { %v9572_v51 = vadd.f32 %v4762_v22, %v9462_v3  ;;  %v9574_v10 = vadd.f32 %v5062_v31, %v4853_v57  ;;  %v7563_v50 = vpop.f32.mrb[230].mxu1  ;;  %v7609_v49 = vpop.f32.mrb[10].mxu0 }
 0x3a9   : > { %v4765_v47 = vpop.f32.mrb[231].mxu1  ;;  %v5065_v59 = vpop.f32.mrb[11].mxu0 }
 0x3aa   : > { %v9577_v4 = vadd.f32 %v4765_v47, %v9468_v7  ;;  %v9579_v62 = vadd.f32 %v5065_v59, %v4854_v54 }
 0x3ae   : > { %v7566_v40 = vpop.f32.mrb[232].mxu1  ;;  %v7612_v8 = vpop.f32.mrb[12].mxu0 }
 0x3af   : > { %v4778_v56 = vpop.f32.mrb[233].mxu1  ;;  %v5078_v16 = vpop.f32.mrb[13].mxu0 }
 0x3b0   : > { %v9582_v46 = vadd.f32 %v4778_v56, %v9478_v34  ;;  %v9584_v3 = vadd.f32 %v5078_v16, %v4857_v53  ;;  %v7567_v57 = vpop.f32.mrb[234].mxu1  ;;  %v7613_v58 = vpop.f32.mrb[14].mxu0 }
 0x3b1   : > { %v4781_v2 = vpop.f32.mrb[235].mxu1  ;;  %v5081_v26 = vpop.f32.mrb[15].mxu0 }
 0x3b2   : > { %v9587_v17 = vadd.f32 %v4781_v2, %v9485_v18  ;;  %v9589_v7 = vadd.f32 %v5081_v26, %v4858_v29 }
 0x3b6   : > { %v7570_v54 = vpop.f32.mrb[236].mxu1  ;;  %v7616_v21 = vpop.f32.mrb[16].mxu0 }
 0x3b7   : > { %v4794_v48 = vpop.f32.mrb[237].mxu1  ;;  %v5094_v9 = vpop.f32.mrb[17].mxu0 }
 0x3b8   : > { %v9592_v63 = vadd.f32 %v4794_v48, %v9496_v60  ;;  %v9594_v34 = vadd.f32 %v5094_v9, %v4861_v19  ;;  %v7571_v53 = vpop.f32.mrb[238].mxu1  ;;  %v7617_v61 = vpop.f32.mrb[18].mxu0 }
 0x3b9   : > { %v4797_v13 = vpop.f32.mrb[239].mxu1  ;;  %v5097_v37 = vpop.f32.mrb[19].mxu0 }
 0x3ba   : > { %v9597_v43 = vadd.f32 %v4797_v13, %v9503_v52  ;;  %v9599_v18 = vadd.f32 %v5097_v37, %v4862_v0 }
 0x3be   : > { %v7574_v29 = vpop.f32.mrb[240].mxu1  ;;  %v7620_v35 = vpop.f32.mrb[20].mxu0 }
 0x3bf   : > { %v4810_v23 = vpop.f32.mrb[241].mxu1  ;;  %v5110_v32 = vpop.f32.mrb[21].mxu0 }
 0x3c0   : > { %v9602_v30 = vadd.f32 %v4810_v23, %v9512_v25  ;;  %v9604_v60 = vadd.f32 %v5110_v32, %v4865_v36  ;;  %v7575_v19 = vpop.f32.mrb[242].mxu1  ;;  %v7621_v20 = vpop.f32.mrb[22].mxu0  ;;  %v9614_v25 = vld [vmem:[%s9822_s4] ss:$0 sm:$0xff] }
 0x3c1   : > { %v4813_v22 = vpop.f32.mrb[243].mxu1  ;;  %v5113_v31 = vpop.f32.mrb[23].mxu0 }
 0x3c2   : > { %v9607_v50 = vadd.f32 %v4813_v22, %v9517_v11  ;;  %v9609_v52 = vadd.f32 %v5113_v31, %v4866_v33 }
 0x3c6   : > { %v7624_v0 = vpop.f32.mrb[24].mxu0  ;;  %v7646_v49 = vpop.f32.mrb[244].mxu1 }
 0x3c7   : > { %v5126_v47 = vpop.f32.mrb[25].mxu0  ;;  %v5330_v59 = vpop.f32.mrb[245].mxu1 }
 0x3c8   : > { %v9616_v36 = vadd.f32 %v5126_v47, %v4869_v27  ;;  %v5585_v40 = vadd.f32 %v5330_v59, %v9523_v39  ;;  %v7625_v8 = vpop.f32.mrb[26].mxu0  ;;  %v7647_v56 = vpop.f32.mrb[246].mxu1 }
 0x3c9   : > { %v5129_v11 = vpop.f32.mrb[27].mxu0  ;;  %v5333_v16 = vpop.f32.mrb[247].mxu1 }
 0x3ca   : > { %v5656_v33 = vadd.f32 %v9614_v25, %v5585_v40  ;;  %v9620_v57 = vadd.f32 %v5129_v11, %v4870_v14  ;;  %v5586_v58 = vadd.f32 %v5333_v16, %v9527_v28 }
 0x3cc   : > { %v5720_v2 = vmax.f32 %v5656_v33, 0.0  ;;  %v5657_v26 = vadd.f32 %v9614_v25, %v5586_v58 }
 0x3ce   : > { %v6731_v39 = vpack.c.bf16 %v5720_v2, %v5720_v2  ;;  %v5721_v27 = vmax.f32 %v5657_v26, 0.0  ;;  %v7628_v54 = vpop.f32.mrb[28].mxu0  ;;  %v7650_v21 = vpop.f32.mrb[248].mxu1  ;;  %v5976_v14 = vsel %vm262_vm1, %v5720_v2, 0.0 }
 0x3cf   : > { %v5142_v48 = vpop.f32.mrb[29].mxu0  ;;  %v5346_v28 = vpop.f32.mrb[249].mxu1 }
 0x3d0   : > { %6134 = vst.msk [vmem:[%s9629_s10] sm:$0xf] %vm6133_vm5, %v6731_v39  ;;  %v5977_v9 = vsel %vm262_vm1, %v5721_v27, 0.0  ;;  %v6732_v53 = vpack.c.bf16 %v5721_v27, %v5721_v27  ;;  %v9636_v61 = vadd.f32 %v5142_v48, %v9572_v51  ;;  %v5589_v13 = vadd.f32 %v5346_v28, %v9531_v24  ;;  %v7629_v37 = vpop.f32.mrb[30].mxu0  ;;  %v7651_v29 = vpop.f32.mrb[250].mxu1 }
 0x3d1   : > { %v5978_v35 = vadd.f32 %v5977_v9, %v5976_v14  ;;  %v5145_v23 = vpop.f32.mrb[31].mxu0  ;;  %v5349_v32 = vpop.f32.mrb[251].mxu1 }
 0x3d2   : > { %6135 = vst.msk [vmem:[%s9629_s10 + $0x4] sm:$0xf] %vm6133_vm5, %v6732_v53  ;;  %v5660_v19 = vadd.f32 %v9614_v25, %v5589_v13  ;;  %v9643_v20 = vadd.f32 %v5145_v23, %v9577_v4  ;;  %v5590_v22 = vadd.f32 %v5349_v32, %v9535_v12 }
 0x3d4   : > { %v5724_v31 = vmax.f32 %v5660_v19, 0.0  ;;  %v5661_v51 = vadd.f32 %v9614_v25, %v5590_v22 }
 0x3d6   : > { %v5983_v24 = vsel %vm262_vm1, %v5724_v31, 0.0  ;;  %v6733_v0 = vpack.c.bf16 %v5724_v31, %v5724_v31  ;;  %v5725_v49 = vmax.f32 %v5661_v51, 0.0  ;;  %v7632_v47 = vpop.f32.mrb[32].mxu0  ;;  %v7654_v59 = vpop.f32.mrb[252].mxu1 }
 0x3d7   : > { %v5984_v40 = vadd.f32 %v5983_v24, %v5978_v35  ;;  %v5158_v8 = vpop.f32.mrb[33].mxu0  ;;  %v5362_v56 = vpop.f32.mrb[253].mxu1 }
 0x3d8   : > { %6143 = vst.msk [vmem:[%s9629_s10 + $0x8] sm:$0xf] %vm6133_vm5, %v6733_v0  ;;  %v5985_v4 = vsel %vm262_vm1, %v5725_v49, 0.0  ;;  %v6734_v11 = vpack.c.bf16 %v5725_v49, %v5725_v49  ;;  %v9652_v12 = vadd.f32 %v5158_v8, %v9582_v46  ;;  %v5593_v16 = vadd.f32 %v5362_v56, %v9539_v41  ;;  %v7633_v33 = vpop.f32.mrb[34].mxu0  ;;  %v7655_v58 = vpop.f32.mrb[254].mxu1 }
 0x3d9   : > { %v5986_v2 = vadd.f32 %v5985_v4, %v5984_v40  ;;  %v5161_v26 = vpop.f32.mrb[35].mxu0  ;;  %v5365_v39 = vpop.f32.mrb[255].mxu1 }
 0x3da   : > { %6144 = vst.msk [vmem:[%s9629_s10 + $0xc] sm:$0xf] %vm6133_vm5, %v6734_v11  ;;  %v5664_v27 = vadd.f32 %v9614_v25, %v5593_v16  ;;  %v9659_v54 = vadd.f32 %v5161_v26, %v9587_v17  ;;  %v5594_v21 = vadd.f32 %v5365_v39, %v9543_v6 }
 0x3dc   : > { %v5728_v14 = vmax.f32 %v5664_v27, 0.0  ;;  %v5665_v46 = vadd.f32 %v9614_v25, %v5594_v21 }
 0x3de   : > { %v5991_v41 = vsel %vm262_vm1, %v5728_v14, 0.0  ;;  %v6735_v48 = vpack.c.bf16 %v5728_v14, %v5728_v14  ;;  %v5729_v28 = vmax.f32 %v5665_v46, 0.0  ;;  %v7636_v9 = vpop.f32.mrb[36].mxu0  ;;  %v7658_v53 = vpop.f32.mrb[0].mxu1 }
 0x3df   : > { %v5992_v13 = vadd.f32 %v5991_v41, %v5986_v2  ;;  %v5174_v37 = vpop.f32.mrb[37].mxu0  ;;  %v5378_v29 = vpop.f32.mrb[1].mxu1 }
 0x3e0   : > { %6152 = vst.msk [vmem:[%s9629_s10 + $0x10] sm:$0xf] %vm6133_vm5, %v6735_v48  ;;  %v5993_v17 = vsel %vm262_vm1, %v5729_v28, 0.0  ;;  %v6736_v35 = vpack.c.bf16 %v5729_v28, %v5729_v28  ;;  %v9668_v6 = vadd.f32 %v5174_v37, %v9592_v63  ;;  %v5597_v23 = vadd.f32 %v5378_v29, %v9547_v42  ;;  %v7637_v32 = vpop.f32.mrb[38].mxu0  ;;  %v7659_v19 = vpop.f32.mrb[2].mxu1 }
 0x3e1   : > { %v5994_v22 = vadd.f32 %v5993_v17, %v5992_v13  ;;  %v5177_v31 = vpop.f32.mrb[39].mxu0  ;;  %v5381_v51 = vpop.f32.mrb[3].mxu1 }
 0x3e2   : > { %6153 = vst.msk [vmem:[%s9629_s10 + $0x14] sm:$0xf] %vm6133_vm5, %v6736_v35  ;;  %v5668_v24 = vadd.f32 %v9614_v25, %v5597_v23  ;;  %v9675_v0 = vadd.f32 %v5177_v31, %v9597_v43  ;;  %v5598_v49 = vadd.f32 %v5381_v51, %v9551_v44 }
 0x3e4   : > { %v5732_v47 = vmax.f32 %v5668_v24, 0.0  ;;  %v5669_v63 = vadd.f32 %v9614_v25, %v5598_v49 }
 0x3e6   : > { %v5999_v42 = vsel %vm262_vm1, %v5732_v47, 0.0  ;;  %v6737_v59 = vpack.c.bf16 %v5732_v47, %v5732_v47  ;;  %v5733_v40 = vmax.f32 %v5669_v63, 0.0  ;;  %v7640_v8 = vpop.f32.mrb[40].mxu0  ;;  %v7662_v56 = vpop.f32.mrb[4].mxu1 }
 0x3e7   : > { %v6000_v4 = vadd.f32 %v5999_v42, %v5994_v22  ;;  %v5190_v11 = vpop.f32.mrb[41].mxu0  ;;  %v5394_v16 = vpop.f32.mrb[5].mxu1 }
 0x3e8   : > { %6161 = vst.msk [vmem:[%s9629_s10 + $0x18] sm:$0xf] %vm6133_vm5, %v6737_v59  ;;  %v6001_v43 = vsel %vm262_vm1, %v5733_v40, 0.0  ;;  %v6738_v33 = vpack.c.bf16 %v5733_v40, %v5733_v40  ;;  %v9684_v44 = vadd.f32 %v5190_v11, %v9602_v30  ;;  %v5601_v58 = vadd.f32 %v5394_v16, %v9554_v5  ;;  %v7641_v2 = vpop.f32.mrb[42].mxu0  ;;  %v7663_v26 = vpop.f32.mrb[6].mxu1 }
 0x3e9   : > { %v6002_v39 = vadd.f32 %v6001_v43, %v6000_v4  ;;  %v5193_v27 = vpop.f32.mrb[43].mxu0  ;;  %v5397_v21 = vpop.f32.mrb[7].mxu1 }
 0x3ea   : > { %6162 = vst.msk [vmem:[%s9629_s10 + $0x1c] sm:$0xf] %vm6133_vm5, %v6738_v33  ;;  %v5672_v14 = vadd.f32 %v9614_v25, %v5601_v58  ;;  %v9691_v46 = vadd.f32 %v5193_v27, %v9607_v50  ;;  %v5602_v41 = vadd.f32 %v5397_v21, %v9557_v1 }
 0x3ec   : > { %v5736_v30 = vmax.f32 %v5672_v14, 0.0  ;;  %v5673_v48 = vadd.f32 %v9614_v25, %v5602_v41 }
 0x3ee   : > { %v6007_v5 = vsel %vm262_vm1, %v5736_v30, 0.0  ;;  %v6739_v28 = vpack.c.bf16 %v5736_v30, %v5736_v30  ;;  %v5737_v9 = vmax.f32 %v5673_v48, 0.0  ;;  %v7666_v53 = vpop.f32.mrb[8].mxu1 }
 0x3ef   : > { %v6008_v13 = vadd.f32 %v6007_v5, %v6002_v39  ;;  %v5410_v37 = vpop.f32.mrb[9].mxu1 }
 0x3f0   : > { %6170 = vst.msk [vmem:[%s9629_s10 + $0x20] sm:$0xf] %vm6133_vm5, %v6739_v28  ;;  %v6009_v29 = vsel %vm262_vm1, %v5737_v9, 0.0  ;;  %v6740_v17 = vpack.c.bf16 %v5737_v9, %v5737_v9  ;;  %v5605_v50 = vadd.f32 %v5410_v37, %v9560_v15  ;;  %v7667_v1 = vpop.f32.mrb[10].mxu1 }
 0x3f1   : > { %v6010_v35 = vadd.f32 %v6009_v29, %v6008_v13  ;;  %v5413_v23 = vpop.f32.mrb[11].mxu1 }
 0x3f2   : > { %6171 = vst.msk [vmem:[%s9629_s10 + $0x24] sm:$0xf] %vm6133_vm5, %v6740_v17  ;;  %v5676_v32 = vadd.f32 %v9614_v25, %v5605_v50  ;;  %v5606_v19 = vadd.f32 %v5413_v23, %v9563_v55 }
 0x3f4   : > { %v5740_v22 = vmax.f32 %v5676_v32, 0.0  ;;  %v5677_v31 = vadd.f32 %v9614_v25, %v5606_v19 }
 0x3f6   : > { %v6015_v51 = vsel %vm262_vm1, %v5740_v22, 0.0  ;;  %v6741_v24 = vpack.c.bf16 %v5740_v22, %v5740_v22  ;;  %v5741_v49 = vmax.f32 %v5677_v31, 0.0  ;;  %v7670_v47 = vpop.f32.mrb[12].mxu1 }
 0x3f7   : > { %v6016_v63 = vadd.f32 %v6015_v51, %v6010_v35  ;;  %v5426_v15 = vpop.f32.mrb[13].mxu1 }
 0x3f8   : > { %6179 = vst.msk [vmem:[%s9629_s10 + $0x28] sm:$0xf] %vm6133_vm5, %v6741_v24  ;;  %v6017_v42 = vsel %vm262_vm1, %v5741_v49, 0.0  ;;  %v6742_v59 = vpack.c.bf16 %v5741_v49, %v5741_v49  ;;  %v5609_v40 = vadd.f32 %v5426_v15, %v9566_v45  ;;  %v7671_v55 = vpop.f32.mrb[14].mxu1 }
 0x3f9   : > { %v6018_v8 = vadd.f32 %v6017_v42, %v6016_v63  ;;  %v5429_v56 = vpop.f32.mrb[15].mxu1 }
 0x3fa   : > { %6180 = vst.msk [vmem:[%s9629_s10 + $0x2c] sm:$0xf] %vm6133_vm5, %v6742_v59  ;;  %v5680_v4 = vadd.f32 %v9614_v25, %v5609_v40  ;;  %v5610_v11 = vadd.f32 %v5429_v56, %v9569_v38 }
 0x3fc   : > { %v5744_v16 = vmax.f32 %v5680_v4, 0.0  ;;  %v5681_v43 = vadd.f32 %v9614_v25, %v5610_v11 }
 0x3fe   : > { %v6023_v33 = vsel %vm262_vm1, %v5744_v16, 0.0  ;;  %v6743_v58 = vpack.c.bf16 %v5744_v16, %v5744_v16  ;;  %v5745_v2 = vmax.f32 %v5681_v43, 0.0  ;;  %v7674_v26 = vpop.f32.mrb[16].mxu1 }
 0x3ff   : > { %v6024_v39 = vadd.f32 %v6023_v33, %v6018_v8  ;;  %v5442_v45 = vpop.f32.mrb[17].mxu1 }
 0x400   : > { %6188 = vst.msk [vmem:[%s9629_s10 + $0x30] sm:$0xf] %vm6133_vm5, %v6743_v58  ;;  %v6025_v27 = vsel %vm262_vm1, %v5745_v2, 0.0  ;;  %v6744_v21 = vpack.c.bf16 %v5745_v2, %v5745_v2  ;;  %v5613_v14 = vadd.f32 %v5442_v45, %v9574_v10  ;;  %v7675_v38 = vpop.f32.mrb[18].mxu1 }
 0x401   : > { %v6026_v41 = vadd.f32 %v6025_v27, %v6024_v39  ;;  %v5445_v30 = vpop.f32.mrb[19].mxu1 }
 0x402   : > { %6189 = vst.msk [vmem:[%s9629_s10 + $0x34] sm:$0xf] %vm6133_vm5, %v6744_v21  ;;  %v5684_v48 = vadd.f32 %v9614_v25, %v5613_v14  ;;  %v5614_v5 = vadd.f32 %v5445_v30, %v9579_v62 }
 0x404   : > { %v5748_v28 = vmax.f32 %v5684_v48, 0.0  ;;  %v5685_v9 = vadd.f32 %v9614_v25, %v5614_v5 }
 0x406   : > { %v6031_v53 = vsel %vm262_vm1, %v5748_v28, 0.0  ;;  %v6745_v13 = vpack.c.bf16 %v5748_v28, %v5748_v28  ;;  %v5749_v37 = vmax.f32 %v5685_v9, 0.0  ;;  %v7678_v29 = vpop.f32.mrb[20].mxu1 }
 0x407   : > { %v6032_v17 = vadd.f32 %v6031_v53, %v6026_v41  ;;  %v5458_v10 = vpop.f32.mrb[21].mxu1 }
 0x408   : > { %6197 = vst.msk [vmem:[%s9629_s10 + $0x38] sm:$0xf] %vm6133_vm5, %v6745_v13  ;;  %v6033_v50 = vsel %vm262_vm1, %v5749_v37, 0.0  ;;  %v6746_v1 = vpack.c.bf16 %v5749_v37, %v5749_v37  ;;  %v5617_v35 = vadd.f32 %v5458_v10, %v9584_v3  ;;  %v7679_v62 = vpop.f32.mrb[22].mxu1 }
 0x409   : > { %v6034_v23 = vadd.f32 %v6033_v50, %v6032_v17  ;;  %v5461_v32 = vpop.f32.mrb[23].mxu1 }
 0x40a   : > { %6198 = vst.msk [vmem:[%s9629_s10 + $0x3c] sm:$0xf] %vm6133_vm5, %v6746_v1  ;;  %v5688_v19 = vadd.f32 %v9614_v25, %v5617_v35  ;;  %v5618_v22 = vadd.f32 %v5461_v32, %v9589_v7 }
 0x40c   : > { %v5752_v31 = vmax.f32 %v5688_v19, 0.0  ;;  %v5689_v51 = vadd.f32 %v9614_v25, %v5618_v22 }
 0x40e   : > { %v6039_v24 = vsel %vm262_vm1, %v5752_v31, 0.0  ;;  %v6747_v49 = vpack.c.bf16 %v5752_v31, %v5752_v31  ;;  %v5753_v47 = vmax.f32 %v5689_v51, 0.0  ;;  %v7682_v63 = vpop.f32.mrb[24].mxu1 }
 0x40f   : > { %v6040_v15 = vadd.f32 %v6039_v24, %v6034_v23  ;;  %v5474_v3 = vpop.f32.mrb[25].mxu1 }
 0x410   : > { %6206 = vst.msk [vmem:[%s9629_s10 + $0x40] sm:$0xf] %vm6133_vm5, %v6747_v49  ;;  %v6041_v42 = vsel %vm262_vm1, %v5753_v47, 0.0  ;;  %v6748_v59 = vpack.c.bf16 %v5753_v47, %v5753_v47  ;;  %v5621_v40 = vadd.f32 %v5474_v3, %v9594_v34  ;;  %v7683_v7 = vpop.f32.mrb[26].mxu1 }
 0x411   : > { %v6042_v55 = vadd.f32 %v6041_v42, %v6040_v15  ;;  %v5477_v8 = vpop.f32.mrb[27].mxu1 }
 0x412   : > { %6207 = vst.msk [vmem:[%s9629_s10 + $0x44] sm:$0xf] %vm6133_vm5, %v6748_v59  ;;  %v5692_v56 = vadd.f32 %v9614_v25, %v5621_v40  ;;  %v5622_v4 = vadd.f32 %v5477_v8, %v9599_v18 }
 0x414   : > { %v5756_v11 = vmax.f32 %v5692_v56, 0.0  ;;  %v5693_v16 = vadd.f32 %v9614_v25, %v5622_v4 }
 0x416   : > { %v6047_v43 = vsel %vm262_vm1, %v5756_v11, 0.0  ;;  %v6749_v33 = vpack.c.bf16 %v5756_v11, %v5756_v11  ;;  %v5757_v58 = vmax.f32 %v5693_v16, 0.0  ;;  %v7686_v2 = vpop.f32.mrb[28].mxu1 }
 0x417   : > { %v6048_v26 = vadd.f32 %v6047_v43, %v6042_v55  ;;  %v5490_v34 = vpop.f32.mrb[29].mxu1 }
 0x418   : > { %6215 = vst.msk [vmem:[%s9629_s10 + $0x48] sm:$0xf] %vm6133_vm5, %v6749_v33  ;;  %v6049_v39 = vsel %vm262_vm1, %v5757_v58, 0.0  ;;  %v6750_v45 = vpack.c.bf16 %v5757_v58, %v5757_v58  ;;  %v5625_v27 = vadd.f32 %v5490_v34, %v9604_v60  ;;  %v7687_v18 = vpop.f32.mrb[30].mxu1 }
 0x419   : > { %v6050_v21 = vadd.f32 %v6049_v39, %v6048_v26  ;;  %v5493_v14 = vpop.f32.mrb[31].mxu1 }
 0x41a   : > { %6216 = vst.msk [vmem:[%s9629_s10 + $0x4c] sm:$0xf] %vm6133_vm5, %v6750_v45  ;;  %v5696_v38 = vadd.f32 %v9614_v25, %v5625_v27  ;;  %v5626_v41 = vadd.f32 %v5493_v14, %v9609_v52 }
 0x41c   : > { %v5760_v30 = vmax.f32 %v5696_v38, 0.0  ;;  %v5697_v48 = vadd.f32 %v9614_v25, %v5626_v41 }
 0x41e   : > { %v6055_v5 = vsel %vm262_vm1, %v5760_v30, 0.0  ;;  %v6751_v28 = vpack.c.bf16 %v5760_v30, %v5760_v30  ;;  %v5761_v9 = vmax.f32 %v5697_v48, 0.0  ;;  %v7690_v53 = vpop.f32.mrb[32].mxu1 }
 0x41f   : > { %v6056_v13 = vadd.f32 %v6055_v5, %v6050_v21  ;;  %v5506_v60 = vpop.f32.mrb[33].mxu1 }
 0x420   : > { %6224 = vst.msk [vmem:[%s9629_s10 + $0x50] sm:$0xf] %vm6133_vm5, %v6751_v28  ;;  %v6057_v37 = vsel %vm262_vm1, %v5761_v9, 0.0  ;;  %v6752_v29 = vpack.c.bf16 %v5761_v9, %v5761_v9  ;;  %v5629_v17 = vadd.f32 %v5506_v60, %v9616_v36  ;;  %v7691_v52 = vpop.f32.mrb[34].mxu1 }
 0x421   : > { %v6058_v10 = vadd.f32 %v6057_v37, %v6056_v13  ;;  %v5509_v50 = vpop.f32.mrb[35].mxu1 }
 0x422   : > { %6225 = vst.msk [vmem:[%s9629_s10 + $0x54] sm:$0xf] %vm6133_vm5, %v6752_v29  ;;  %v5700_v1 = vadd.f32 %v9614_v25, %v5629_v17  ;;  %v5630_v35 = vadd.f32 %v5509_v50, %v9620_v57 }
 0x424   : > { %v5764_v62 = vmax.f32 %v5700_v1, 0.0  ;;  %v5701_v23 = vadd.f32 %v9614_v25, %v5630_v35 }
 0x426   : > { %v6063_v32 = vsel %vm262_vm1, %v5764_v62, 0.0  ;;  %v6753_v19 = vpack.c.bf16 %v5764_v62, %v5764_v62  ;;  %v5765_v22 = vmax.f32 %v5701_v23, 0.0  ;;  %v7694_v31 = vpop.f32.mrb[36].mxu1 }
 0x427   : > { %v6064_v51 = vadd.f32 %v6063_v32, %v6058_v10  ;;  %v5522_v36 = vpop.f32.mrb[37].mxu1 }
 0x428   : > { %6233 = vst.msk [vmem:[%s9629_s10 + $0x58] sm:$0xf] %vm6133_vm5, %v6753_v19  ;;  %v6065_v24 = vsel %vm262_vm1, %v5765_v22, 0.0  ;;  %v6754_v49 = vpack.c.bf16 %v5765_v22, %v5765_v22  ;;  %v5633_v47 = vadd.f32 %v5522_v36, %v9636_v61  ;;  %v7695_v57 = vpop.f32.mrb[38].mxu1 }
 0x429   : > { %v6066_v63 = vadd.f32 %v6065_v24, %v6064_v51  ;;  %v5525_v15 = vpop.f32.mrb[39].mxu1 }
 0x42a   : > { %6234 = vst.msk [vmem:[%s9629_s10 + $0x5c] sm:$0xf] %vm6133_vm5, %v6754_v49  ;;  %v5704_v3 = vadd.f32 %v9614_v25, %v5633_v47  ;;  %v5634_v42 = vadd.f32 %v5525_v15, %v9643_v20 }
 0x42c   : > { %v5768_v59 = vmax.f32 %v5704_v3, 0.0  ;;  %v5705_v40 = vadd.f32 %v9614_v25, %v5634_v42 }
 0x42e   : > { %v6071_v7 = vsel %vm262_vm1, %v5768_v59, 0.0  ;;  %v6755_v55 = vpack.c.bf16 %v5768_v59, %v5768_v59  ;;  %v5769_v8 = vmax.f32 %v5705_v40, 0.0  ;;  %v7698_v56 = vpop.f32.mrb[40].mxu1 }
 0x42f   : > { %v6072_v4 = vadd.f32 %v6071_v7, %v6066_v63  ;;  %v5538_v61 = vpop.f32.mrb[41].mxu1 }
 0x430   : > { %6242 = vst.msk [vmem:[%s9629_s10 + $0x60] sm:$0xf] %vm6133_vm5, %v6755_v55  ;;  %v6073_v11 = vsel %vm262_vm1, %v5769_v8, 0.0  ;;  %v6756_v16 = vpack.c.bf16 %v5769_v8, %v5769_v8  ;;  %v5637_v43 = vadd.f32 %v5538_v61, %v9652_v12  ;;  %v7699_v20 = vpop.f32.mrb[42].mxu1 }
 0x431   : > { %v6074_v33 = vadd.f32 %v6073_v11, %v6072_v4  ;;  %v5541_v58 = vpop.f32.mrb[43].mxu1 }
 0x432   : > { %6243 = vst.msk [vmem:[%s9629_s10 + $0x64] sm:$0xf] %vm6133_vm5, %v6756_v16  ;;  %v5708_v2 = vadd.f32 %v9614_v25, %v5637_v43  ;;  %v5638_v26 = vadd.f32 %v5541_v58, %v9659_v54 }
 0x434   : > { %v5772_v34 = vmax.f32 %v5708_v2, 0.0  ;;  %v5709_v39 = vadd.f32 %v9614_v25, %v5638_v26 }
 0x436   : > { %v6079_v45 = vsel %vm262_vm1, %v5772_v34, 0.0  ;;  %v6757_v27 = vpack.c.bf16 %v5772_v34, %v5772_v34  ;;  %v5773_v18 = vmax.f32 %v5709_v39, 0.0  ;;  %v7702_v21 = vpop.f32.mrb[44].mxu1 }
 0x437   : > { %v6080_v14 = vadd.f32 %v6079_v45, %v6074_v33  ;;  %v5554_v12 = vpop.f32.mrb[45].mxu1 }
 0x438   : > { %6251 = vst.msk [vmem:[%s9629_s10 + $0x68] sm:$0xf] %vm6133_vm5, %v6757_v27  ;;  %v6081_v38 = vsel %vm262_vm1, %v5773_v18, 0.0  ;;  %v6758_v41 = vpack.c.bf16 %v5773_v18, %v5773_v18  ;;  %v5641_v30 = vadd.f32 %v5554_v12, %v9668_v6  ;;  %v7703_v54 = vpop.f32.mrb[46].mxu1 }
 0x439   : > { %v6082_v48 = vadd.f32 %v6081_v38, %v6080_v14  ;;  %v5557_v5 = vpop.f32.mrb[47].mxu1 }
 0x43a   : > { %6252 = vst.msk [vmem:[%s9629_s10 + $0x6c] sm:$0xf] %vm6133_vm5, %v6758_v41  ;;  %v5712_v28 = vadd.f32 %v9614_v25, %v5641_v30  ;;  %v5642_v9 = vadd.f32 %v5557_v5, %v9675_v0 }
 0x43c   : > { %v5776_v53 = vmax.f32 %v5712_v28, 0.0  ;;  %v5713_v13 = vadd.f32 %v9614_v25, %v5642_v9 }
 0x43e   : > { %v6087_v60 = vsel %vm262_vm1, %v5776_v53, 0.0  ;;  %v6759_v37 = vpack.c.bf16 %v5776_v53, %v5776_v53  ;;  %v5777_v29 = vmax.f32 %v5713_v13, 0.0  ;;  %v7706_v17 = vpop.f32.mrb[48].mxu1 }
 0x43f   : > { %v6088_v52 = vadd.f32 %v6087_v60, %v6082_v48  ;;  %v5570_v6 = vpop.f32.mrb[49].mxu1 }
 0x440   : > { %6260 = vst.msk [vmem:[%s9629_s10 + $0x70] sm:$0xf] %vm6133_vm5, %v6759_v37  ;;  %v6089_v10 = vsel %vm262_vm1, %v5777_v29, 0.0  ;;  %v6760_v50 = vpack.c.bf16 %v5777_v29, %v5777_v29  ;;  %v5645_v1 = vadd.f32 %v5570_v6, %v9684_v44  ;;  %v7707_v0 = vpop.f32.mrb[50].mxu1 }
 0x441   : > { %v6090_v35 = vadd.f32 %v6089_v10, %v6088_v52  ;;  %v5573_v62 = vpop.f32.mrb[51].mxu1 }
 0x442   : > { %6261 = vst.msk [vmem:[%s9629_s10 + $0x74] sm:$0xf] %vm6133_vm5, %v6760_v50  ;;  %v5716_v23 = vadd.f32 %v9614_v25, %v5645_v1  ;;  %v5646_v32 = vadd.f32 %v5573_v62, %v9691_v46 }
 0x444   : > { %v5780_v19 = vmax.f32 %v5716_v23, 0.0  ;;  %v5717_v22 = vadd.f32 %v9614_v25, %v5646_v32 }
 0x446   : > { %v6095_v31 = vsel %vm262_vm1, %v5780_v19, 0.0  ;;  %v6761_v51 = vpack.c.bf16 %v5780_v19, %v5780_v19  ;;  %v5781_v36 = vmax.f32 %v5717_v22, 0.0 }
 0x447   : > { %v6096_v24 = vadd.f32 %v6095_v31, %v6090_v35 }
 0x448   : > { %6269 = vst.msk [vmem:[%s9629_s10 + $0x78] sm:$0xf] %vm6133_vm5, %v6761_v51  ;;  %v6097_v44 = vsel %vm262_vm1, %v5781_v36, 0.0  ;;  %v6762_v49 = vpack.c.bf16 %v5781_v36, %v5781_v36 }
 0x449   : > { %v6098_v47 = vadd.f32 %v6097_v44, %v6096_v24 }
 0x44a   : > { %6270 = vst.msk [vmem:[%s9629_s10 + $0x7c] sm:$0xf] %vm6133_vm5, %v6762_v49 }
 0x44b   : > { %v6103_v57 = vrot.slane %v6098_v47, 4 }
 0x44d   : > { %v6104_v63 = vadd.f32 %v6103_v57, %v6098_v47 }
 0x44f   : > { %v6105_v46 = vrot.slane %v6104_v63, 2 }
 0x451   : > { %v6106_v15 = vadd.f32 %v6105_v46, %v6104_v63 }
 0x453   : > { %v6107_v3 = vrot.slane %v6106_v15, 1 }
 0x455   : > { %v6108_v25 = vadd.f32 %v6107_v3, %v6106_v15 }
 0x457   : > { %v6271_v42 = vmul.f32 0.00390625, %v6108_v25 }
 0x459   : > { %6273 = vst.msk [vmem:[%s260_s12] sm:$0x1] %vm6272_vm6, %v6271_v42 }
 0x45a PF: > { %s17_s21 = sadd.s32 1, %s7760_s21  }
 0x45b   : > { %p14_p4 = scmp.ge.s32.totalorder %s17_s21, 4  }
 0x45d   :  { %16 = sbr.rel (!%p14_p4) target bundleno = 1 (0x1), region = 90 }

</bundles_post_ra>
